<compile_context>
chip_gen: v6e
topology: v6e:2x2x1
jax: 0.10.0
libtpu: 0.0.40
codegen_flags: <defaults>
</compile_context>

<pallas_src>
import jax
import jax.numpy as jnp
from jax import lax
from jax.experimental import pallas as pl
from jax.experimental.pallas import tpu as pltpu

# ----------------------------- sizes (small) ---------------------------------
B, T = 2, 8          # batch, sequence length
V, E = 64, 32        # word vocab, embedding size
K = 8                # number of tags (len(tag2idx))


# --------------------------- fused forward kernel -----------------------------
def ner_fused_kernel(wid_ref, mask_ref, tags_ref, table_ref, start_ref, end_ref,
                     trans_ref, out_ref):
    # Per-block shapes (time-major, batch in lanes):
    #   wid_ref/mask_ref/tags_ref : (T, TB)
    #   table_ref                 : (K, V)   pre-projected (embedding @ enc_w + enc_b).T
    #   start_ref/end_ref         : (K, 1),  trans_ref : (K, K)
    #   out_ref                   : (1, TB)  per-sample NLL (0 for padded rows)
    T_, TB = wid_ref.shape
    K_, V_ = table_ref.shape

    wid = wid_ref[...]            # (T, TB) i32
    maskf = mask_ref[...]         # (T, TB) f32
    tags = tags_ref[...]          # (T, TB) i32
    table = table_ref[...]        # (K, V)
    start = start_ref[...]        # (K, 1) -- broadcasts over batch lanes
    end = end_ref[...]            # (K, 1)
    trans = trans_ref[...]        # (K, K)

    # 2-D iotas, built once (review: no 3-D one-hot + reshape).
    v_iota = lax.broadcasted_iota(jnp.int32, (V_, TB), 0)
    k_iota = lax.broadcasted_iota(jnp.int32, (K_, TB), 0)

    # Loop-invariant broadcast of the transition matrix, hoisted & materialized once.
    trans_btile = jnp.broadcast_to(trans[:, :, None], (K_, K_, TB))    # (Kp, Kn, TB)

    # ---- embedding lookup + encoder projection (one-hot matmul vs (K,V) table) ----
    # emissions[t] = table[:, wid[t, :]]  -> (K, TB), batch-in-lanes.
    # TODO(synk): nn.Embedding would raise on out-of-range ids; the one-hot maps them
    #             to an all-zero row instead.
    em = []    # em[t] : (K, TB) emissions at step t
    oh = []    # oh[t] : (K, TB) one-hot of the gold tag at step t
    for t in range(T_):
        oh_w_t = (v_iota == wid[t:t + 1, :]).astype(jnp.float32)        # (V, TB)
        em.append(jnp.dot(table, oh_w_t, preferred_element_type=jnp.float32))
        oh.append((k_iota == tags[t:t + 1, :]).astype(jnp.float32))

    # ---- numerator: gold-path score (batch in lanes) ------------------------------
    em_sc0 = jnp.sum(oh[0] * em[0], axis=0, keepdims=True)              # (1, TB)
    start_sc = jnp.sum(oh[0] * start, axis=0, keepdims=True)            # (1, TB)
    numer = start_sc + em_sc0
    for t in range(T_):
        # end bonus at the last valid step: is_last[t] = mask[t] * (1 - mask[t+1])
        nxt = maskf[t + 1:t + 2, :] if t + 1 < T_ else jnp.zeros((1, TB), jnp.float32)
        is_last_t = maskf[t:t + 1, :] * (1.0 - nxt)                     # (1, TB)
        end_tag_t = jnp.sum(oh[t] * end, axis=0, keepdims=True)         # (1, TB)
        numer = numer + is_last_t * end_tag_t
        if t >= 1:
            em_sc_t = jnp.sum(oh[t] * em[t], axis=0, keepdims=True)     # (1, TB)
            # trans[tags[t-1], tags[t]] via two small masked reductions (no MXU).
            trans_rows = jnp.sum(trans_btile * oh[t][None, :, :], axis=1)   # (K, TB)
            trans_sc_t = jnp.sum(oh[t - 1] * trans_rows, axis=0, keepdims=True)
            numer = numer + maskf[t:t + 1, :] * (em_sc_t + trans_sc_t)

    # ---- denominator: serial alpha recursion (the only sequential part) -----------
    # alpha : (K, TB) -- batch in lanes; statically unrolled (T is trace-time const).
    alpha = start + em[0]                                               # (K, TB)
    for t in range(1, T_):
        # scores[i, j, b] = alpha[i, b] + trans[i, j] + em_t[j, b]
        scores = alpha[:, None, :] + trans_btile + em[t][None, :, :]    # (K, K, TB)
        mx = jnp.max(scores, axis=0)                                    # (K, TB)
        alpha_new = mx + jnp.log(jnp.sum(jnp.exp(scores - mx[None, :, :]), axis=0))
        keep = maskf[t:t + 1, :] > 0.0                                  # (1, TB)
        alpha = jnp.where(keep, alpha_new, alpha)
    final = alpha + end                                                 # (K, TB)
    fmax = jnp.max(final, axis=0, keepdims=True)                        # (1, TB)
    denom = fmax + jnp.log(jnp.sum(jnp.exp(final - fmax), axis=0, keepdims=True))

    # ---- per-sample NLL; zero out padded rows (mask[:, 0] == 0) --------------------
    out_ref[...] = maskf[0:1, :] * (denom - numer)                       # (1, TB)


# ------------------------------ python wrapper --------------------------------
def ner_forward(params, word_ids, masks, tag_ids, *, block_b=None):
    """Returns the CRF negative log-likelihood loss (scalar), summed over batch."""
    Bn, Tn = word_ids.shape
    Vn, En = params["embedding"].shape
    Kn = params["crf_trans"].shape[0]

    # Grid-invariant pre-projection, computed ONCE outside the kernel.
    # (K, V) layout so in-kernel emissions come out batch-in-lanes; bias folded in.
    table_kv = (params["embedding"].astype(jnp.float32)
                @ params["enc_w"].astype(jnp.float32)
                + params["enc_b"].astype(jnp.float32)[None, :]).T        # (K, V)

    if block_b is None:
        # Per-block VMEM footprint is dominated by the transient (V, TB) one-hot plus
        # O(T*K*TB) emissions -- a few MiB at TB=512. Cap so large batches give the
        # grid several steps (megacore sharding on v7x); small batches stay one block.
        block_b = Bn if Bn <= 512 else 512
    assert Bn % block_b == 0, "pad batch to a multiple of block_b"
    nb = Bn // block_b

    partial = pl.pallas_call(
        ner_fused_kernel,
        out_shape=jax.ShapeDtypeStruct((nb, block_b), jnp.float32),
        grid=(nb,),
        in_specs=[
            pl.BlockSpec((Tn, block_b), lambda i: (0, i)),   # word_ids (time-major)
            pl.BlockSpec((Tn, block_b), lambda i: (0, i)),   # mask     (time-major)
            pl.BlockSpec((Tn, block_b), lambda i: (0, i)),   # tags     (time-major)
            pl.BlockSpec((Kn, Vn), lambda i: (0, 0)),        # (K, V) lookup table
            pl.BlockSpec((Kn, 1), lambda i: (0, 0)),         # crf start
            pl.BlockSpec((Kn, 1), lambda i: (0, 0)),         # crf end
            pl.BlockSpec((Kn, Kn), lambda i: (0, 0)),        # crf transitions
        ],
        out_specs=pl.BlockSpec((1, block_b), lambda i: (i, 0)),
        compiler_params=pltpu.CompilerParams(
            dimension_semantics=("parallel",),
            vmem_limit_bytes=32 * 1024 * 1024),
    )(
        word_ids.T.astype(jnp.int32),
        masks.T.astype(jnp.float32),
        tag_ids.T.astype(jnp.int32),
        table_kv.astype(jnp.float32),
        params["crf_start"].reshape(Kn, 1).astype(jnp.float32),
        params["crf_end"].reshape(Kn, 1).astype(jnp.float32),
        params["crf_trans"].astype(jnp.float32),
    )
    return jnp.sum(partial)


# --------------------------- pure-JAX reference -------------------------------
def ner_forward_ref(params, word_ids, masks, tag_ids):
    emb = jnp.take(params["embedding"], word_ids, axis=0)
    em = emb.astype(jnp.float32) @ params["enc_w"] + params["enc_b"]  # (B, T, K)
    start, end, trans = params["crf_start"], params["crf_end"], params["crf_trans"]
    maskf = masks.astype(jnp.float32)
    bidx = jnp.arange(B)

    score = start[tag_ids[:, 0]] + em[bidx, 0, tag_ids[:, 0]]
    for i in range(1, T):
        score = score + (
            trans[tag_ids[:, i - 1], tag_ids[:, i]] + em[bidx, i, tag_ids[:, i]]
        ) * maskf[:, i]
    seq_ends = masks.sum(axis=1) - 1
    score = score + end[tag_ids[bidx, seq_ends]]

    alpha = start[None, :] + em[:, 0]
    for i in range(1, T):
        ns = alpha[:, :, None] + trans[None] + em[:, i][:, None, :]
        ns = jax.scipy.special.logsumexp(ns, axis=1)
        alpha = jnp.where(maskf[:, i][:, None] > 0, ns, alpha)
    denom = jax.scipy.special.logsumexp(alpha + end[None, :], axis=1)
    return -jnp.sum(score - denom)


# ---------------------------------- main --------------------------------------
if __name__ == "__main__":
    key = jax.random.PRNGKey(0)
    k_emb, k_w, k_b, k_s, k_e, k_t, k_wid, k_tag = jax.random.split(key, 8)

    params = {
        "embedding": jax.random.normal(k_emb, (V, E), jnp.float32) * 0.1,
        "enc_w": jax.random.normal(k_w, (E, K), jnp.float32) * 0.1,
        "enc_b": jax.random.normal(k_b, (K,), jnp.float32) * 0.1,
        "crf_start": jax.random.normal(k_s, (K,), jnp.float32) * 0.1,
        "crf_end": jax.random.normal(k_e, (K,), jnp.float32) * 0.1,
        "crf_trans": jax.random.normal(k_t, (K, K), jnp.float32) * 0.1,
    }

    word_ids = jax.random.randint(k_wid, (B, T), 0, V, dtype=jnp.int32)
    tag_ids = jax.random.randint(k_tag, (B, T), 0, K, dtype=jnp.int32)
    lengths = jnp.array([T, 5], dtype=jnp.int32)                 # left-aligned masks
    masks = (jnp.arange(T)[None, :] < lengths[:, None]).astype(jnp.int32)

    loss = jax.block_until_ready(ner_forward(params, word_ids, masks, tag_ids))
    loss_ref = jax.block_until_ready(ner_forward_ref(params, word_ids, masks, tag_ids))

    assert jnp.isfinite(loss), "non-finite loss"
    assert jnp.allclose(loss, loss_ref, rtol=1e-4, atol=1e-4), (loss, loss_ref)
    print("KERNEL_OK")
</pallas_src>

<mosaic_0001>
module attributes {stable_mosaic.version = 11 : i64} {
  func.func @ner_fused_kernel(%arg0: i32, %arg1: memref<8x2xi32, #tpu.memory_space<vmem>>, %arg2: memref<8x2xf32, #tpu.memory_space<vmem>>, %arg3: memref<8x2xi32, #tpu.memory_space<vmem>>, %arg4: memref<8x64xf32, #tpu.memory_space<vmem>>, %arg5: memref<8x1xf32, #tpu.memory_space<vmem>>, %arg6: memref<8x1xf32, #tpu.memory_space<vmem>>, %arg7: memref<8x8xf32, #tpu.memory_space<vmem>>, %arg8: memref<1x2xf32, #tpu.memory_space<vmem>>) attributes {dimension_semantics = [#tpu.dimension_semantics<parallel>], iteration_bounds = array<i64: 1>, scalar_prefetch = 0 : i64, scratch_operands = 0 : i64, tpu.core_type = #tpu.core_type<tc>, window_params = [{transform_indices = @transform_0, window_bounds = array<i64: 8, 2>}, {transform_indices = @transform_1, window_bounds = array<i64: 8, 2>}, {transform_indices = @transform_2, window_bounds = array<i64: 8, 2>}, {pipeline_mode = #tpu.pipeline_mode<synchronous>, transform_indices = @transform_3, window_bounds = array<i64: 8, 64>}, {pipeline_mode = #tpu.pipeline_mode<synchronous>, transform_indices = @transform_4, window_bounds = array<i64: 8, 1>}, {pipeline_mode = #tpu.pipeline_mode<synchronous>, transform_indices = @transform_5, window_bounds = array<i64: 8, 1>}, {pipeline_mode = #tpu.pipeline_mode<synchronous>, transform_indices = @transform_6, window_bounds = array<i64: 8, 8>}, {transform_indices = @transform_7, window_bounds = array<i64: 1, 2>}]} {
    %c0 = arith.constant 0 : index
    %c0_0 = arith.constant 0 : index
    %0 = vector.load %arg1[%c0, %c0_0] : memref<8x2xi32, #tpu.memory_space<vmem>>, vector<8x2xi32>
    %c0_1 = arith.constant 0 : index
    %c0_2 = arith.constant 0 : index
    %1 = vector.load %arg2[%c0_1, %c0_2] : memref<8x2xf32, #tpu.memory_space<vmem>>, vector<8x2xf32>
    %c0_3 = arith.constant 0 : index
    %c0_4 = arith.constant 0 : index
    %2 = vector.load %arg3[%c0_3, %c0_4] : memref<8x2xi32, #tpu.memory_space<vmem>>, vector<8x2xi32>
    %c0_5 = arith.constant 0 : index
    %c0_6 = arith.constant 0 : index
    %3 = vector.load %arg4[%c0_5, %c0_6] : memref<8x64xf32, #tpu.memory_space<vmem>>, vector<8x64xf32>
    %c0_7 = arith.constant 0 : index
    %c0_8 = arith.constant 0 : index
    %4 = vector.load %arg5[%c0_7, %c0_8] : memref<8x1xf32, #tpu.memory_space<vmem>>, vector<8x1xf32>
    %c0_9 = arith.constant 0 : index
    %c0_10 = arith.constant 0 : index
    %5 = vector.load %arg6[%c0_9, %c0_10] : memref<8x1xf32, #tpu.memory_space<vmem>>, vector<8x1xf32>
    %c0_11 = arith.constant 0 : index
    %c0_12 = arith.constant 0 : index
    %6 = vector.load %arg7[%c0_11, %c0_12] : memref<8x8xf32, #tpu.memory_space<vmem>>, vector<8x8xf32>
    %7 = tpu.iota {dimensions = array<i32: 0>} : vector<64x2xi32>
    %8 = tpu.iota {dimensions = array<i32: 0>} : vector<8x2xi32>
    %9 = vector.shape_cast %6 : vector<8x8xf32> to vector<8x8x1xf32>
    %10 = vector.shape_cast %9 : vector<8x8x1xf32> to vector<8x8x1xf32>
    %11 = vector.broadcast %10 : vector<8x8x1xf32> to vector<8x8x2xf32>
    %12 = vector.extract_strided_slice %0 {offsets = [0, 0], sizes = [1, 2], strides = [1, 1]} : vector<8x2xi32> to vector<1x2xi32>
    %13 = vector.broadcast %12 : vector<1x2xi32> to vector<64x2xi32>
    %14 = arith.cmpi eq, %7, %13 : vector<64x2xi32>
    %15 = arith.extui %14 : vector<64x2xi1> to vector<64x2xi32>
    %16 = arith.sitofp %15 : vector<64x2xi32> to vector<64x2xf32>
    %cst = arith.constant dense<0.000000e+00> : vector<8x2xf32>
    %17 = tpu.matmul %3, %16, %cst {dimension_numbers = #tpu.dot_dimension_numbers<[1], [0], [0], [1], [0, 0, 1, 1], [], []>} : vector<8x64xf32>, vector<64x2xf32>, vector<8x2xf32> -> vector<8x2xf32>
    %18 = vector.extract_strided_slice %2 {offsets = [0, 0], sizes = [1, 2], strides = [1, 1]} : vector<8x2xi32> to vector<1x2xi32>
    %19 = vector.broadcast %18 : vector<1x2xi32> to vector<8x2xi32>
    %20 = arith.cmpi eq, %8, %19 : vector<8x2xi32>
    %21 = arith.extui %20 : vector<8x2xi1> to vector<8x2xi32>
    %22 = arith.sitofp %21 : vector<8x2xi32> to vector<8x2xf32>
    %23 = vector.extract_strided_slice %0 {offsets = [1, 0], sizes = [1, 2], strides = [1, 1]} : vector<8x2xi32> to vector<1x2xi32>
    %24 = vector.broadcast %23 : vector<1x2xi32> to vector<64x2xi32>
    %25 = arith.cmpi eq, %7, %24 : vector<64x2xi32>
    %26 = arith.extui %25 : vector<64x2xi1> to vector<64x2xi32>
    %27 = arith.sitofp %26 : vector<64x2xi32> to vector<64x2xf32>
    %cst_13 = arith.constant dense<0.000000e+00> : vector<8x2xf32>
    %28 = tpu.matmul %3, %27, %cst_13 {dimension_numbers = #tpu.dot_dimension_numbers<[1], [0], [0], [1], [0, 0, 1, 1], [], []>} : vector<8x64xf32>, vector<64x2xf32>, vector<8x2xf32> -> vector<8x2xf32>
    %29 = vector.extract_strided_slice %2 {offsets = [1, 0], sizes = [1, 2], strides = [1, 1]} : vector<8x2xi32> to vector<1x2xi32>
    %30 = vector.broadcast %29 : vector<1x2xi32> to vector<8x2xi32>
    %31 = arith.cmpi eq, %8, %30 : vector<8x2xi32>
    %32 = arith.extui %31 : vector<8x2xi1> to vector<8x2xi32>
    %33 = arith.sitofp %32 : vector<8x2xi32> to vector<8x2xf32>
    %34 = vector.extract_strided_slice %0 {offsets = [2, 0], sizes = [1, 2], strides = [1, 1]} : vector<8x2xi32> to vector<1x2xi32>
    %35 = vector.broadcast %34 : vector<1x2xi32> to vector<64x2xi32>
    %36 = arith.cmpi eq, %7, %35 : vector<64x2xi32>
    %37 = arith.extui %36 : vector<64x2xi1> to vector<64x2xi32>
    %38 = arith.sitofp %37 : vector<64x2xi32> to vector<64x2xf32>
    %cst_14 = arith.constant dense<0.000000e+00> : vector<8x2xf32>
    %39 = tpu.matmul %3, %38, %cst_14 {dimension_numbers = #tpu.dot_dimension_numbers<[1], [0], [0], [1], [0, 0, 1, 1], [], []>} : vector<8x64xf32>, vector<64x2xf32>, vector<8x2xf32> -> vector<8x2xf32>
    %40 = vector.extract_strided_slice %2 {offsets = [2, 0], sizes = [1, 2], strides = [1, 1]} : vector<8x2xi32> to vector<1x2xi32>
    %41 = vector.broadcast %40 : vector<1x2xi32> to vector<8x2xi32>
    %42 = arith.cmpi eq, %8, %41 : vector<8x2xi32>
    %43 = arith.extui %42 : vector<8x2xi1> to vector<8x2xi32>
    %44 = arith.sitofp %43 : vector<8x2xi32> to vector<8x2xf32>
    %45 = vector.extract_strided_slice %0 {offsets = [3, 0], sizes = [1, 2], strides = [1, 1]} : vector<8x2xi32> to vector<1x2xi32>
    %46 = vector.broadcast %45 : vector<1x2xi32> to vector<64x2xi32>
    %47 = arith.cmpi eq, %7, %46 : vector<64x2xi32>
    %48 = arith.extui %47 : vector<64x2xi1> to vector<64x2xi32>
    %49 = arith.sitofp %48 : vector<64x2xi32> to vector<64x2xf32>
    %cst_15 = arith.constant dense<0.000000e+00> : vector<8x2xf32>
    %50 = tpu.matmul %3, %49, %cst_15 {dimension_numbers = #tpu.dot_dimension_numbers<[1], [0], [0], [1], [0, 0, 1, 1], [], []>} : vector<8x64xf32>, vector<64x2xf32>, vector<8x2xf32> -> vector<8x2xf32>
    %51 = vector.extract_strided_slice %2 {offsets = [3, 0], sizes = [1, 2], strides = [1, 1]} : vector<8x2xi32> to vector<1x2xi32>
    %52 = vector.broadcast %51 : vector<1x2xi32> to vector<8x2xi32>
    %53 = arith.cmpi eq, %8, %52 : vector<8x2xi32>
    %54 = arith.extui %53 : vector<8x2xi1> to vector<8x2xi32>
    %55 = arith.sitofp %54 : vector<8x2xi32> to vector<8x2xf32>
    %56 = vector.extract_strided_slice %0 {offsets = [4, 0], sizes = [1, 2], strides = [1, 1]} : vector<8x2xi32> to vector<1x2xi32>
    %57 = vector.broadcast %56 : vector<1x2xi32> to vector<64x2xi32>
    %58 = arith.cmpi eq, %7, %57 : vector<64x2xi32>
    %59 = arith.extui %58 : vector<64x2xi1> to vector<64x2xi32>
    %60 = arith.sitofp %59 : vector<64x2xi32> to vector<64x2xf32>
    %cst_16 = arith.constant dense<0.000000e+00> : vector<8x2xf32>
    %61 = tpu.matmul %3, %60, %cst_16 {dimension_numbers = #tpu.dot_dimension_numbers<[1], [0], [0], [1], [0, 0, 1, 1], [], []>} : vector<8x64xf32>, vector<64x2xf32>, vector<8x2xf32> -> vector<8x2xf32>
    %62 = vector.extract_strided_slice %2 {offsets = [4, 0], sizes = [1, 2], strides = [1, 1]} : vector<8x2xi32> to vector<1x2xi32>
    %63 = vector.broadcast %62 : vector<1x2xi32> to vector<8x2xi32>
    %64 = arith.cmpi eq, %8, %63 : vector<8x2xi32>
    %65 = arith.extui %64 : vector<8x2xi1> to vector<8x2xi32>
    %66 = arith.sitofp %65 : vector<8x2xi32> to vector<8x2xf32>
    %67 = vector.extract_strided_slice %0 {offsets = [5, 0], sizes = [1, 2], strides = [1, 1]} : vector<8x2xi32> to vector<1x2xi32>
    %68 = vector.broadcast %67 : vector<1x2xi32> to vector<64x2xi32>
    %69 = arith.cmpi eq, %7, %68 : vector<64x2xi32>
    %70 = arith.extui %69 : vector<64x2xi1> to vector<64x2xi32>
    %71 = arith.sitofp %70 : vector<64x2xi32> to vector<64x2xf32>
    %cst_17 = arith.constant dense<0.000000e+00> : vector<8x2xf32>
    %72 = tpu.matmul %3, %71, %cst_17 {dimension_numbers = #tpu.dot_dimension_numbers<[1], [0], [0], [1], [0, 0, 1, 1], [], []>} : vector<8x64xf32>, vector<64x2xf32>, vector<8x2xf32> -> vector<8x2xf32>
    %73 = vector.extract_strided_slice %2 {offsets = [5, 0], sizes = [1, 2], strides = [1, 1]} : vector<8x2xi32> to vector<1x2xi32>
    %74 = vector.broadcast %73 : vector<1x2xi32> to vector<8x2xi32>
    %75 = arith.cmpi eq, %8, %74 : vector<8x2xi32>
    %76 = arith.extui %75 : vector<8x2xi1> to vector<8x2xi32>
    %77 = arith.sitofp %76 : vector<8x2xi32> to vector<8x2xf32>
    %78 = vector.extract_strided_slice %0 {offsets = [6, 0], sizes = [1, 2], strides = [1, 1]} : vector<8x2xi32> to vector<1x2xi32>
    %79 = vector.broadcast %78 : vector<1x2xi32> to vector<64x2xi32>
    %80 = arith.cmpi eq, %7, %79 : vector<64x2xi32>
    %81 = arith.extui %80 : vector<64x2xi1> to vector<64x2xi32>
    %82 = arith.sitofp %81 : vector<64x2xi32> to vector<64x2xf32>
    %cst_18 = arith.constant dense<0.000000e+00> : vector<8x2xf32>
    %83 = tpu.matmul %3, %82, %cst_18 {dimension_numbers = #tpu.dot_dimension_numbers<[1], [0], [0], [1], [0, 0, 1, 1], [], []>} : vector<8x64xf32>, vector<64x2xf32>, vector<8x2xf32> -> vector<8x2xf32>
    %84 = vector.extract_strided_slice %2 {offsets = [6, 0], sizes = [1, 2], strides = [1, 1]} : vector<8x2xi32> to vector<1x2xi32>
    %85 = vector.broadcast %84 : vector<1x2xi32> to vector<8x2xi32>
    %86 = arith.cmpi eq, %8, %85 : vector<8x2xi32>
    %87 = arith.extui %86 : vector<8x2xi1> to vector<8x2xi32>
    %88 = arith.sitofp %87 : vector<8x2xi32> to vector<8x2xf32>
    %89 = vector.extract_strided_slice %0 {offsets = [7, 0], sizes = [1, 2], strides = [1, 1]} : vector<8x2xi32> to vector<1x2xi32>
    %90 = vector.broadcast %89 : vector<1x2xi32> to vector<64x2xi32>
    %91 = arith.cmpi eq, %7, %90 : vector<64x2xi32>
    %92 = arith.extui %91 : vector<64x2xi1> to vector<64x2xi32>
    %93 = arith.sitofp %92 : vector<64x2xi32> to vector<64x2xf32>
    %cst_19 = arith.constant dense<0.000000e+00> : vector<8x2xf32>
    %94 = tpu.matmul %3, %93, %cst_19 {dimension_numbers = #tpu.dot_dimension_numbers<[1], [0], [0], [1], [0, 0, 1, 1], [], []>} : vector<8x64xf32>, vector<64x2xf32>, vector<8x2xf32> -> vector<8x2xf32>
    %95 = vector.extract_strided_slice %2 {offsets = [7, 0], sizes = [1, 2], strides = [1, 1]} : vector<8x2xi32> to vector<1x2xi32>
    %96 = vector.broadcast %95 : vector<1x2xi32> to vector<8x2xi32>
    %97 = arith.cmpi eq, %8, %96 : vector<8x2xi32>
    %98 = arith.extui %97 : vector<8x2xi1> to vector<8x2xi32>
    %99 = arith.sitofp %98 : vector<8x2xi32> to vector<8x2xf32>
    %100 = arith.mulf %22, %17 : vector<8x2xf32>
    %cst_20 = arith.constant dense<0.000000e+00> : vector<2xf32>
    %101 = vector.multi_reduction <add>, %100, %cst_20 [0] : vector<8x2xf32> to vector<2xf32>
    %102 = vector.shape_cast %101 : vector<2xf32> to vector<1x2xf32>
    %103 = vector.broadcast %4 : vector<8x1xf32> to vector<8x2xf32>
    %104 = arith.mulf %22, %103 : vector<8x2xf32>
    %cst_21 = arith.constant dense<0.000000e+00> : vector<2xf32>
    %105 = vector.multi_reduction <add>, %104, %cst_21 [0] : vector<8x2xf32> to vector<2xf32>
    %106 = vector.shape_cast %105 : vector<2xf32> to vector<1x2xf32>
    %107 = arith.addf %106, %102 : vector<1x2xf32>
    %108 = vector.extract_strided_slice %1 {offsets = [1, 0], sizes = [1, 2], strides = [1, 1]} : vector<8x2xf32> to vector<1x2xf32>
    %109 = vector.extract_strided_slice %1 {offsets = [0, 0], sizes = [1, 2], strides = [1, 1]} : vector<8x2xf32> to vector<1x2xf32>
    %cst_22 = arith.constant 1.000000e+00 : f32
    %110 = vector.broadcast %cst_22 : f32 to vector<1x2xf32>
    %111 = arith.subf %110, %108 : vector<1x2xf32>
    %112 = arith.mulf %109, %111 : vector<1x2xf32>
    %113 = vector.broadcast %5 : vector<8x1xf32> to vector<8x2xf32>
    %114 = arith.mulf %22, %113 : vector<8x2xf32>
    %cst_23 = arith.constant dense<0.000000e+00> : vector<2xf32>
    %115 = vector.multi_reduction <add>, %114, %cst_23 [0] : vector<8x2xf32> to vector<2xf32>
    %116 = vector.shape_cast %115 : vector<2xf32> to vector<1x2xf32>
    %117 = arith.mulf %112, %116 : vector<1x2xf32>
    %118 = arith.addf %107, %117 : vector<1x2xf32>
    %119 = vector.extract_strided_slice %1 {offsets = [2, 0], sizes = [1, 2], strides = [1, 1]} : vector<8x2xf32> to vector<1x2xf32>
    %120 = vector.extract_strided_slice %1 {offsets = [1, 0], sizes = [1, 2], strides = [1, 1]} : vector<8x2xf32> to vector<1x2xf32>
    %cst_24 = arith.constant 1.000000e+00 : f32
    %121 = vector.broadcast %cst_24 : f32 to vector<1x2xf32>
    %122 = arith.subf %121, %119 : vector<1x2xf32>
    %123 = arith.mulf %120, %122 : vector<1x2xf32>
    %124 = vector.broadcast %5 : vector<8x1xf32> to vector<8x2xf32>
    %125 = arith.mulf %33, %124 : vector<8x2xf32>
    %cst_25 = arith.constant dense<0.000000e+00> : vector<2xf32>
    %126 = vector.multi_reduction <add>, %125, %cst_25 [0] : vector<8x2xf32> to vector<2xf32>
    %127 = vector.shape_cast %126 : vector<2xf32> to vector<1x2xf32>
    %128 = arith.mulf %123, %127 : vector<1x2xf32>
    %129 = arith.addf %118, %128 : vector<1x2xf32>
    %130 = arith.mulf %33, %28 : vector<8x2xf32>
    %cst_26 = arith.constant dense<0.000000e+00> : vector<2xf32>
    %131 = vector.multi_reduction <add>, %130, %cst_26 [0] : vector<8x2xf32> to vector<2xf32>
    %132 = vector.shape_cast %131 : vector<2xf32> to vector<1x2xf32>
    %133 = vector.shape_cast %33 : vector<8x2xf32> to vector<1x8x2xf32>
    %134 = vector.broadcast %133 : vector<1x8x2xf32> to vector<8x8x2xf32>
    %135 = arith.mulf %11, %134 : vector<8x8x2xf32>
    %cst_27 = arith.constant dense<0.000000e+00> : vector<8x2xf32>
    %136 = vector.multi_reduction <add>, %135, %cst_27 [1] : vector<8x8x2xf32> to vector<8x2xf32>
    %137 = arith.mulf %22, %136 : vector<8x2xf32>
    %cst_28 = arith.constant dense<0.000000e+00> : vector<2xf32>
    %138 = vector.multi_reduction <add>, %137, %cst_28 [0] : vector<8x2xf32> to vector<2xf32>
    %139 = vector.shape_cast %138 : vector<2xf32> to vector<1x2xf32>
    %140 = vector.extract_strided_slice %1 {offsets = [1, 0], sizes = [1, 2], strides = [1, 1]} : vector<8x2xf32> to vector<1x2xf32>
    %141 = arith.addf %132, %139 : vector<1x2xf32>
    %142 = arith.mulf %140, %141 : vector<1x2xf32>
    %143 = arith.addf %129, %142 : vector<1x2xf32>
    %144 = vector.extract_strided_slice %1 {offsets = [3, 0], sizes = [1, 2], strides = [1, 1]} : vector<8x2xf32> to vector<1x2xf32>
    %145 = vector.extract_strided_slice %1 {offsets = [2, 0], sizes = [1, 2], strides = [1, 1]} : vector<8x2xf32> to vector<1x2xf32>
    %cst_29 = arith.constant 1.000000e+00 : f32
    %146 = vector.broadcast %cst_29 : f32 to vector<1x2xf32>
    %147 = arith.subf %146, %144 : vector<1x2xf32>
    %148 = arith.mulf %145, %147 : vector<1x2xf32>
    %149 = vector.broadcast %5 : vector<8x1xf32> to vector<8x2xf32>
    %150 = arith.mulf %44, %149 : vector<8x2xf32>
    %cst_30 = arith.constant dense<0.000000e+00> : vector<2xf32>
    %151 = vector.multi_reduction <add>, %150, %cst_30 [0] : vector<8x2xf32> to vector<2xf32>
    %152 = vector.shape_cast %151 : vector<2xf32> to vector<1x2xf32>
    %153 = arith.mulf %148, %152 : vector<1x2xf32>
    %154 = arith.addf %143, %153 : vector<1x2xf32>
    %155 = arith.mulf %44, %39 : vector<8x2xf32>
    %cst_31 = arith.constant dense<0.000000e+00> : vector<2xf32>
    %156 = vector.multi_reduction <add>, %155, %cst_31 [0] : vector<8x2xf32> to vector<2xf32>
    %157 = vector.shape_cast %156 : vector<2xf32> to vector<1x2xf32>
    %158 = vector.shape_cast %44 : vector<8x2xf32> to vector<1x8x2xf32>
    %159 = vector.broadcast %158 : vector<1x8x2xf32> to vector<8x8x2xf32>
    %160 = arith.mulf %11, %159 : vector<8x8x2xf32>
    %cst_32 = arith.constant dense<0.000000e+00> : vector<8x2xf32>
    %161 = vector.multi_reduction <add>, %160, %cst_32 [1] : vector<8x8x2xf32> to vector<8x2xf32>
    %162 = arith.mulf %33, %161 : vector<8x2xf32>
    %cst_33 = arith.constant dense<0.000000e+00> : vector<2xf32>
    %163 = vector.multi_reduction <add>, %162, %cst_33 [0] : vector<8x2xf32> to vector<2xf32>
    %164 = vector.shape_cast %163 : vector<2xf32> to vector<1x2xf32>
    %165 = vector.extract_strided_slice %1 {offsets = [2, 0], sizes = [1, 2], strides = [1, 1]} : vector<8x2xf32> to vector<1x2xf32>
    %166 = arith.addf %157, %164 : vector<1x2xf32>
    %167 = arith.mulf %165, %166 : vector<1x2xf32>
    %168 = arith.addf %154, %167 : vector<1x2xf32>
    %169 = vector.extract_strided_slice %1 {offsets = [4, 0], sizes = [1, 2], strides = [1, 1]} : vector<8x2xf32> to vector<1x2xf32>
    %170 = vector.extract_strided_slice %1 {offsets = [3, 0], sizes = [1, 2], strides = [1, 1]} : vector<8x2xf32> to vector<1x2xf32>
    %cst_34 = arith.constant 1.000000e+00 : f32
    %171 = vector.broadcast %cst_34 : f32 to vector<1x2xf32>
    %172 = arith.subf %171, %169 : vector<1x2xf32>
    %173 = arith.mulf %170, %172 : vector<1x2xf32>
    %174 = vector.broadcast %5 : vector<8x1xf32> to vector<8x2xf32>
    %175 = arith.mulf %55, %174 : vector<8x2xf32>
    %cst_35 = arith.constant dense<0.000000e+00> : vector<2xf32>
    %176 = vector.multi_reduction <add>, %175, %cst_35 [0] : vector<8x2xf32> to vector<2xf32>
    %177 = vector.shape_cast %176 : vector<2xf32> to vector<1x2xf32>
    %178 = arith.mulf %173, %177 : vector<1x2xf32>
    %179 = arith.addf %168, %178 : vector<1x2xf32>
    %180 = arith.mulf %55, %50 : vector<8x2xf32>
    %cst_36 = arith.constant dense<0.000000e+00> : vector<2xf32>
    %181 = vector.multi_reduction <add>, %180, %cst_36 [0] : vector<8x2xf32> to vector<2xf32>
    %182 = vector.shape_cast %181 : vector<2xf32> to vector<1x2xf32>
    %183 = vector.shape_cast %55 : vector<8x2xf32> to vector<1x8x2xf32>
    %184 = vector.broadcast %183 : vector<1x8x2xf32> to vector<8x8x2xf32>
    %185 = arith.mulf %11, %184 : vector<8x8x2xf32>
    %cst_37 = arith.constant dense<0.000000e+00> : vector<8x2xf32>
    %186 = vector.multi_reduction <add>, %185, %cst_37 [1] : vector<8x8x2xf32> to vector<8x2xf32>
    %187 = arith.mulf %44, %186 : vector<8x2xf32>
    %cst_38 = arith.constant dense<0.000000e+00> : vector<2xf32>
    %188 = vector.multi_reduction <add>, %187, %cst_38 [0] : vector<8x2xf32> to vector<2xf32>
    %189 = vector.shape_cast %188 : vector<2xf32> to vector<1x2xf32>
    %190 = vector.extract_strided_slice %1 {offsets = [3, 0], sizes = [1, 2], strides = [1, 1]} : vector<8x2xf32> to vector<1x2xf32>
    %191 = arith.addf %182, %189 : vector<1x2xf32>
    %192 = arith.mulf %190, %191 : vector<1x2xf32>
    %193 = arith.addf %179, %192 : vector<1x2xf32>
    %194 = vector.extract_strided_slice %1 {offsets = [5, 0], sizes = [1, 2], strides = [1, 1]} : vector<8x2xf32> to vector<1x2xf32>
    %195 = vector.extract_strided_slice %1 {offsets = [4, 0], sizes = [1, 2], strides = [1, 1]} : vector<8x2xf32> to vector<1x2xf32>
    %cst_39 = arith.constant 1.000000e+00 : f32
    %196 = vector.broadcast %cst_39 : f32 to vector<1x2xf32>
    %197 = arith.subf %196, %194 : vector<1x2xf32>
    %198 = arith.mulf %195, %197 : vector<1x2xf32>
    %199 = vector.broadcast %5 : vector<8x1xf32> to vector<8x2xf32>
    %200 = arith.mulf %66, %199 : vector<8x2xf32>
    %cst_40 = arith.constant dense<0.000000e+00> : vector<2xf32>
    %201 = vector.multi_reduction <add>, %200, %cst_40 [0] : vector<8x2xf32> to vector<2xf32>
    %202 = vector.shape_cast %201 : vector<2xf32> to vector<1x2xf32>
    %203 = arith.mulf %198, %202 : vector<1x2xf32>
    %204 = arith.addf %193, %203 : vector<1x2xf32>
    %205 = arith.mulf %66, %61 : vector<8x2xf32>
    %cst_41 = arith.constant dense<0.000000e+00> : vector<2xf32>
    %206 = vector.multi_reduction <add>, %205, %cst_41 [0] : vector<8x2xf32> to vector<2xf32>
    %207 = vector.shape_cast %206 : vector<2xf32> to vector<1x2xf32>
    %208 = vector.shape_cast %66 : vector<8x2xf32> to vector<1x8x2xf32>
    %209 = vector.broadcast %208 : vector<1x8x2xf32> to vector<8x8x2xf32>
    %210 = arith.mulf %11, %209 : vector<8x8x2xf32>
    %cst_42 = arith.constant dense<0.000000e+00> : vector<8x2xf32>
    %211 = vector.multi_reduction <add>, %210, %cst_42 [1] : vector<8x8x2xf32> to vector<8x2xf32>
    %212 = arith.mulf %55, %211 : vector<8x2xf32>
    %cst_43 = arith.constant dense<0.000000e+00> : vector<2xf32>
    %213 = vector.multi_reduction <add>, %212, %cst_43 [0] : vector<8x2xf32> to vector<2xf32>
    %214 = vector.shape_cast %213 : vector<2xf32> to vector<1x2xf32>
    %215 = vector.extract_strided_slice %1 {offsets = [4, 0], sizes = [1, 2], strides = [1, 1]} : vector<8x2xf32> to vector<1x2xf32>
    %216 = arith.addf %207, %214 : vector<1x2xf32>
    %217 = arith.mulf %215, %216 : vector<1x2xf32>
    %218 = arith.addf %204, %217 : vector<1x2xf32>
    %219 = vector.extract_strided_slice %1 {offsets = [6, 0], sizes = [1, 2], strides = [1, 1]} : vector<8x2xf32> to vector<1x2xf32>
    %220 = vector.extract_strided_slice %1 {offsets = [5, 0], sizes = [1, 2], strides = [1, 1]} : vector<8x2xf32> to vector<1x2xf32>
    %cst_44 = arith.constant 1.000000e+00 : f32
    %221 = vector.broadcast %cst_44 : f32 to vector<1x2xf32>
    %222 = arith.subf %221, %219 : vector<1x2xf32>
    %223 = arith.mulf %220, %222 : vector<1x2xf32>
    %224 = vector.broadcast %5 : vector<8x1xf32> to vector<8x2xf32>
    %225 = arith.mulf %77, %224 : vector<8x2xf32>
    %cst_45 = arith.constant dense<0.000000e+00> : vector<2xf32>
    %226 = vector.multi_reduction <add>, %225, %cst_45 [0] : vector<8x2xf32> to vector<2xf32>
    %227 = vector.shape_cast %226 : vector<2xf32> to vector<1x2xf32>
    %228 = arith.mulf %223, %227 : vector<1x2xf32>
    %229 = arith.addf %218, %228 : vector<1x2xf32>
    %230 = arith.mulf %77, %72 : vector<8x2xf32>
    %cst_46 = arith.constant dense<0.000000e+00> : vector<2xf32>
    %231 = vector.multi_reduction <add>, %230, %cst_46 [0] : vector<8x2xf32> to vector<2xf32>
    %232 = vector.shape_cast %231 : vector<2xf32> to vector<1x2xf32>
    %233 = vector.shape_cast %77 : vector<8x2xf32> to vector<1x8x2xf32>
    %234 = vector.broadcast %233 : vector<1x8x2xf32> to vector<8x8x2xf32>
    %235 = arith.mulf %11, %234 : vector<8x8x2xf32>
    %cst_47 = arith.constant dense<0.000000e+00> : vector<8x2xf32>
    %236 = vector.multi_reduction <add>, %235, %cst_47 [1] : vector<8x8x2xf32> to vector<8x2xf32>
    %237 = arith.mulf %66, %236 : vector<8x2xf32>
    %cst_48 = arith.constant dense<0.000000e+00> : vector<2xf32>
    %238 = vector.multi_reduction <add>, %237, %cst_48 [0] : vector<8x2xf32> to vector<2xf32>
    %239 = vector.shape_cast %238 : vector<2xf32> to vector<1x2xf32>
    %240 = vector.extract_strided_slice %1 {offsets = [5, 0], sizes = [1, 2], strides = [1, 1]} : vector<8x2xf32> to vector<1x2xf32>
    %241 = arith.addf %232, %239 : vector<1x2xf32>
    %242 = arith.mulf %240, %241 : vector<1x2xf32>
    %243 = arith.addf %229, %242 : vector<1x2xf32>
    %244 = vector.extract_strided_slice %1 {offsets = [7, 0], sizes = [1, 2], strides = [1, 1]} : vector<8x2xf32> to vector<1x2xf32>
    %245 = vector.extract_strided_slice %1 {offsets = [6, 0], sizes = [1, 2], strides = [1, 1]} : vector<8x2xf32> to vector<1x2xf32>
    %cst_49 = arith.constant 1.000000e+00 : f32
    %246 = vector.broadcast %cst_49 : f32 to vector<1x2xf32>
    %247 = arith.subf %246, %244 : vector<1x2xf32>
    %248 = arith.mulf %245, %247 : vector<1x2xf32>
    %249 = vector.broadcast %5 : vector<8x1xf32> to vector<8x2xf32>
    %250 = arith.mulf %88, %249 : vector<8x2xf32>
    %cst_50 = arith.constant dense<0.000000e+00> : vector<2xf32>
    %251 = vector.multi_reduction <add>, %250, %cst_50 [0] : vector<8x2xf32> to vector<2xf32>
    %252 = vector.shape_cast %251 : vector<2xf32> to vector<1x2xf32>
    %253 = arith.mulf %248, %252 : vector<1x2xf32>
    %254 = arith.addf %243, %253 : vector<1x2xf32>
    %255 = arith.mulf %88, %83 : vector<8x2xf32>
    %cst_51 = arith.constant dense<0.000000e+00> : vector<2xf32>
    %256 = vector.multi_reduction <add>, %255, %cst_51 [0] : vector<8x2xf32> to vector<2xf32>
    %257 = vector.shape_cast %256 : vector<2xf32> to vector<1x2xf32>
    %258 = vector.shape_cast %88 : vector<8x2xf32> to vector<1x8x2xf32>
    %259 = vector.broadcast %258 : vector<1x8x2xf32> to vector<8x8x2xf32>
    %260 = arith.mulf %11, %259 : vector<8x8x2xf32>
    %cst_52 = arith.constant dense<0.000000e+00> : vector<8x2xf32>
    %261 = vector.multi_reduction <add>, %260, %cst_52 [1] : vector<8x8x2xf32> to vector<8x2xf32>
    %262 = arith.mulf %77, %261 : vector<8x2xf32>
    %cst_53 = arith.constant dense<0.000000e+00> : vector<2xf32>
    %263 = vector.multi_reduction <add>, %262, %cst_53 [0] : vector<8x2xf32> to vector<2xf32>
    %264 = vector.shape_cast %263 : vector<2xf32> to vector<1x2xf32>
    %265 = vector.extract_strided_slice %1 {offsets = [6, 0], sizes = [1, 2], strides = [1, 1]} : vector<8x2xf32> to vector<1x2xf32>
    %266 = arith.addf %257, %264 : vector<1x2xf32>
    %267 = arith.mulf %265, %266 : vector<1x2xf32>
    %268 = arith.addf %254, %267 : vector<1x2xf32>
    %cst_54 = arith.constant 0.000000e+00 : f32
    %269 = vector.broadcast %cst_54 : f32 to vector<1x2xf32>
    %270 = vector.extract_strided_slice %1 {offsets = [7, 0], sizes = [1, 2], strides = [1, 1]} : vector<8x2xf32> to vector<1x2xf32>
    %cst_55 = arith.constant 1.000000e+00 : f32
    %271 = vector.broadcast %cst_55 : f32 to vector<1x2xf32>
    %272 = arith.subf %271, %269 : vector<1x2xf32>
    %273 = arith.mulf %270, %272 : vector<1x2xf32>
    %274 = vector.broadcast %5 : vector<8x1xf32> to vector<8x2xf32>
    %275 = arith.mulf %99, %274 : vector<8x2xf32>
    %cst_56 = arith.constant dense<0.000000e+00> : vector<2xf32>
    %276 = vector.multi_reduction <add>, %275, %cst_56 [0] : vector<8x2xf32> to vector<2xf32>
    %277 = vector.shape_cast %276 : vector<2xf32> to vector<1x2xf32>
    %278 = arith.mulf %273, %277 : vector<1x2xf32>
    %279 = arith.addf %268, %278 : vector<1x2xf32>
    %280 = arith.mulf %99, %94 : vector<8x2xf32>
    %cst_57 = arith.constant dense<0.000000e+00> : vector<2xf32>
    %281 = vector.multi_reduction <add>, %280, %cst_57 [0] : vector<8x2xf32> to vector<2xf32>
    %282 = vector.shape_cast %281 : vector<2xf32> to vector<1x2xf32>
    %283 = vector.shape_cast %99 : vector<8x2xf32> to vector<1x8x2xf32>
    %284 = vector.broadcast %283 : vector<1x8x2xf32> to vector<8x8x2xf32>
    %285 = arith.mulf %11, %284 : vector<8x8x2xf32>
    %cst_58 = arith.constant dense<0.000000e+00> : vector<8x2xf32>
    %286 = vector.multi_reduction <add>, %285, %cst_58 [1] : vector<8x8x2xf32> to vector<8x2xf32>
    %287 = arith.mulf %88, %286 : vector<8x2xf32>
    %cst_59 = arith.constant dense<0.000000e+00> : vector<2xf32>
    %288 = vector.multi_reduction <add>, %287, %cst_59 [0] : vector<8x2xf32> to vector<2xf32>
    %289 = vector.shape_cast %288 : vector<2xf32> to vector<1x2xf32>
    %290 = vector.extract_strided_slice %1 {offsets = [7, 0], sizes = [1, 2], strides = [1, 1]} : vector<8x2xf32> to vector<1x2xf32>
    %291 = arith.addf %282, %289 : vector<1x2xf32>
    %292 = arith.mulf %290, %291 : vector<1x2xf32>
    %293 = arith.addf %279, %292 : vector<1x2xf32>
    %294 = vector.broadcast %4 : vector<8x1xf32> to vector<8x2xf32>
    %295 = arith.addf %294, %17 : vector<8x2xf32>
    %296 = vector.shape_cast %295 : vector<8x2xf32> to vector<8x1x2xf32>
    %297 = vector.broadcast %296 : vector<8x1x2xf32> to vector<8x8x2xf32>
    %298 = arith.addf %297, %11 : vector<8x8x2xf32>
    %299 = vector.shape_cast %28 : vector<8x2xf32> to vector<1x8x2xf32>
    %300 = vector.broadcast %299 : vector<1x8x2xf32> to vector<8x8x2xf32>
    %301 = arith.addf %298, %300 : vector<8x8x2xf32>
    %cst_60 = arith.constant dense<0xFF800000> : vector<8x2xf32>
    %302 = vector.multi_reduction <maximumf>, %301, %cst_60 [0] : vector<8x8x2xf32> to vector<8x2xf32>
    %303 = vector.shape_cast %302 : vector<8x2xf32> to vector<1x8x2xf32>
    %304 = vector.broadcast %303 : vector<1x8x2xf32> to vector<8x8x2xf32>
    %305 = arith.subf %301, %304 : vector<8x8x2xf32>
    %306 = math.exp %305 : vector<8x8x2xf32>
    %cst_61 = arith.constant dense<0.000000e+00> : vector<8x2xf32>
    %307 = vector.multi_reduction <add>, %306, %cst_61 [0] : vector<8x8x2xf32> to vector<8x2xf32>
    %308 = math.log %307 : vector<8x2xf32>
    %309 = arith.addf %302, %308 : vector<8x2xf32>
    %310 = vector.extract_strided_slice %1 {offsets = [1, 0], sizes = [1, 2], strides = [1, 1]} : vector<8x2xf32> to vector<1x2xf32>
    %cst_62 = arith.constant 0.000000e+00 : f32
    %311 = vector.broadcast %cst_62 : f32 to vector<1x2xf32>
    %312 = arith.cmpf ogt, %310, %311 : vector<1x2xf32>
    %313 = vector.shape_cast %312 : vector<1x2xi1> to vector<1x2xi1>
    %314 = vector.broadcast %313 : vector<1x2xi1> to vector<8x2xi1>
    %315 = arith.select %314, %309, %295 : vector<8x2xi1>, vector<8x2xf32>
    %316 = vector.shape_cast %315 : vector<8x2xf32> to vector<8x1x2xf32>
    %317 = vector.broadcast %316 : vector<8x1x2xf32> to vector<8x8x2xf32>
    %318 = arith.addf %317, %11 : vector<8x8x2xf32>
    %319 = vector.shape_cast %39 : vector<8x2xf32> to vector<1x8x2xf32>
    %320 = vector.broadcast %319 : vector<1x8x2xf32> to vector<8x8x2xf32>
    %321 = arith.addf %318, %320 : vector<8x8x2xf32>
    %cst_63 = arith.constant dense<0xFF800000> : vector<8x2xf32>
    %322 = vector.multi_reduction <maximumf>, %321, %cst_63 [0] : vector<8x8x2xf32> to vector<8x2xf32>
    %323 = vector.shape_cast %322 : vector<8x2xf32> to vector<1x8x2xf32>
    %324 = vector.broadcast %323 : vector<1x8x2xf32> to vector<8x8x2xf32>
    %325 = arith.subf %321, %324 : vector<8x8x2xf32>
    %326 = math.exp %325 : vector<8x8x2xf32>
    %cst_64 = arith.constant dense<0.000000e+00> : vector<8x2xf32>
    %327 = vector.multi_reduction <add>, %326, %cst_64 [0] : vector<8x8x2xf32> to vector<8x2xf32>
    %328 = math.log %327 : vector<8x2xf32>
    %329 = arith.addf %322, %328 : vector<8x2xf32>
    %330 = vector.extract_strided_slice %1 {offsets = [2, 0], sizes = [1, 2], strides = [1, 1]} : vector<8x2xf32> to vector<1x2xf32>
    %cst_65 = arith.constant 0.000000e+00 : f32
    %331 = vector.broadcast %cst_65 : f32 to vector<1x2xf32>
    %332 = arith.cmpf ogt, %330, %331 : vector<1x2xf32>
    %333 = vector.shape_cast %332 : vector<1x2xi1> to vector<1x2xi1>
    %334 = vector.broadcast %333 : vector<1x2xi1> to vector<8x2xi1>
    %335 = arith.select %334, %329, %315 : vector<8x2xi1>, vector<8x2xf32>
    %336 = vector.shape_cast %335 : vector<8x2xf32> to vector<8x1x2xf32>
    %337 = vector.broadcast %336 : vector<8x1x2xf32> to vector<8x8x2xf32>
    %338 = arith.addf %337, %11 : vector<8x8x2xf32>
    %339 = vector.shape_cast %50 : vector<8x2xf32> to vector<1x8x2xf32>
    %340 = vector.broadcast %339 : vector<1x8x2xf32> to vector<8x8x2xf32>
    %341 = arith.addf %338, %340 : vector<8x8x2xf32>
    %cst_66 = arith.constant dense<0xFF800000> : vector<8x2xf32>
    %342 = vector.multi_reduction <maximumf>, %341, %cst_66 [0] : vector<8x8x2xf32> to vector<8x2xf32>
    %343 = vector.shape_cast %342 : vector<8x2xf32> to vector<1x8x2xf32>
    %344 = vector.broadcast %343 : vector<1x8x2xf32> to vector<8x8x2xf32>
    %345 = arith.subf %341, %344 : vector<8x8x2xf32>
    %346 = math.exp %345 : vector<8x8x2xf32>
    %cst_67 = arith.constant dense<0.000000e+00> : vector<8x2xf32>
    %347 = vector.multi_reduction <add>, %346, %cst_67 [0] : vector<8x8x2xf32> to vector<8x2xf32>
    %348 = math.log %347 : vector<8x2xf32>
    %349 = arith.addf %342, %348 : vector<8x2xf32>
    %350 = vector.extract_strided_slice %1 {offsets = [3, 0], sizes = [1, 2], strides = [1, 1]} : vector<8x2xf32> to vector<1x2xf32>
    %cst_68 = arith.constant 0.000000e+00 : f32
    %351 = vector.broadcast %cst_68 : f32 to vector<1x2xf32>
    %352 = arith.cmpf ogt, %350, %351 : vector<1x2xf32>
    %353 = vector.shape_cast %352 : vector<1x2xi1> to vector<1x2xi1>
    %354 = vector.broadcast %353 : vector<1x2xi1> to vector<8x2xi1>
    %355 = arith.select %354, %349, %335 : vector<8x2xi1>, vector<8x2xf32>
    %356 = vector.shape_cast %355 : vector<8x2xf32> to vector<8x1x2xf32>
    %357 = vector.broadcast %356 : vector<8x1x2xf32> to vector<8x8x2xf32>
    %358 = arith.addf %357, %11 : vector<8x8x2xf32>
    %359 = vector.shape_cast %61 : vector<8x2xf32> to vector<1x8x2xf32>
    %360 = vector.broadcast %359 : vector<1x8x2xf32> to vector<8x8x2xf32>
    %361 = arith.addf %358, %360 : vector<8x8x2xf32>
    %cst_69 = arith.constant dense<0xFF800000> : vector<8x2xf32>
    %362 = vector.multi_reduction <maximumf>, %361, %cst_69 [0] : vector<8x8x2xf32> to vector<8x2xf32>
    %363 = vector.shape_cast %362 : vector<8x2xf32> to vector<1x8x2xf32>
    %364 = vector.broadcast %363 : vector<1x8x2xf32> to vector<8x8x2xf32>
    %365 = arith.subf %361, %364 : vector<8x8x2xf32>
    %366 = math.exp %365 : vector<8x8x2xf32>
    %cst_70 = arith.constant dense<0.000000e+00> : vector<8x2xf32>
    %367 = vector.multi_reduction <add>, %366, %cst_70 [0] : vector<8x8x2xf32> to vector<8x2xf32>
    %368 = math.log %367 : vector<8x2xf32>
    %369 = arith.addf %362, %368 : vector<8x2xf32>
    %370 = vector.extract_strided_slice %1 {offsets = [4, 0], sizes = [1, 2], strides = [1, 1]} : vector<8x2xf32> to vector<1x2xf32>
    %cst_71 = arith.constant 0.000000e+00 : f32
    %371 = vector.broadcast %cst_71 : f32 to vector<1x2xf32>
    %372 = arith.cmpf ogt, %370, %371 : vector<1x2xf32>
    %373 = vector.shape_cast %372 : vector<1x2xi1> to vector<1x2xi1>
    %374 = vector.broadcast %373 : vector<1x2xi1> to vector<8x2xi1>
    %375 = arith.select %374, %369, %355 : vector<8x2xi1>, vector<8x2xf32>
    %376 = vector.shape_cast %375 : vector<8x2xf32> to vector<8x1x2xf32>
    %377 = vector.broadcast %376 : vector<8x1x2xf32> to vector<8x8x2xf32>
    %378 = arith.addf %377, %11 : vector<8x8x2xf32>
    %379 = vector.shape_cast %72 : vector<8x2xf32> to vector<1x8x2xf32>
    %380 = vector.broadcast %379 : vector<1x8x2xf32> to vector<8x8x2xf32>
    %381 = arith.addf %378, %380 : vector<8x8x2xf32>
    %cst_72 = arith.constant dense<0xFF800000> : vector<8x2xf32>
    %382 = vector.multi_reduction <maximumf>, %381, %cst_72 [0] : vector<8x8x2xf32> to vector<8x2xf32>
    %383 = vector.shape_cast %382 : vector<8x2xf32> to vector<1x8x2xf32>
    %384 = vector.broadcast %383 : vector<1x8x2xf32> to vector<8x8x2xf32>
    %385 = arith.subf %381, %384 : vector<8x8x2xf32>
    %386 = math.exp %385 : vector<8x8x2xf32>
    %cst_73 = arith.constant dense<0.000000e+00> : vector<8x2xf32>
    %387 = vector.multi_reduction <add>, %386, %cst_73 [0] : vector<8x8x2xf32> to vector<8x2xf32>
    %388 = math.log %387 : vector<8x2xf32>
    %389 = arith.addf %382, %388 : vector<8x2xf32>
    %390 = vector.extract_strided_slice %1 {offsets = [5, 0], sizes = [1, 2], strides = [1, 1]} : vector<8x2xf32> to vector<1x2xf32>
    %cst_74 = arith.constant 0.000000e+00 : f32
    %391 = vector.broadcast %cst_74 : f32 to vector<1x2xf32>
    %392 = arith.cmpf ogt, %390, %391 : vector<1x2xf32>
    %393 = vector.shape_cast %392 : vector<1x2xi1> to vector<1x2xi1>
    %394 = vector.broadcast %393 : vector<1x2xi1> to vector<8x2xi1>
    %395 = arith.select %394, %389, %375 : vector<8x2xi1>, vector<8x2xf32>
    %396 = vector.shape_cast %395 : vector<8x2xf32> to vector<8x1x2xf32>
    %397 = vector.broadcast %396 : vector<8x1x2xf32> to vector<8x8x2xf32>
    %398 = arith.addf %397, %11 : vector<8x8x2xf32>
    %399 = vector.shape_cast %83 : vector<8x2xf32> to vector<1x8x2xf32>
    %400 = vector.broadcast %399 : vector<1x8x2xf32> to vector<8x8x2xf32>
    %401 = arith.addf %398, %400 : vector<8x8x2xf32>
    %cst_75 = arith.constant dense<0xFF800000> : vector<8x2xf32>
    %402 = vector.multi_reduction <maximumf>, %401, %cst_75 [0] : vector<8x8x2xf32> to vector<8x2xf32>
    %403 = vector.shape_cast %402 : vector<8x2xf32> to vector<1x8x2xf32>
    %404 = vector.broadcast %403 : vector<1x8x2xf32> to vector<8x8x2xf32>
    %405 = arith.subf %401, %404 : vector<8x8x2xf32>
    %406 = math.exp %405 : vector<8x8x2xf32>
    %cst_76 = arith.constant dense<0.000000e+00> : vector<8x2xf32>
    %407 = vector.multi_reduction <add>, %406, %cst_76 [0] : vector<8x8x2xf32> to vector<8x2xf32>
    %408 = math.log %407 : vector<8x2xf32>
    %409 = arith.addf %402, %408 : vector<8x2xf32>
    %410 = vector.extract_strided_slice %1 {offsets = [6, 0], sizes = [1, 2], strides = [1, 1]} : vector<8x2xf32> to vector<1x2xf32>
    %cst_77 = arith.constant 0.000000e+00 : f32
    %411 = vector.broadcast %cst_77 : f32 to vector<1x2xf32>
    %412 = arith.cmpf ogt, %410, %411 : vector<1x2xf32>
    %413 = vector.shape_cast %412 : vector<1x2xi1> to vector<1x2xi1>
    %414 = vector.broadcast %413 : vector<1x2xi1> to vector<8x2xi1>
    %415 = arith.select %414, %409, %395 : vector<8x2xi1>, vector<8x2xf32>
    %416 = vector.shape_cast %415 : vector<8x2xf32> to vector<8x1x2xf32>
    %417 = vector.broadcast %416 : vector<8x1x2xf32> to vector<8x8x2xf32>
    %418 = arith.addf %417, %11 : vector<8x8x2xf32>
    %419 = vector.shape_cast %94 : vector<8x2xf32> to vector<1x8x2xf32>
    %420 = vector.broadcast %419 : vector<1x8x2xf32> to vector<8x8x2xf32>
    %421 = arith.addf %418, %420 : vector<8x8x2xf32>
    %cst_78 = arith.constant dense<0xFF800000> : vector<8x2xf32>
    %422 = vector.multi_reduction <maximumf>, %421, %cst_78 [0] : vector<8x8x2xf32> to vector<8x2xf32>
    %423 = vector.shape_cast %422 : vector<8x2xf32> to vector<1x8x2xf32>
    %424 = vector.broadcast %423 : vector<1x8x2xf32> to vector<8x8x2xf32>
    %425 = arith.subf %421, %424 : vector<8x8x2xf32>
    %426 = math.exp %425 : vector<8x8x2xf32>
    %cst_79 = arith.constant dense<0.000000e+00> : vector<8x2xf32>
    %427 = vector.multi_reduction <add>, %426, %cst_79 [0] : vector<8x8x2xf32> to vector<8x2xf32>
    %428 = math.log %427 : vector<8x2xf32>
    %429 = arith.addf %422, %428 : vector<8x2xf32>
    %430 = vector.extract_strided_slice %1 {offsets = [7, 0], sizes = [1, 2], strides = [1, 1]} : vector<8x2xf32> to vector<1x2xf32>
    %cst_80 = arith.constant 0.000000e+00 : f32
    %431 = vector.broadcast %cst_80 : f32 to vector<1x2xf32>
    %432 = arith.cmpf ogt, %430, %431 : vector<1x2xf32>
    %433 = vector.shape_cast %432 : vector<1x2xi1> to vector<1x2xi1>
    %434 = vector.broadcast %433 : vector<1x2xi1> to vector<8x2xi1>
    %435 = arith.select %434, %429, %415 : vector<8x2xi1>, vector<8x2xf32>
    %436 = vector.broadcast %5 : vector<8x1xf32> to vector<8x2xf32>
    %437 = arith.addf %435, %436 : vector<8x2xf32>
    %cst_81 = arith.constant dense<0xFF800000> : vector<2xf32>
    %438 = vector.multi_reduction <maximumf>, %437, %cst_81 [0] : vector<8x2xf32> to vector<2xf32>
    %439 = vector.shape_cast %438 : vector<2xf32> to vector<1x2xf32>
    %440 = vector.broadcast %439 : vector<1x2xf32> to vector<8x2xf32>
    %441 = arith.subf %437, %440 : vector<8x2xf32>
    %442 = math.exp %441 : vector<8x2xf32>
    %cst_82 = arith.constant dense<0.000000e+00> : vector<2xf32>
    %443 = vector.multi_reduction <add>, %442, %cst_82 [0] : vector<8x2xf32> to vector<2xf32>
    %444 = vector.shape_cast %443 : vector<2xf32> to vector<1x2xf32>
    %445 = math.log %444 : vector<1x2xf32>
    %446 = arith.addf %439, %445 : vector<1x2xf32>
    %447 = vector.extract_strided_slice %1 {offsets = [0, 0], sizes = [1, 2], strides = [1, 1]} : vector<8x2xf32> to vector<1x2xf32>
    %448 = arith.subf %446, %293 : vector<1x2xf32>
    %449 = arith.mulf %447, %448 : vector<1x2xf32>
    %c0_83 = arith.constant 0 : index
    %c0_84 = arith.constant 0 : index
    %450 = vector.load %arg8[%c0_83, %c0_84] : memref<1x2xf32, #tpu.memory_space<vmem>>, vector<1x2xf32>
    tpu.vector_store %arg8[%c0_83, %c0_84], %449 {strides = array<i32>} : memref<1x2xf32, #tpu.memory_space<vmem>>, vector<1x2xf32>,
    return
  }
  func.func @transform_0(%arg0: i32) -> (i32, i32) {
    %c0_i32 = arith.constant 0 : i32
    %c0_i32_0 = arith.constant 0 : i32
    return %c0_i32, %arg0 : i32, i32
  }
  func.func @transform_1(%arg0: i32) -> (i32, i32) {
    %c0_i32 = arith.constant 0 : i32
    %c0_i32_0 = arith.constant 0 : i32
    return %c0_i32, %arg0 : i32, i32
  }
  func.func @transform_2(%arg0: i32) -> (i32, i32) {
    %c0_i32 = arith.constant 0 : i32
    %c0_i32_0 = arith.constant 0 : i32
    return %c0_i32, %arg0 : i32, i32
  }
  func.func @transform_3(%arg0: i32) -> (i32, i32) {
    %c0_i32 = arith.constant 0 : i32
    %c0_i32_0 = arith.constant 0 : i32
    %c0_i32_1 = arith.constant 0 : i32
    return %c0_i32, %c0_i32_0 : i32, i32
  }
  func.func @transform_4(%arg0: i32) -> (i32, i32) {
    %c0_i32 = arith.constant 0 : i32
    %c0_i32_0 = arith.constant 0 : i32
    %c0_i32_1 = arith.constant 0 : i32
    return %c0_i32, %c0_i32_0 : i32, i32
  }
  func.func @transform_5(%arg0: i32) -> (i32, i32) {
    %c0_i32 = arith.constant 0 : i32
    %c0_i32_0 = arith.constant 0 : i32
    %c0_i32_1 = arith.constant 0 : i32
    return %c0_i32, %c0_i32_0 : i32, i32
  }
  func.func @transform_6(%arg0: i32) -> (i32, i32) {
    %c0_i32 = arith.constant 0 : i32
    %c0_i32_0 = arith.constant 0 : i32
    %c0_i32_1 = arith.constant 0 : i32
    return %c0_i32, %c0_i32_0 : i32, i32
  }
  func.func @transform_7(%arg0: i32) -> (i32, i32) {
    %c0_i32 = arith.constant 0 : i32
    %c0_i32_0 = arith.constant 0 : i32
    return %arg0, %c0_i32 : i32, i32
  }
}

</mosaic_0001>

<bundles_post_ra>
// kernel: tpu_custom_call.1
= control target key start
LH: loop header
LB: loop body
LE: loop exit
PB: predicated region body
PF: predicated region fallthrough
CT: control target
= control target key end

     0   :  { %v34_v0 = vlaneseq  ;;  %v3554_v1 = vmov 0.0   ;;  %vm3555_vm0 = vmmov 0   ;;  %s5127_s0 = inlined_call_operand.vmem [shape: s32[8,2], index: 0, kind: input, shape index: {}]   ;;  %s5128_s1 = inlined_call_operand.vmem [shape: f32[8,2], index: 1, kind: input, shape index: {}]   ;;  %s5129_s2 = inlined_call_operand.vmem [shape: s32[8,2], index: 2, kind: input, shape index: {}]   ;;  %s5130_s3 = inlined_call_operand.vmem [shape: f32[8,64], index: 3, kind: input, shape index: {}]   ;;  %s5131_s4 = inlined_call_operand.vmem [shape: f32[8,1], index: 4, kind: input, shape index: {}]   ;;  %s5132_s5 = inlined_call_operand.vmem [shape: f32[8,1], index: 5, kind: input, shape index: {}]   ;;  %s5133_s6 = inlined_call_operand.vmem [shape: f32[8,8], index: 6, kind: input, shape index: {}]   ;;  %s5134_s7 = inlined_call_operand.hbm [shape: f32[1,2], index: 7, kind: output, shape index: {}]  }
   0x1   :  { %3239 = vmatprep.subr.mxu0 %v3554_v1  ;;  %3258 = vmatprep.subr.mxu1 %v3554_v1  ;;  %v31_v2 = vld [vmem:[%s5131_s4] sm:$0xff] }
   0x2   :  { %v3605_v3 = vshrl.u32 %v34_v0, 7  ;;  %3255 = vmatprep.mubr.msk.f32.mxu0 %vm3555_vm0, %v3554_v1  ;;  %3274 = vmatprep.mubr.msk.f32.mxu1 %vm3555_vm0, %v3554_v1 }
   0x3   :  { %12 = vsyncpa [#allocation3], 0  ;;  %v3614_v4 = vld [vmem:[%s5127_s0] sm:$0xff]  ;;  %v3556_v5 = vmov 0   ;;  %v3557_v14 = vmov 1.0   ;;  %s3559_s13 = smov [#allocation2]  }
   0x4   :  { %3397 = vset.pattern.permute.xlu0 %v3556_v5  ;;  %3398 = vset.pattern.permute.xlu1 %v3556_v5  ;;  %v3619_v6 = vadd.s32 56, %v3605_v3  ;;  %v3622_v7 = vsub.s32 0, %v3605_v3  ;;  %v3625_v8 = vsub.s32 1, %v3605_v3  ;;  %v3628_v9 = vadd.s32 48, %v3605_v3  ;;  %v3706_v22 = vld [vmem:[%s5128_s1] sm:$0xff]  ;;  %s3015_s14 = sshll.u32 %s3559_s13, 4  ;;  %s3016_s14 = int_to_ptr.vmem [resolvable:$true] %s3015_s14 }
   0x5   :  { %954 = vperm.xlu0 %3397, %v31_v2   ;;  %v3635_v12 = vadd.s32 40, %v3605_v3  ;;  %v3638_v13 = vadd.s32 32, %v3605_v3  ;;  %v3651_v15 = vadd.s32 24, %v3605_v3  ;;  %v3660_v16 = vadd.s32 16, %v3605_v3  ;;  %v3713_v23 = vld [vmem:[%s5130_s3] sm:$0xff]  ;;  %s3532_s17 = scalar_lea.vmem %s3016_s14, 16  ;;  %p3537_p1 = scmp.lt.s32.totalorder %s3016_s14, %s3016_s14 }
   0x6   :  { %5163 = vst [vmem:[#allocation5_spill] sm:$0xff] %v3625_v8  ;;  %v102_v10 = vrot.slane %v3614_v4, %v3622_v7  ;;  %v211_v11 = vrot.slane %v3614_v4, %v3625_v8  ;;  %v3669_v17 = vadd.s32 8, %v3605_v3  ;;  %v3674_v18 = vsub.s32 2, %v3605_v3  ;;  %v33_v40 = vld [vmem:[%s5133_s6] sm:$0xff]  ;;  %p3533_p0 = scmp.ne.s32.totalorder %s3016_s14, %s3532_s17  ;;  %s3536_s18 = scalar_lea.vmem %s3016_s14, 32 }
   0x7   :  { %v3677_v19 = vsub.s32 3, %v3605_v3  ;;  %v3738_v25 = vsub.s32 4, %v3605_v3  ;;  %v3747_v26 = vsub.s32 5, %v3605_v3  ;;  %v3750_v27 = vsub.s32 6, %v3605_v3  ;;  %v32_v49 = vld [vmem:[%s5132_s5] sm:$0xff]  ;;  %p3538_p2 = scmp.lt.s32.totalorder %s3536_s18, %s3532_s17 }
   0x8   :  { %vm110_vm1 = vcmp.eq.s32.totalorder %v3619_v6, %v102_v10  ;;  %vm219_vm2 = vcmp.eq.s32.totalorder %v3619_v6, %v211_v11  ;;  %vm109_vm3 = vcmp.eq.s32.totalorder %v3628_v9, %v102_v10  ;;  %vm218_vm4 = vcmp.eq.s32.totalorder %v3628_v9, %v211_v11  ;;  %5164 = vst [vmem:[#allocation6_spill] sm:$0xff] %v3674_v18  ;;  %v29_v50 = vld [vmem:[%s5129_s2] sm:$0xff] }
   0x9   :  { %3240 = vmatpush3.msk.msra.mxu0 %vm110_vm1, %v3557_v14  ;;  %3259 = vmatpush3.msk.msra.mxu1 %vm219_vm2, %v3557_v14  ;;  %vm108_vm5 = vcmp.eq.s32.totalorder %v3635_v12, %v102_v10  ;;  %vm217_vm6 = vcmp.eq.s32.totalorder %v3635_v12, %v211_v11  ;;  %vm107_vm7 = vcmp.eq.s32.totalorder %v3638_v13, %v102_v10  ;;  %vm127_vm2 = vcmask 523264   ;;  %p3539_p3 = por %p3538_p2, %p3537_p1 }
   0xa   :  { %3241 = vmatprep.subr.mxu0 %v3554_v1  ;;  %3260 = vmatprep.subr.mxu1 %v3554_v1  ;;  %vm216_vm8 = vcmp.eq.s32.totalorder %v3638_v13, %v211_v11  ;;  %vm106_vm9 = vcmp.eq.s32.totalorder %v3651_v15, %v102_v10  ;;  %vm215_vm10 = vcmp.eq.s32.totalorder %v3651_v15, %v211_v11  ;;  %v3755_v28 = vsub.s32 7, %v3605_v3 }
   0xb   :  { %3242 = vmatpush3.msk.msra.mxu0 %vm109_vm3, %v3557_v14  ;;  %3261 = vmatpush3.msk.msra.mxu1 %vm218_vm4, %v3557_v14  ;;  %5165 = vst [vmem:[#allocation7_spill] sm:$0xff] %v3677_v19  ;;  %vm105_vm11 = vcmp.eq.s32.totalorder %v3660_v16, %v102_v10  ;;  %vm214_vm12 = vcmp.eq.s32.totalorder %v3660_v16, %v211_v11  ;;  %vm1962_vm3 = vcmp.gt.f32.partialorder %v3706_v22, 0.0  ;;  %5167 = vst [vmem:[#allocation9_spill] sm:$0xff] %v3738_v25  ;;  %v3558_v2 = vmov 1966171168   ;;  %p3540_p4 = pnand %p3539_p3, %p3533_p0 }
   0xc   :  { %3243 = vmatprep.subr.mxu0 %v3554_v1  ;;  %3262 = vmatprep.subr.mxu1 %v3554_v1  ;;  %vm104_vm13 = vcmp.eq.s32.totalorder %v3669_v17, %v102_v10  ;;  %vm213_vm14 = vcmp.eq.s32.totalorder %v3669_v17, %v211_v11  ;;  %v3693_v20 = vrot.slane %v3614_v4, %v3674_v18  ;;  %v3729_v24 = vsel %vm1962_vm3, 1, %v3556_v5 }
   0xd   :  { %3244 = vmatpush3.msk.msra.mxu0 %vm108_vm5, %v3557_v14  ;;  %3263 = vmatpush3.msk.msra.mxu1 %vm217_vm6, %v3557_v14  ;;  %v3697_v21 = vrot.slane %v3614_v4, %v3677_v19  ;;  %vm103_vm15 = vcmp.eq.s32.totalorder %v3605_v3, %v102_v10  ;;  %vm212_vm1 = vcmp.eq.s32.totalorder %v3605_v3, %v211_v11  ;;  %v966_v0 = vsub.f32 1.0, %v3706_v22 }
   0xe   :  { %3245 = vmatprep.subr.mxu0 %v3554_v1  ;;  %3264 = vmatprep.subr.mxu1 %v3554_v1  ;;  %vm324_vm4 = vcmp.eq.s32.totalorder %v3619_v6, %v3693_v20  ;;  %5166 = vst [vmem:[#allocation8_spill] sm:$0xff] %v3729_v24  ;;  %vm323_vm6 = vcmp.eq.s32.totalorder %v3628_v9, %v3693_v20  ;;  %5168 = vst [vmem:[#allocation10_spill] sm:$0xff] %v3747_v26 }
   0xf   :  { %3246 = vmatpush3.msk.msra.mxu0 %vm107_vm7, %v3557_v14  ;;  %3265 = vmatpush3.msk.msra.mxu1 %vm216_vm8, %v3557_v14  ;;  %vm429_vm5 = vcmp.eq.s32.totalorder %v3619_v6, %v3697_v21  ;;  %vm428_vm7 = vcmp.eq.s32.totalorder %v3628_v9, %v3697_v21  ;;  %vm322_vm8 = vcmp.eq.s32.totalorder %v3635_v12, %v3693_v20  ;;  %v968_v10 = vrot.slane %v966_v0, 1 }
  0x10   :  { %3247 = vmatprep.subr.mxu0 %v3554_v1  ;;  %3266 = vmatprep.subr.mxu1 %v3554_v1  ;;  %5169 = vst [vmem:[#allocation11_spill] sm:$0xff] %v3750_v27  ;;  %5170 = vst [vmem:[#allocation12_spill] sm:$0xff] %v3755_v28  ;;  %vm423_vm3 = vcmp.eq.s32.totalorder %v3669_v17, %v3697_v21  ;;  %v526_v36 = vrot.slane %v3614_v4, %v3738_v25 }
  0x11   :  { %3248 = vmatpush3.msk.msra.mxu0 %vm106_vm9, %v3557_v14  ;;  %3267 = vmatpush3.msk.msra.mxu1 %vm215_vm10, %v3557_v14  ;;  %vm427_vm9 = vcmp.eq.s32.totalorder %v3635_v12, %v3697_v21  ;;  %vm321_vm10 = vcmp.eq.s32.totalorder %v3638_v13, %v3693_v20  ;;  %v3819_v37 = vrot.slane %v3614_v4, %v3747_v26 }
  0x12   :  { %3249 = vmatprep.subr.mxu0 %v3554_v1  ;;  %3268 = vmatprep.subr.mxu1 %v3554_v1  ;;  %v3887_v38 = vrot.slane %v3614_v4, %v3750_v27  ;;  %v3891_v39 = vrot.slane %v3614_v4, %v3755_v28  ;;  %v53_v41 = vrot.slane %v33_v40, %v3625_v8  ;;  %v1802_v4 = vunpack.c.l.s4 %v3558_v2 }
  0x13   :  { %3250 = vmatpush3.msk.msra.mxu0 %vm105_vm11, %v3557_v14  ;;  %3269 = vmatpush3.msk.msra.mxu1 %vm214_vm12, %v3557_v14  ;;  %vm426_vm11 = vcmp.eq.s32.totalorder %v3638_v13, %v3697_v21  ;;  %vm320_vm12 = vcmp.eq.s32.totalorder %v3651_v15, %v3693_v20  ;;  %v46_v42 = vrot.slane %v33_v40, %v3622_v7 }
  0x14   :  { %3251 = vmatprep.subr.mxu0 %v3554_v1  ;;  %3270 = vmatprep.subr.mxu1 %v3554_v1  ;;  %v60_v43 = vrot.slane %v33_v40, %v3674_v18  ;;  %v67_v44 = vrot.slane %v33_v40, %v3677_v19  ;;  %v74_v45 = vrot.slane %v33_v40, %v3738_v25  ;;  %v1803_v11 = vunpack.c.0.s8 %v1802_v4 }
  0x15   :  { %3252 = vmatpush3.msk.msra.mxu0 %vm104_vm13, %v3557_v14  ;;  %3271 = vmatpush3.msk.msra.mxu1 %vm213_vm14, %v3557_v14  ;;  %vm425_vm13 = vcmp.eq.s32.totalorder %v3651_v15, %v3697_v21  ;;  %vm319_vm14 = vcmp.eq.s32.totalorder %v3660_v16, %v3693_v20  ;;  %v81_v46 = vrot.slane %v33_v40, %v3747_v26 }
  0x16   :  { %3253 = vmatprep.subr.mxu0 %v3554_v1  ;;  %3272 = vmatprep.subr.mxu1 %v3554_v1  ;;  %v88_v47 = vrot.slane %v33_v40, %v3750_v27  ;;  %v95_v48 = vrot.slane %v33_v40, %v3755_v28  ;;  %v204_v51 = vrot.slane %v29_v50, %v3622_v7 }
  0x17   :  { %3254 = vmatpush3.msk.msra.mxu0 %vm103_vm15, %v3557_v14  ;;  %3273 = vmatpush3.msk.msra.mxu1 %vm212_vm1, %v3557_v14  ;;  %vm424_vm15 = vcmp.eq.s32.totalorder %v3660_v16, %v3697_v21  ;;  %vm318_vm1 = vcmp.eq.s32.totalorder %v3669_v17, %v3693_v20  ;;  %v309_v59 = vrot.slane %v29_v50, %v3625_v8 }
  0x18   :  { %3256 = vmatmul.mubr.msk.f32.vlgmr.msra.gmra.mxu0 %vm127_vm2, %v3713_v23  ;;  %3275 = vmatmul.mubr.msk.f32.vlgmr.msra.gmra.mxu1 %vm127_vm2, %v3713_v23  ;;  %v414_v60 = vrot.slane %v29_v50, %v3674_v18  ;;  %v519_v61 = vrot.slane %v29_v50, %v3677_v19  ;;  %v624_v62 = vrot.slane %v29_v50, %v3738_v25 }
  0x19   :  { %3277 = vmatprep.subr.mxu0 %v3554_v1  ;;  %3296 = vmatprep.subr.mxu1 %v3554_v1  ;;  %v729_v63 = vrot.slane %v29_v50, %v3747_v26  ;;  %v834_v5 = vrot.slane %v29_v50, %v3750_v27 }
  0x1a   :  { %3278 = vmatpush3.msk.msra.mxu0 %vm324_vm4, %v3557_v14  ;;  %3297 = vmatpush3.msk.msra.mxu1 %vm429_vm5, %v3557_v14  ;;  %vm317_vm4 = vcmp.eq.s32.totalorder %v3605_v3, %v3693_v20  ;;  %vm422_vm5 = vcmp.eq.s32.totalorder %v3605_v3, %v3697_v21 }
  0x1b   :  { %3279 = vmatprep.subr.mxu0 %v3554_v1  ;;  %3298 = vmatprep.subr.mxu1 %v3554_v1 }
  0x1c   :  { %3280 = vmatpush3.msk.msra.mxu0 %vm323_vm6, %v3557_v14  ;;  %3299 = vmatpush3.msk.msra.mxu1 %vm428_vm7, %v3557_v14  ;;  %vm534_vm6 = vcmp.eq.s32.totalorder %v3619_v6, %v526_v36  ;;  %vm639_vm7 = vcmp.eq.s32.totalorder %v3619_v6, %v3819_v37 }
  0x1d   :  { %3281 = vmatprep.subr.mxu0 %v3554_v1  ;;  %3300 = vmatprep.subr.mxu1 %v3554_v1 }
  0x1e   :  { %3282 = vmatpush3.msk.msra.mxu0 %vm322_vm8, %v3557_v14  ;;  %3301 = vmatpush3.msk.msra.mxu1 %vm427_vm9, %v3557_v14  ;;  %vm533_vm8 = vcmp.eq.s32.totalorder %v3628_v9, %v526_v36  ;;  %vm638_vm9 = vcmp.eq.s32.totalorder %v3628_v9, %v3819_v37 }
  0x1f   :  { %3283 = vmatprep.subr.mxu0 %v3554_v1  ;;  %3302 = vmatprep.subr.mxu1 %v3554_v1 }
  0x20   :  { %3284 = vmatpush3.msk.msra.mxu0 %vm321_vm10, %v3557_v14  ;;  %3303 = vmatpush3.msk.msra.mxu1 %vm426_vm11, %v3557_v14  ;;  %vm532_vm10 = vcmp.eq.s32.totalorder %v3635_v12, %v526_v36  ;;  %vm637_vm11 = vcmp.eq.s32.totalorder %v3635_v12, %v3819_v37 }
  0x21   :  { %3285 = vmatprep.subr.mxu0 %v3554_v1  ;;  %3304 = vmatprep.subr.mxu1 %v3554_v1 }
  0x22   :  { %3286 = vmatpush3.msk.msra.mxu0 %vm320_vm12, %v3557_v14  ;;  %3305 = vmatpush3.msk.msra.mxu1 %vm425_vm13, %v3557_v14  ;;  %vm531_vm12 = vcmp.eq.s32.totalorder %v3638_v13, %v526_v36  ;;  %vm636_vm13 = vcmp.eq.s32.totalorder %v3638_v13, %v3819_v37 }
  0x23   :  { %3287 = vmatprep.subr.mxu0 %v3554_v1  ;;  %3306 = vmatprep.subr.mxu1 %v3554_v1 }
  0x24   :  { %3288 = vmatpush3.msk.msra.mxu0 %vm319_vm14, %v3557_v14  ;;  %3307 = vmatpush3.msk.msra.mxu1 %vm424_vm15, %v3557_v14  ;;  %vm530_vm14 = vcmp.eq.s32.totalorder %v3651_v15, %v526_v36  ;;  %vm635_vm15 = vcmp.eq.s32.totalorder %v3651_v15, %v3819_v37 }
  0x25   :  { %3289 = vmatprep.subr.mxu0 %v3554_v1  ;;  %3308 = vmatprep.subr.mxu1 %v3554_v1 }
  0x26   :  { %3290 = vmatpush3.msk.msra.mxu0 %vm318_vm1, %v3557_v14  ;;  %3309 = vmatpush3.msk.msra.mxu1 %vm423_vm3, %v3557_v14  ;;  %vm529_vm1 = vcmp.eq.s32.totalorder %v3660_v16, %v526_v36  ;;  %vm634_vm3 = vcmp.eq.s32.totalorder %v3660_v16, %v3819_v37 }
  0x27   :  { %3291 = vmatprep.subr.mxu0 %v3554_v1  ;;  %3310 = vmatprep.subr.mxu1 %v3554_v1 }
  0x28   :  { %3292 = vmatpush3.msk.msra.mxu0 %vm317_vm4, %v3557_v14  ;;  %3293 = vmatprep.mubr.msk.f32.mxu0 %vm3555_vm0, %v3554_v1  ;;  %vm528_vm4 = vcmp.eq.s32.totalorder %v3669_v17, %v526_v36 }
  0x29   :  { %3311 = vmatpush3.msk.msra.mxu1 %vm422_vm5, %v3557_v14  ;;  %3312 = vmatprep.mubr.msk.f32.mxu1 %vm3555_vm0, %v3554_v1  ;;  %vm633_vm5 = vcmp.eq.s32.totalorder %v3669_v17, %v3819_v37 }
  0x2a   :  { %3294 = vmatmul.mubr.msk.f32.vlgmr.msra.gmra.mxu0 %vm127_vm2, %v3713_v23  ;;  %3313 = vmatmul.mubr.msk.f32.vlgmr.msra.gmra.mxu1 %vm127_vm2, %v3713_v23 }
  0x2b   :  { %3315 = vmatprep.subr.mxu0 %v3554_v1  ;;  %3334 = vmatprep.subr.mxu1 %v3554_v1 }
  0x2c   :  { %3316 = vmatpush3.msk.msra.mxu0 %vm534_vm6, %v3557_v14  ;;  %3335 = vmatpush3.msk.msra.mxu1 %vm639_vm7, %v3557_v14  ;;  %vm527_vm6 = vcmp.eq.s32.totalorder %v3605_v3, %v526_v36  ;;  %vm632_vm7 = vcmp.eq.s32.totalorder %v3605_v3, %v3819_v37  ;;  %v4049_v37 = vmul.f32 %v968_v10, %v3706_v22 }
  0x2d   :  { %3317 = vmatprep.subr.mxu0 %v3554_v1  ;;  %3336 = vmatprep.subr.mxu1 %v3554_v1 }
  0x2e   :  { %3318 = vmatpush3.msk.msra.mxu0 %vm533_vm8, %v3557_v14  ;;  %3337 = vmatpush3.msk.msra.mxu1 %vm638_vm9, %v3557_v14  ;;  %vm744_vm8 = vcmp.eq.s32.totalorder %v3619_v6, %v3887_v38  ;;  %vm849_vm9 = vcmp.eq.s32.totalorder %v3619_v6, %v3891_v39  ;;  %v939_v6 = vrot.slane %v29_v50, %v3755_v28 }
  0x2f   :  { %3319 = vmatprep.subr.mxu0 %v3554_v1  ;;  %3338 = vmatprep.subr.mxu1 %v3554_v1 }
  0x30   :  { %3320 = vmatpush3.msk.msra.mxu0 %vm532_vm10, %v3557_v14  ;;  %3339 = vmatpush3.msk.msra.mxu1 %vm637_vm11, %v3557_v14  ;;  %vm743_vm10 = vcmp.eq.s32.totalorder %v3628_v9, %v3887_v38  ;;  %vm848_vm11 = vcmp.eq.s32.totalorder %v3628_v9, %v3891_v39 }
  0x31   :  { %3321 = vmatprep.subr.mxu0 %v3554_v1  ;;  %3340 = vmatprep.subr.mxu1 %v3554_v1 }
  0x32   :  { %3322 = vmatpush3.msk.msra.mxu0 %vm531_vm12, %v3557_v14  ;;  %3341 = vmatpush3.msk.msra.mxu1 %vm636_vm13, %v3557_v14  ;;  %vm742_vm12 = vcmp.eq.s32.totalorder %v3635_v12, %v3887_v38  ;;  %vm847_vm13 = vcmp.eq.s32.totalorder %v3635_v12, %v3891_v39 }
  0x33   :  { %3323 = vmatprep.subr.mxu0 %v3554_v1  ;;  %3342 = vmatprep.subr.mxu1 %v3554_v1 }
  0x34   :  { %3324 = vmatpush3.msk.msra.mxu0 %vm530_vm14, %v3557_v14  ;;  %3343 = vmatpush3.msk.msra.mxu1 %vm635_vm15, %v3557_v14  ;;  %vm741_vm14 = vcmp.eq.s32.totalorder %v3638_v13, %v3887_v38  ;;  %vm846_vm15 = vcmp.eq.s32.totalorder %v3638_v13, %v3891_v39 }
  0x35   :  { %3325 = vmatprep.subr.mxu0 %v3554_v1  ;;  %3344 = vmatprep.subr.mxu1 %v3554_v1 }
  0x36   :  { %3326 = vmatpush3.msk.msra.mxu0 %vm529_vm1, %v3557_v14  ;;  %3345 = vmatpush3.msk.msra.mxu1 %vm634_vm3, %v3557_v14  ;;  %vm740_vm1 = vcmp.eq.s32.totalorder %v3651_v15, %v3887_v38  ;;  %vm845_vm3 = vcmp.eq.s32.totalorder %v3651_v15, %v3891_v39 }
  0x37   :  { %3327 = vmatprep.subr.mxu0 %v3554_v1  ;;  %3346 = vmatprep.subr.mxu1 %v3554_v1 }
  0x38   :  { %3328 = vmatpush3.msk.msra.mxu0 %vm528_vm4, %v3557_v14  ;;  %3347 = vmatpush3.msk.msra.mxu1 %vm633_vm5, %v3557_v14  ;;  %vm739_vm4 = vcmp.eq.s32.totalorder %v3660_v16, %v3887_v38  ;;  %vm844_vm5 = vcmp.eq.s32.totalorder %v3660_v16, %v3891_v39 }
  0x39   :  { %3329 = vmatprep.subr.mxu0 %v3554_v1  ;;  %3348 = vmatprep.subr.mxu1 %v3554_v1 }
  0x3a   :  { %3330 = vmatpush3.msk.msra.mxu0 %vm527_vm6, %v3557_v14  ;;  %3331 = vmatprep.mubr.msk.f32.mxu0 %vm3555_vm0, %v3554_v1  ;;  %vm738_vm6 = vcmp.eq.s32.totalorder %v3669_v17, %v3887_v38 }
  0x3b   :  { %3349 = vmatpush3.msk.msra.mxu1 %vm632_vm7, %v3557_v14  ;;  %3350 = vmatprep.mubr.msk.f32.mxu1 %vm3555_vm0, %v3554_v1  ;;  %vm843_vm7 = vcmp.eq.s32.totalorder %v3669_v17, %v3891_v39 }
  0x3c   :  { %3332 = vmatmul.mubr.msk.f32.vlgmr.msra.gmra.mxu0 %vm127_vm2, %v3713_v23  ;;  %3351 = vmatmul.mubr.msk.f32.vlgmr.msra.gmra.mxu1 %vm127_vm2, %v3713_v23 }
  0x3d   :  { %3353 = vmatprep.subr.mxu0 %v3554_v1  ;;  %3372 = vmatprep.subr.mxu1 %v3554_v1 }
  0x3e   :  { %3354 = vmatpush3.msk.msra.mxu0 %vm744_vm8, %v3557_v14  ;;  %3373 = vmatpush3.msk.msra.mxu1 %vm849_vm9, %v3557_v14  ;;  %vm737_vm8 = vcmp.eq.s32.totalorder %v3605_v3, %v3887_v38  ;;  %vm842_vm9 = vcmp.eq.s32.totalorder %v3605_v3, %v3891_v39  ;;  %v4052_v38 = vsub.s32 %v1803_v11, %v3605_v3 }
  0x3f   :  { %3355 = vmatprep.subr.mxu0 %v3554_v1  ;;  %3374 = vmatprep.subr.mxu1 %v3554_v1 }
  0x40   :  { %3356 = vmatpush3.msk.msra.mxu0 %vm743_vm10, %v3557_v14  ;;  %3375 = vmatpush3.msk.msra.mxu1 %vm848_vm11, %v3557_v14  ;;  %vm310_vm10 = vcmp.eq.s32.totalorder %v3605_v3, %v309_v59  ;;  %vm415_vm11 = vcmp.eq.s32.totalorder %v3605_v3, %v414_v60 }
  0x41   :  { %3357 = vmatprep.subr.mxu0 %v3554_v1  ;;  %3376 = vmatprep.subr.mxu1 %v3554_v1  ;;  %v4024_v13 = vsel %vm310_vm10, 1.0, %v3554_v1 }
  0x42   :  { %3358 = vmatpush3.msk.msra.mxu0 %vm742_vm12, %v3557_v14  ;;  %3377 = vmatpush3.msk.msra.mxu1 %vm847_vm13, %v3557_v14  ;;  %vm520_vm12 = vcmp.eq.s32.totalorder %v3605_v3, %v519_v61  ;;  %vm625_vm13 = vcmp.eq.s32.totalorder %v3605_v3, %v624_v62  ;;  %5171 = vst [vmem:[#allocation13_spill] sm:$0xff] %v4024_v13 }
  0x43   :  { %3359 = vmatprep.subr.mxu0 %v3554_v1  ;;  %3378 = vmatprep.subr.mxu1 %v3554_v1  ;;  %v4030_v15 = vsel %vm520_vm12, 1.0, %v3554_v1  ;;  %v4033_v16 = vsel %vm625_vm13, 1.0, %v3554_v1 }
  0x44   :  { %3360 = vmatpush3.msk.msra.mxu0 %vm741_vm14, %v3557_v14  ;;  %3379 = vmatpush3.msk.msra.mxu1 %vm846_vm15, %v3557_v14  ;;  %vm730_vm14 = vcmp.eq.s32.totalorder %v3605_v3, %v729_v63  ;;  %vm835_vm15 = vcmp.eq.s32.totalorder %v3605_v3, %v834_v5 }
  0x45   :  { %3361 = vmatprep.subr.mxu0 %v3554_v1  ;;  %3380 = vmatprep.subr.mxu1 %v3554_v1  ;;  %v4036_v17 = vsel %vm730_vm14, 1.0, %v3554_v1  ;;  %v4039_v20 = vsel %vm835_vm15, 1.0, %v3554_v1 }
  0x46   :  { %3362 = vmatpush3.msk.msra.mxu0 %vm740_vm1, %v3557_v14  ;;  %3381 = vmatpush3.msk.msra.mxu1 %vm845_vm3, %v3557_v14  ;;  %vm940_vm1 = vcmp.eq.s32.totalorder %v3605_v3, %v939_v6  ;;  %5172 = vst [vmem:[#allocation14_spill] sm:$0xff] %v4039_v20  ;;  %vm1079_vm3 = vcmask 1041409  }
  0x47   :  { %3363 = vmatprep.subr.mxu0 %v3554_v1  ;;  %3382 = vmatprep.subr.mxu1 %v3554_v1  ;;  %v4042_v21 = vsel %vm940_vm1, 1.0, %v3554_v1  ;;  %vm3007_vm1 = vcmask 8192  }
  0x48   :  { %3364 = vmatpush3.msk.msra.mxu0 %vm739_vm4, %v3557_v14  ;;  %3383 = vmatpush3.msk.msra.mxu1 %vm844_vm5, %v3557_v14  ;;  %5173 = vst [vmem:[#allocation15_spill] sm:$0xff] %v4042_v21  ;;  %vm1081_vm4 = vcmask 1042434   ;;  %vm1083_vm5 = vcmask 1043459  }
  0x49   :  { %3365 = vmatprep.subr.mxu0 %v3554_v1  ;;  %3384 = vmatprep.subr.mxu1 %v3554_v1 }
  0x4a   :  { %3366 = vmatpush3.msk.msra.mxu0 %vm738_vm6, %v3557_v14  ;;  %3385 = vmatpush3.msk.msra.mxu1 %vm843_vm7, %v3557_v14  ;;  %vm1085_vm6 = vcmask 1044484   ;;  %vm1087_vm7 = vcmask 1045509  }
  0x4b   :  { %3367 = vmatprep.subr.mxu0 %v3554_v1  ;;  %3386 = vmatprep.subr.mxu1 %v3554_v1 }
  0x4c   :  { %3368 = vmatpush3.msk.msra.mxu0 %vm737_vm8, %v3557_v14  ;;  %3369 = vmatprep.mubr.msk.f32.mxu0 %vm3555_vm0, %v3554_v1  ;;  %vm1089_vm8 = vcmask 1046534  }
  0x4d   :  { %3387 = vmatpush3.msk.msra.mxu1 %vm842_vm9, %v3557_v14  ;;  %3388 = vmatprep.mubr.msk.f32.mxu1 %vm3555_vm0, %v3554_v1  ;;  %vm205_vm0 = vcmp.eq.s32.totalorder %v3605_v3, %v204_v51  ;;  %v4027_v14 = vsel %vm415_vm11, 1.0, %v3554_v1  ;;  %vm1091_vm9 = vcmask 1047559  }
  0x4e   :  { %3370 = vmatmul.mubr.msk.f32.vlgmr.msra.gmra.mxu0 %vm127_vm2, %v3713_v23  ;;  %3389 = vmatmul.mubr.msk.f32.vlgmr.msra.gmra.mxu1 %vm127_vm2, %v3713_v23  ;;  %v4001_v52 = vsel %vm205_vm0, 1.0, %v3554_v1  ;;  %vm944_vm2 = vcmask 15360  }
  0x4f   :  { %55 = vbcast.lane.b32.xlu1 %v53_v41, 256  ;;  %48 = vbcast.lane.b32.xlu0 %v46_v42, 256 }
  0x53   :  { %62 = vbcast.lane.b32.xlu1 %v60_v43, 256  ;;  %69 = vbcast.lane.b32.xlu0 %v67_v44, 256 }
  0x57   :  { %76 = vbcast.lane.b32.xlu1 %v74_v45, 256  ;;  %83 = vbcast.lane.b32.xlu0 %v81_v46, 256 }
  0x5b   :  { %90 = vbcast.lane.b32.xlu1 %v88_v47, 256  ;;  %97 = vbcast.lane.b32.xlu0 %v95_v48, 256 }
  0x5f   :  { %973 = vperm.xlu1 %3398, %v32_v49  }
  0x80   :  { %v4003_v53 = vpop.permute.xlu0 %954 }
  0x81   :  { %v957_v54 = vmul.f32 %v4001_v52, %v4003_v53 }
  0x83   :  { %v958_v55 = vsel %vm944_vm2, %v957_v54, 0.0 }
  0x84   :  { %v959_v56 = vrot.slane %v958_v55, 4 }
  0x86   :  { %v960_v57 = vadd.f32 %v959_v56, %v958_v55 }
  0x88   :  { %v961_v58 = vrot.slane %v960_v57, 2 }
  0x8a   :  { %v962_v9 = vadd.f32 %v961_v58, %v960_v57 }
  0x8c   :  { %v963_v12 = vrot.slane %v962_v9, 1 }
  0x8e   :  { %v4054_v39 = vadd.f32 %v963_v12, %v962_v9 }
  0xc1   :  { %v4044_v23 = vpop.permute.xlu1 %55  ;;  %v4046_v36 = vpop.permute.xlu0 %48 }
  0xc2   :  { %v1008_v40 = vmul.f32 %v4024_v13, %v4044_v23  ;;  %v1130_v41 = vmul.f32 %v4027_v14, %v4044_v23  ;;  %v1245_v1 = vmul.f32 %v4030_v15, %v4044_v23  ;;  %v1360_v42 = vmul.f32 %v4033_v16, %v4044_v23 }
  0xc3   :  { %v1007_v22 = vmul.f32 %v4024_v13, %v4046_v36  ;;  %v1129_v3 = vmul.f32 %v4027_v14, %v4046_v36  ;;  %v1244_v43 = vmul.f32 %v4030_v15, %v4046_v36  ;;  %v4075_v47 = vmul.f32 %v4033_v16, %v4046_v36 }
  0xc4   :  { %v1022_v44 = vsel %vm944_vm2, %v1008_v40, 0.0  ;;  %v1144_v45 = vsel %vm944_vm2, %v1130_v41, 0.0  ;;  %v1259_v46 = vsel %vm944_vm2, %v1245_v1, 0.0  ;;  %v4087_v63 = vsel %vm944_vm2, %v1360_v42, 0.0 }
  0xc5   :  { %5174 = vst [vmem:[#allocation16_spill] sm:$0xff] %v4075_v47  ;;  %v1023_v48 = vrot.slane %v1022_v44, 4  ;;  %v1145_v49 = vrot.slane %v1144_v45, 4  ;;  %v1260_v50 = vrot.slane %v1259_v46, 4  ;;  %v1015_v51 = vsel %vm944_vm2, %v1007_v22, 0.0  ;;  %v4078_v54 = vpop.permute.xlu1 %62  ;;  %v4080_v55 = vpop.permute.xlu0 %69  ;;  %5175 = vst [vmem:[#allocation17_spill] sm:$0xff] %v4087_v63 }
  0xc6   :  { %v1016_v56 = vrot.slane %v1015_v51, 4  ;;  %v1137_v57 = vsel %vm944_vm2, %v1129_v3, 0.0  ;;  %v1252_v58 = vsel %vm944_vm2, %v1244_v43, 0.0  ;;  %v1009_v59 = vmul.f32 %v4024_v13, %v4078_v54 }
  0xc7   :  { %v1024_v60 = vadd.f32 %v1023_v48, %v1022_v44  ;;  %v1146_v61 = vadd.f32 %v1145_v49, %v1144_v45  ;;  %v1138_v62 = vrot.slane %v1137_v57, 4  ;;  %v1253_v2 = vrot.slane %v1252_v58, 4 }
  0xc8   :  { %v1017_v0 = vadd.f32 %v1016_v56, %v1015_v51  ;;  %v1029_v4 = vsel %vm944_vm2, %v1009_v59, 0.0  ;;  %v1131_v5 = vmul.f32 %v4027_v14, %v4078_v54  ;;  %v4092_v12 = vadd.f32 %v1260_v50, %v1259_v46 }
  0xc9   :  { %v1025_v6 = vrot.slane %v1024_v60, 2  ;;  %v1147_v9 = vrot.slane %v1146_v61, 2  ;;  %v1139_v10 = vadd.f32 %v1138_v62, %v1137_v57  ;;  %v1030_v11 = vrot.slane %v1029_v4, 4  ;;  %v4097_v42 = vpop.permute.xlu1 %76  ;;  %v4101_v45 = vpop.permute.xlu0 %83 }
  0xca   :  { %5176 = vst [vmem:[#allocation18_spill] sm:$0xff] %v4092_v12  ;;  %v1018_v40 = vrot.slane %v1017_v0, 2  ;;  %v1151_v41 = vsel %vm944_vm2, %v1131_v5, 0.0  ;;  %v1246_v1 = vmul.f32 %v4030_v15, %v4078_v54  ;;  %v4099_v43 = vadd.f32 %v1253_v2, %v1252_v58 }
  0xcb   :  { %v1026_v22 = vadd.f32 %v1025_v6, %v1024_v60  ;;  %v1140_v3 = vrot.slane %v1139_v10, 2  ;;  %v1031_v44 = vadd.f32 %v1030_v11, %v1029_v4  ;;  %v4103_v48 = vadd.f32 %v1147_v9, %v1146_v61 }
  0xcc   :  { %5177 = vst [vmem:[#allocation19_spill] sm:$0xff] %v4099_v43  ;;  %v1019_v49 = vadd.f32 %v1018_v40, %v1017_v0  ;;  %v1152_v46 = vrot.slane %v1151_v41, 4  ;;  %v4106_v50 = vsel %vm944_vm2, %v1246_v1, 0.0  ;;  %v4112_v59 = vmul.f32 %v4033_v16, %v4078_v54 }
  0xcd   :  { %5178 = vst [vmem:[#allocation20_spill] sm:$0xff] %v4106_v50  ;;  %v1027_v51 = vrot.slane %v1026_v22, 1  ;;  %v4108_v56 = vadd.f32 %v1140_v3, %v1139_v10  ;;  %v1032_v57 = vrot.slane %v1031_v44, 2  ;;  %v1010_v61 = vmul.f32 %v4024_v13, %v4080_v55  ;;  %v4132_v40 = vpop.permute.xlu1 %90 }
  0xce   :  { %5179 = vst [vmem:[#allocation21_spill] sm:$0xff] %v4112_v59  ;;  %v4114_v58 = vadd.f32 %v1152_v46, %v1151_v41  ;;  %v1132_v62 = vmul.f32 %v4027_v14, %v4080_v55  ;;  %v1020_v0 = vrot.slane %v1019_v49, 1  ;;  %v1011_v4 = vmul.f32 %v4024_v13, %v4097_v42  ;;  %v4138_v46 = vpop.permute.xlu0 %97 }
  0xcf   :  { %v1033_v2 = vadd.f32 %v1032_v57, %v1031_v44  ;;  %v1133_v5 = vmul.f32 %v4027_v14, %v4097_v42  ;;  %v1036_v9 = vsel %vm944_vm2, %v1010_v61, 0.0  ;;  %v4130_v11 = vmul.f32 %v4030_v15, %v4080_v55 }
  0xd0   :  { %v1158_v10 = vsel %vm944_vm2, %v1132_v62, 0.0  ;;  %v1037_v41 = vrot.slane %v1036_v9, 4  ;;  %v1043_v3 = vsel %vm944_vm2, %v1011_v4, 0.0  ;;  %v4143_v62 = vmul.f32 %v4030_v15, %v4097_v42 }
  0xd1   :  { %5180 = vst [vmem:[#allocation22_spill] sm:$0xff] %v4130_v11  ;;  %v1159_v1 = vrot.slane %v1158_v10, 4  ;;  %v4136_v44 = vsel %vm944_vm2, %v1133_v5, 0.0  ;;  %v1044_v57 = vrot.slane %v1043_v3, 4  ;;  %v1012_v35 = vmul.f32 %v4024_v13, %v4101_v45 }
  0xd2   :  { %5181 = vst [vmem:[#allocation23_spill] sm:$0xff] %v4143_v62  ;;  %v1038_v34 = vadd.f32 %v1037_v41, %v1036_v9  ;;  %v4151_v4 = vmul.f32 %v4027_v14, %v4101_v45  ;;  %v1013_v5 = vmul.f32 %v4024_v13, %v4132_v40  ;;  %v4157_v32 = vmul.f32 %v4027_v14, %v4132_v40 }
  0xd3   :  { %v4147_v33 = vadd.f32 %v1159_v1, %v1158_v10  ;;  %v1014_v31 = vmul.f32 %v4024_v13, %v4138_v46  ;;  %v1136_v30 = vmul.f32 %v4027_v14, %v4138_v46  ;;  %v1021_v9 = vadd.f32 %v1020_v0, %v1019_v49 }
  0xd4   :  { %v1039_v10 = vrot.slane %v1038_v34, 2  ;;  %v1028_v41 = vadd.f32 %v1027_v51, %v1026_v22  ;;  %v1034_v1 = vrot.slane %v1033_v2, 1  ;;  %v1045_v29 = vadd.f32 %v1044_v57, %v1043_v3 }
  0xd5   :  { %v1064_v60 = vsel %vm944_vm2, %v1014_v31, 0.0  ;;  %v4165_v61 = vsel %vm944_vm2, %v1136_v30, 0.0  ;;  %v1050_v6 = vsel %vm944_vm2, %v1012_v35, 0.0  ;;  %v1057_v28 = vsel %vm944_vm2, %v1013_v5, 0.0 }
  0xd6   :  { %v1065_v27 = vrot.slane %v1064_v60, 4  ;;  %v4172_v25 = vmul.f32 %v4030_v15, %v4138_v46  ;;  %v4174_v49 = vadd.f32 %v1039_v10, %v1038_v34  ;;  %v4178_v31 = vadd.f32 %v1034_v1, %v1033_v2 }
  0xd7   :  { %v1046_v30 = vrot.slane %v1045_v29, 2  ;;  %v1051_v0 = vrot.slane %v1050_v6, 4  ;;  %v1058_v3 = vrot.slane %v1057_v28, 4  ;;  %v4188_v26 = vsel %vm1079_vm3, %v1028_v41, %v1021_v9 }
  0xd8   :  { %5182 = vst [vmem:[#allocation24_spill] sm:$0xff] %v4172_v25  ;;  %v197_v22 = vpop.f32.mrf.mxu0  ;;  %v4176_v51 = vpop.f32.mrf.mxu1  ;;  %v4180_v35 = vadd.f32 %v1065_v27, %v1064_v60 }
  0xd9   :  { %v943_v57 = vmul.f32 %v4001_v52, %v197_v22  ;;  %v4185_v5 = vmul.f32 %v4024_v13, %v4176_v51  ;;  %v4193_v10 = vadd.f32 %v4003_v53, %v197_v22  ;;  %v4196_v1 = vadd.f32 %v1046_v30, %v1045_v29 }
  0xda   :  { %v4190_v34 = vpop.permute.xlu1 %973  ;;  %v4198_v27 = vadd.f32 %v1051_v0, %v1050_v6  ;;  %v3257_v60 = vpop.f32.mrf.mxu0  ;;  %v4206_v41 = vadd.f32 %v1058_v3, %v1057_v28 }
  0xdb   :  { %5183 = vst [vmem:[#allocation25_spill] sm:$0xff] %v4190_v34  ;;  %v986_v19 = vmul.f32 %v4024_v13, %v4190_v34  ;;  %v1108_v18 = vmul.f32 %v4027_v14, %v4190_v34  ;;  %v1223_v9 = vmul.f32 %v4030_v15, %v4190_v34  ;;  %v3276_v53 = vpop.f32.mrf.mxu1  ;;  %v976_v22 = vmul.f32 %v4001_v52, %v4190_v34 }
  0xdc   :  { %v1338_v29 = vmul.f32 %v4033_v16, %v4190_v34  ;;  %v1453_v6 = vmul.f32 %v4036_v17, %v4190_v34  ;;  %v1568_v30 = vmul.f32 %v4039_v20, %v4190_v34  ;;  %v945_v3 = vsel %vm944_vm2, %v943_v57, 0.0 }
  0xdd   :  { %v987_v0 = vsel %vm944_vm2, %v986_v19, 0.0  ;;  %v1109_v60 = vsel %vm944_vm2, %v1108_v18, 0.0  ;;  %v1224_v28 = vsel %vm944_vm2, %v1223_v9, 0.0  ;;  %v4224_v24 = vmul.f32 %v4042_v21, %v4190_v34 }
  0xde   :  { %v988_v53 = vrot.slane %v987_v0, 4  ;;  %v1110_v2 = vrot.slane %v1109_v60, 4  ;;  %v1225_v59 = vrot.slane %v1224_v28, 4  ;;  %v1339_v63 = vsel %vm944_vm2, %v1338_v29, 0.0 }
  0xdf   :  { %v1340_v47 = vrot.slane %v1339_v63, 4  ;;  %v1454_v8 = vsel %vm944_vm2, %v1453_v6, 0.0  ;;  %5184 = vst [vmem:[#allocation26_spill] sm:$0xff] %v4224_v24  ;;  %v946_v25 = vrot.slane %v945_v3, 4  ;;  %v4227_v57 = vsel %vm944_vm2, %v1568_v30, 0.0 }
  0xe0   :  { %v989_v19 = vadd.f32 %v988_v53, %v987_v0  ;;  %v1111_v13 = vadd.f32 %v1110_v2, %v1109_v60  ;;  %v1226_v18 = vadd.f32 %v1225_v59, %v1224_v28  ;;  %v1455_v62 = vrot.slane %v1454_v8, 4  ;;  %5185 = vst [vmem:[#allocation27_spill] sm:$0xff] %v4227_v57 }
  0xe1   :  { %v1341_v9 = vadd.f32 %v1340_v47, %v1339_v63  ;;  %v947_v11 = vadd.f32 %v946_v25, %v945_v3  ;;  %v977_v50 = vsel %vm944_vm2, %v976_v22, 0.0  ;;  %v1800_v2 = vcombine.high %v4193_v10, %v4193_v10 }
  0xe2   :  { %v1112_v29 = vrot.slane %v1111_v13, 2  ;;  %v1227_v12 = vrot.slane %v1226_v18, 2  ;;  %v4230_v43 = vadd.f32 %v1455_v62, %v1454_v8  ;;  %v978_v6 = vrot.slane %v977_v50, 4 }
  0xe3   :  { %v1342_v20 = vrot.slane %v1341_v9, 2  ;;  %v948_v34 = vrot.slane %v947_v11, 2  ;;  %v990_v21 = vrot.slane %v989_v19, 2  ;;  %v1807_v8 = vrot.slane %v4193_v10, %v4052_v38 }
  0xe4   :  { %5186 = vst [vmem:[#allocation28_spill] sm:$0xff] %v4230_v43  ;;  %v1113_v59 = vadd.f32 %v1112_v29, %v1111_v13  ;;  %v1228_v0 = vadd.f32 %v1227_v12, %v1226_v18  ;;  %v979_v63 = vadd.f32 %v978_v6, %v977_v50  ;;  %v1814_v3 = vrot.slane %v1800_v2, %v4052_v38 }
  0xe5   :  { %v4235_v30 = vadd.f32 %v1342_v20, %v1341_v9  ;;  %v949_v25 = vadd.f32 %v948_v34, %v947_v11  ;;  %v991_v22 = vadd.f32 %v990_v21, %v989_v19  ;;  %v1815_v12 = vcombine.high %v1807_v8, %v1807_v8 }
  0xe6   :  { %v1114_v62 = vrot.slane %v1113_v59, 1  ;;  %v1229_v60 = vrot.slane %v1228_v0, 1  ;;  %v980_v28 = vrot.slane %v979_v63, 2  ;;  %v1816_v9 = vcombine.high %v1814_v3, %v1814_v3 }
  0xe7   :  { %v950_v24 = vrot.slane %v949_v25, 1  ;;  %v992_v13 = vrot.slane %v991_v22, 1  ;;  %v1823_v34 = vrot.slane %v1807_v8, %v4052_v38  ;;  %v1830_v19 = vrot.slane %v1814_v3, %v4052_v38 }
  0xe8   :  { %v1115_v18 = vadd.f32 %v1114_v62, %v1113_v59  ;;  %v981_v20 = vadd.f32 %v980_v28, %v979_v63  ;;  %v4244_v29 = vadd.f32 %v1229_v60, %v1228_v0  ;;  %v1837_v2 = vrot.slane %v1815_v12, %v4052_v38 }
  0xe9   :  { %v951_v21 = vadd.f32 %v950_v24, %v949_v25  ;;  %v993_v11 = vadd.f32 %v992_v13, %v991_v22  ;;  %v1844_v47 = vrot.slane %v1816_v9, %v4052_v38  ;;  %v1845_v25 = vcombine.high %v1823_v34, %v1823_v34 }
  0xea   :  { %v982_v6 = vrot.slane %v981_v20, 1  ;;  %v4248_v59 = vpop.f32.mrf.mxu0  ;;  %v4250_v62 = vpop.f32.mrf.mxu1  ;;  %v4253_v63 = vmul.f32 %v1115_v18, %v4049_v37  ;;  %v1846_v22 = vcombine.high %v1830_v19, %v1830_v19  ;;  %v1847_v60 = vcombine.high %v1837_v2, %v1837_v2 }
  0xeb   :  { %v994_v24 = vmul.f32 %v993_v11, %v4049_v37  ;;  %v965_v0 = vadd.f32 %v4054_v39, %v951_v21  ;;  %v1848_v28 = vcombine.high %v1844_v47, %v1844_v47  ;;  %v1852_v9 = vrot.slane %v1823_v34, %v3622_v7 }
  0xec   :  { %v983_v8 = vadd.f32 %v982_v6, %v981_v20  ;;  %v3295_v3 = vpop.f32.mrf.mxu0  ;;  %v3314_v13 = vpop.f32.mrf.mxu1  ;;  %v1856_v53 = vrot.slane %v1837_v2, %v3622_v7  ;;  %v1860_v18 = vrot.slane %v1845_v25, %v3622_v7  ;;  %v1864_v11 = vrot.slane %v1847_v60, %v3622_v7 }
  0xed   :  { %v996_v12 = vrot.slane %v994_v24, 1  ;;  %v1868_v57 = vrot.slane %v1830_v19, %v3622_v7  ;;  %v1872_v39 = vrot.slane %v1844_v47, %v3622_v7  ;;  %v1876_v21 = vrot.slane %v1846_v22, %v3622_v7 }
  0xee   :  { %v984_v50 = vmul.f32 %v983_v8, %v4049_v37  ;;  %v1880_v6 = vrot.slane %v1848_v28, %v3622_v7  ;;  %v1889_v34 = vadd.f32 %v1852_v9, %v4046_v36  ;;  %v1890_v2 = vadd.f32 %v1856_v53, %v4044_v23 }
  0xef   :  { %v1891_v25 = vadd.f32 %v1860_v18, %v4078_v54  ;;  %v1892_v8 = vadd.f32 %v1864_v11, %v4080_v55  ;;  %v1893_v19 = vadd.f32 %v1868_v57, %v4097_v42  ;;  %v1894_v47 = vadd.f32 %v1872_v39, %v4101_v45 }
  0xf0   :  { %v985_v24 = vadd.f32 %v984_v50, %v965_v0  ;;  %v1895_v60 = vadd.f32 %v1876_v21, %v4132_v40  ;;  %v1000_v22 = vsel %vm944_vm2, %v4185_v5, 0.0  ;;  %v5187_v53 = vrot.slane %v4174_v49, 1 }
  0xf1   :  { %v1001_v50 = vrot.slane %v1000_v22, 4  ;;  %v1048_v3 = vrot.slane %v4196_v1, 1  ;;  %v1053_v57 = vrot.slane %v4198_v27, 2  ;;  %v1060_v13 = vrot.slane %v4206_v41, 2 }
  0xf2   :  { %v4276_v28 = vadd.f32 %v996_v12, %v985_v24  ;;  %v1042_v0 = vadd.f32 %v5187_v53, %v4174_v49  ;;  %v1067_v9 = vrot.slane %v4180_v35, 2  ;;  %v1082_v5 = vsel %vm1081_vm4, %v4178_v31, %v4188_v26 }
  0xf3   :  { %v1896_v12 = vadd.f32 %v1880_v6, %v4138_v46  ;;  %v1002_v18 = vadd.f32 %v1001_v50, %v1000_v22  ;;  %v1049_v11 = vadd.f32 %v1048_v3, %v4196_v1  ;;  %v1054_v39 = vadd.f32 %v1053_v57, %v4198_v27 }
  0xf4   :  { %v1084_v49 = vsel %vm1083_vm5, %v1042_v0, %v1082_v5  ;;  %v1061_v21 = vadd.f32 %v1060_v13, %v4206_v41  ;;  %v1068_v24 = vadd.f32 %v1067_v9, %v4180_v35  ;;  %v4295_v53 = vadd.f32 %v1889_v34, %v4176_v51 }
  0xf5   :  { %v1003_v20 = vrot.slane %v1002_v18, 2  ;;  %v1086_v43 = vsel %vm1085_vm6, %v1049_v11, %v1084_v49  ;;  %v4299_v26 = vadd.f32 %v1890_v2, %v4176_v51  ;;  %v4302_v31 = vadd.f32 %v1891_v25, %v4176_v51 }
  0xf6   :  { %v1055_v1 = vrot.slane %v1054_v39, 1  ;;  %v1062_v6 = vrot.slane %v1061_v21, 1  ;;  %v1069_v22 = vrot.slane %v1068_v24, 1  ;;  %v4305_v27 = vadd.f32 %v1893_v19, %v4176_v51 }
  0xf7   :  { %v1004_v41 = vadd.f32 %v1003_v20, %v1002_v18  ;;  %v4308_v35 = vadd.f32 %v1892_v8, %v4176_v51  ;;  %v4311_v34 = vadd.f32 %v1894_v47, %v4176_v51  ;;  %v4314_v50 = vadd.f32 %v1895_v60, %v4176_v51 }
  0xf8   :  { %v1056_v2 = vadd.f32 %v1055_v1, %v1054_v39  ;;  %v1063_v0 = vadd.f32 %v1062_v6, %v1061_v21  ;;  %v1070_v25 = vadd.f32 %v1069_v22, %v1068_v24  ;;  %v4317_v3 = vadd.f32 %v1896_v12, %v4176_v51 }
  0xf9   :  { %v1005_v57 = vrot.slane %v1004_v41, 1  ;;  %v1905_v19 = vsel %vm944_vm2, %v4295_v53, -inf  ;;  %v1906_v20 = vsel %vm944_vm2, %v4299_v26, -inf  ;;  %v1907_v8 = vsel %vm944_vm2, %v4302_v31, -inf }
  0xfa   :  { %v1088_v47 = vsel %vm1087_vm7, %v1056_v2, %v1086_v43  ;;  %v1909_v60 = vsel %vm944_vm2, %v4305_v27, -inf  ;;  %v1911_v13 = vsel %vm944_vm2, %v4311_v34, -inf  ;;  %v1913_v51 = vsel %vm944_vm2, %v4314_v50, -inf }
  0xfb   :  { %v1090_v9 = vsel %vm1089_vm8, %v1063_v0, %v1088_v47  ;;  %v1908_v5 = vsel %vm944_vm2, %v4308_v35, -inf  ;;  %v1910_v12 = vmax.f32 %v1905_v19, %v1909_v60  ;;  %v1912_v18 = vmax.f32 %v1906_v20, %v1911_v13 }
  0xfc   :  { %v4335_v11 = vpop.f32.mrf.mxu0  ;;  %v4337_v49 = vpop.f32.mrf.mxu1  ;;  %v1092_v43 = vsel %vm1091_vm9, %v1070_v25, %v1090_v9  ;;  %v1914_v39 = vmax.f32 %v1907_v8, %v1913_v51  ;;  %v1915_v21 = vsel %vm944_vm2, %v4317_v3, -inf  ;;  %v1121_v24 = vmul.f32 %v4027_v14, %v4248_v59 }
  0xfd   :  { %5188 = vst [vmem:[#allocation29_spill] sm:$0xff] %v4337_v49  ;;  %v1094_v1 = vmul.f32 %v4001_v52, %v1092_v43  ;;  %v1916_v6 = vmax.f32 %v1908_v5, %v1915_v21  ;;  %v1917_v22 = vmax.f32 %v1910_v12, %v1912_v18  ;;  %v1236_v2 = vmul.f32 %v4030_v15, %v4250_v62 }
  0xfe   :  { %v3333_v0 = vpop.f32.mrf.mxu0  ;;  %v3352_v19 = vpop.f32.mrf.mxu1  ;;  %v1122_v20 = vsel %vm944_vm2, %v1121_v24, 0.0  ;;  %v1351_v25 = vmul.f32 %v4033_v16, %v4335_v11  ;;  %v1466_v8 = vmul.f32 %v4036_v17, %v4337_v49  ;;  %v1142_v47 = vrot.slane %v4108_v56, 1 }
  0xff   :  { %v1095_v60 = vsel %vm944_vm2, %v1094_v1, 0.0  ;;  %v1918_v52 = vmax.f32 %v1914_v39, %v1916_v6  ;;  %v1123_v13 = vrot.slane %v1122_v20, 4  ;;  %v1237_v51 = vsel %vm944_vm2, %v1236_v2, 0.0 }
 0x100   :  { %v1096_v9 = vrot.slane %v1095_v60, 4  ;;  %v1238_v5 = vrot.slane %v1237_v51, 4  ;;  %v1352_v12 = vsel %vm944_vm2, %v1351_v25, 0.0  ;;  %v4357_v18 = vsel %vm944_vm2, %v1466_v8, 0.0 }
 0x101   :  { %v1006_v43 = vadd.f32 %v1005_v57, %v1004_v41  ;;  %v4359_v21 = vmax.f32 %v1917_v22, %v1918_v52  ;;  %v1124_v24 = vadd.f32 %v1123_v13, %v1122_v20  ;;  %v1353_v0 = vrot.slane %v1352_v12, 4 }
 0x102   :  { %v1097_v19 = vadd.f32 %v1096_v9, %v1095_v60  ;;  %v1239_v49 = vadd.f32 %v1238_v5, %v1237_v51  ;;  %v4363_v39 = vadd.f32 %v1142_v47, %v4108_v56 }
 0x103   :  { %v1920_v6 = vsub.f32 %v4295_v53, %v4359_v21  ;;  %v1921_v2 = vsub.f32 %v4299_v26, %v4359_v21  ;;  %v1922_v41 = vsub.f32 %v4302_v31, %v4359_v21  ;;  %v1923_v57 = vsub.f32 %v4308_v35, %v4359_v21 }
 0x104   :  { %v1098_v22 = vrot.slane %v1097_v19, 2  ;;  %v1924_v20 = vsub.f32 %v4305_v27, %v4359_v21  ;;  %v1925_v56 = vsub.f32 %v4311_v34, %v4359_v21  ;;  %v1926_v25 = vsub.f32 %v4314_v50, %v4359_v21 }
 0x105   :  { %v1927_v53 = vsub.f32 %v4317_v3, %v4359_v21  ;;  %v1928_v26 = vmul.f32 1.442695, %v1920_v6  ;;  %v1930_v8 = vmul.f32 1.442695, %v1921_v2  ;;  %v1932_v47 = vmul.f32 1.442695, %v1922_v41 }
 0x106   :  { %v1099_v31 = vadd.f32 %v1098_v22, %v1097_v19  ;;  %v1934_v60 = vmul.f32 1.442695, %v1923_v57  ;;  %v1936_v52 = vmul.f32 1.442695, %v1924_v20  ;;  %v1149_v35 = vrot.slane %v4103_v48, 1 }
 0x107   :  { %3399 = vpow2.f32 %v1928_v26  ;;  %v1938_v13 = vmul.f32 1.442695, %v1925_v56  ;;  %v1940_v27 = vmul.f32 1.442695, %v1926_v25  ;;  %v1125_v51 = vrot.slane %v1124_v24, 2 }
 0x108   :  { %v1100_v9 = vrot.slane %v1099_v31, 1  ;;  %3401 = vpow2.f32 %v1930_v8  ;;  %v1240_v34 = vrot.slane %v1239_v49, 2  ;;  %v4382_v5 = vadd.f32 %v1353_v0, %v1352_v12 }
 0x109   :  { %3403 = vpow2.f32 %v1932_v47  ;;  %v1942_v50 = vmul.f32 1.442695, %v1927_v53  ;;  %v1126_v3 = vadd.f32 %v1125_v51, %v1124_v24  ;;  %v5189_v6 = vrot.slane %v4114_v58, 2 }
 0x10a   :  { %v1101_v2 = vadd.f32 %v1100_v9, %v1099_v31  ;;  %3405 = vpow2.f32 %v1934_v60  ;;  %v4387_v41 = vadd.f32 %v1240_v34, %v1239_v49  ;;  %v1150_v57 = vadd.f32 %v1149_v35, %v4103_v48 }
 0x10b   :  { %v1155_v19 = vadd.f32 %v5189_v6, %v4114_v58  ;;  %3407 = vpow2.f32 %v1936_v52  ;;  %v1127_v22 = vrot.slane %v1126_v3, 1  ;;  %v1161_v56 = vrot.slane %v4147_v33, 2 }
 0x10c   :  { %v1102_v12 = vadd.f32 %v1101_v2, %v1006_v43  ;;  %3409 = vpow2.f32 %v1938_v13  ;;  %v5190_v24 = vrot.slane %v4136_v44, 4  ;;  %v4406_v43 = vld [vmem:[%s5128_s1] sm:$0xff]  ;;  %v1172_v35 = vsel %vm944_vm2, %v4151_v4, 0.0 }
 0x10d   :  { %v1156_v20 = vrot.slane %v1155_v19, 1  ;;  %3411 = vpow2.f32 %v1940_v27  ;;  %v4395_v58 = vadd.f32 %v1127_v22, %v1126_v3  ;;  %v1162_v26 = vadd.f32 %v1161_v56, %v4147_v33 }
 0x10e   :  { %v1167_v25 = vadd.f32 %v5190_v24, %v4136_v44  ;;  %v4398_v53 = vpop.f32.mrf.mxu0  ;;  %v4400_v48 = vpop.f32.mrf.mxu1  ;;  %3413 = vpow2.f32 %v1942_v50  ;;  %v1103_v8 = vmul.f32 %v4406_v43, %v1102_v12  ;;  %v1179_v13 = vsel %vm944_vm2, %v4157_v32, 0.0 }
 0x10f   :  { %5191 = vst [vmem:[#allocation30_spill] sm:$0xff] %v4398_v53  ;;  %v1157_v44 = vadd.f32 %v1156_v20, %v1155_v19  ;;  %v1163_v52 = vrot.slane %v1162_v26, 1  ;;  %v5192_v33 = vrot.slane %v4165_v61, 4  ;;  %v1173_v34 = vrot.slane %v1172_v35, 4 }
 0x110   :  { %v1168_v47 = vrot.slane %v1167_v25, 2  ;;  %v3371_v31 = vpop.f32.mrf.mxu0  ;;  %v3390_v60 = vpop.f32.mrf.mxu1  ;;  %v1105_v51 = vrot.slane %v1103_v8, 1  ;;  %v1180_v50 = vrot.slane %v1179_v13, 4  ;;  %v1201_v19 = vsel %vm1079_vm3, %v1150_v57, %v4363_v39 }
 0x111   :  { %v1188_v27 = vadd.f32 %v5192_v33, %v4165_v61  ;;  %v1164_v3 = vadd.f32 %v1163_v52, %v1162_v26  ;;  %v4420_v2 = vmul.f32 %v4244_v29, %v4049_v37  ;;  %v1174_v22 = vadd.f32 %v1173_v34, %v1172_v35  ;;  %v5193_v61 = vld [vmem:[#allocation14_spill] sm:$0xff] }
 0x112   :  { %v1169_v9 = vadd.f32 %v1168_v47, %v1167_v25  ;;  %v1107_v4 = vadd.f32 %v1105_v51, %v4276_v28  ;;  %v1181_v20 = vadd.f32 %v1180_v50, %v1179_v13  ;;  %v4425_v56 = vmul.f32 %v5193_v61, %v4398_v53 }
 0x113   :  { %v1189_v6 = vrot.slane %v1188_v27, 2  ;;  %v1202_v24 = vsel %vm1081_vm4, %v1157_v44, %v1201_v19  ;;  %v5194_v39 = vrot.slane %v4253_v63, 2  ;;  %v1175_v8 = vrot.slane %v1174_v22, 2 }
 0x114   :  { %v1170_v32 = vrot.slane %v1169_v9, 1  ;;  %v3400_v26 = vpop.eup %3399  ;;  %v1182_v28 = vrot.slane %v1181_v20, 2  ;;  %v1203_v52 = vsel %vm1083_vm5, %v1164_v3, %v1202_v24  ;;  %v1249_v35 = vmul.f32 %v4030_v15, %v4101_v45  ;;  %v5195_v24 = vld [vmem:[#allocation19_spill] sm:$0xff] }
 0x115   :  { %v1190_v12 = vadd.f32 %v1189_v6, %v1188_v27  ;;  %v4431_v57 = vadd.f32 %v5194_v39, %v1107_v4  ;;  %v3402_v47 = vpop.eup %3401  ;;  %v1944_v31 = vsel %vm944_vm2, %v3400_v26, 0.0  ;;  %v1176_v33 = vadd.f32 %v1175_v8, %v1174_v22 }
 0x116   :  { %v1171_v29 = vadd.f32 %v1170_v32, %v1169_v9  ;;  %v3404_v44 = vpop.eup %3403  ;;  %v1945_v13 = vsel %vm944_vm2, %v3402_v47, 0.0  ;;  %v1183_v27 = vadd.f32 %v1182_v28, %v1181_v20  ;;  %v1250_v6 = vmul.f32 %v4030_v15, %v4132_v40  ;;  %v5197_v28 = vld [vmem:[#allocation20_spill] sm:$0xff] }
 0x117   :  { %v1191_v60 = vrot.slane %v1190_v12, 1  ;;  %v3406_v51 = vpop.eup %3405  ;;  %v1946_v9 = vadd.f32 %v1945_v13, %v1944_v31  ;;  %v1947_v34 = vsel %vm944_vm2, %v3404_v44, 0.0  ;;  %v1177_v4 = vrot.slane %v1176_v33, 1 }
 0x118   :  { %v1204_v63 = vsel %vm1085_vm6, %v1171_v29, %v1203_v52  ;;  %v3408_v19 = vpop.eup %3407  ;;  %v1949_v3 = vsel %vm944_vm2, %v3406_v51, 0.0  ;;  %v1184_v32 = vrot.slane %v1183_v27, 1  ;;  %v1255_v26 = vrot.slane %v5195_v24, 2  ;;  %v5196_v29 = vld [vmem:[#allocation18_spill] sm:$0xff] }
 0x119   :  { %v1192_v50 = vadd.f32 %v1191_v60, %v1190_v12  ;;  %v3410_v39 = vpop.eup %3409  ;;  %v1948_v22 = vadd.f32 %v1947_v34, %v1946_v9  ;;  %v1951_v20 = vsel %vm944_vm2, %v3408_v19, 0.0  ;;  %v1262_v8 = vrot.slane %v5196_v29, 2 }
 0x11a   :  { %v5198_v47 = vrot.slane %v5197_v28, 4  ;;  %v3412_v31 = vpop.eup %3411  ;;  %v1953_v60 = vsel %vm944_vm2, %v3410_v39, 0.0  ;;  %v1178_v52 = vadd.f32 %v1177_v4, %v1176_v33  ;;  %v1185_v44 = vadd.f32 %v1184_v32, %v1183_v27 }
 0x11b   :  { %v1256_v13 = vadd.f32 %v1255_v26, %v5195_v24  ;;  %v3414_v51 = vpop.eup %3413  ;;  %v1950_v1 = vadd.f32 %v1949_v3, %v1948_v22  ;;  %v1955_v25 = vsel %vm944_vm2, %v3412_v31, 0.0  ;;  %v1263_v9 = vadd.f32 %v1262_v8, %v5196_v29  ;;  %v5200_v26 = vld [vmem:[#allocation23_spill] sm:$0xff]  ;;  %v5201_v8 = vld [vmem:[#allocation13_spill] sm:$0xff] }
 0x11c   :  { %v1268_v12 = vadd.f32 %v5198_v47, %v5197_v28  ;;  %v1957_v19 = vsel %vm944_vm2, %v3414_v51, 0.0  ;;  %v1205_v49 = vsel %vm1087_vm7, %v1178_v52, %v1204_v63  ;;  %v5199_v28 = vld [vmem:[#allocation22_spill] sm:$0xff]  ;;  %v1280_v22 = vsel %vm944_vm2, %v5200_v26, 0.0 }
 0x11d   :  { %v1257_v0 = vrot.slane %v1256_v13, 1  ;;  %v1273_v47 = vsel %vm944_vm2, %v5199_v28, 0.0  ;;  %v1952_v39 = vadd.f32 %v1951_v20, %v1950_v1  ;;  %v1206_v33 = vsel %vm1089_vm8, %v1185_v44, %v1205_v49 }
 0x11e   :  { %v1269_v34 = vrot.slane %v1268_v12, 2  ;;  %v1264_v27 = vrot.slane %v1263_v9, 1  ;;  %v1207_v3 = vsel %vm1091_vm9, %v1192_v50, %v1206_v33  ;;  %v1274_v24 = vrot.slane %v1273_v47, 4  ;;  %v5202_v33 = vld [vmem:[#allocation24_spill] sm:$0xff] }
 0x11f   :  { %v1258_v32 = vadd.f32 %v1257_v0, %v1256_v13  ;;  %v1954_v29 = vadd.f32 %v1953_v60, %v1952_v39  ;;  %v1209_v31 = vmul.f32 %v5201_v8, %v1207_v3  ;;  %v1281_v53 = vrot.slane %v1280_v22, 4 }
 0x120   :  { %v1270_v4 = vadd.f32 %v1269_v34, %v1268_v12  ;;  %v1265_v63 = vadd.f32 %v1264_v27, %v1263_v9  ;;  %v1275_v51 = vadd.f32 %v1274_v24, %v1273_v47  ;;  %v1287_v1 = vsel %vm944_vm2, %v1249_v35, 0.0 }
 0x121   :  { %v1294_v49 = vsel %vm944_vm2, %v1250_v6, 0.0  ;;  %v1956_v20 = vadd.f32 %v1955_v25, %v1954_v29  ;;  %v1210_v12 = vsel %vm944_vm2, %v1209_v31, 0.0  ;;  %v1288_v0 = vrot.slane %v1287_v1, 4 }
 0x122   :  { %v1271_v52 = vrot.slane %v1270_v4, 1  ;;  %v1211_v44 = vrot.slane %v1210_v12, 4  ;;  %v1276_v13 = vrot.slane %v1275_v51, 2  ;;  %v1282_v34 = vadd.f32 %v1281_v53, %v1280_v22 }
 0x123   :  { %v1295_v28 = vrot.slane %v1294_v49, 4  ;;  %v1958_v60 = vadd.f32 %v1957_v19, %v1956_v20  ;;  %v1289_v39 = vadd.f32 %v1288_v0, %v1287_v1  ;;  %v1301_v9 = vsel %vm944_vm2, %v5202_v33, 0.0 }
 0x124   :  { %v1272_v50 = vadd.f32 %v1271_v52, %v1270_v4  ;;  %v1316_v47 = vsel %vm1079_vm3, %v1265_v63, %v1258_v32  ;;  %v1212_v27 = vadd.f32 %v1211_v44, %v1210_v12  ;;  %v1277_v35 = vadd.f32 %v1276_v13, %v1275_v51 }
 0x125   :  { %v1283_v3 = vrot.slane %v1282_v34, 2  ;;  %v1296_v6 = vadd.f32 %v1295_v28, %v1294_v49  ;;  %3415 = vlog2.f32 %v1958_v60  ;;  %v1290_v25 = vrot.slane %v1289_v39, 2 }
 0x126   :  { %v1302_v24 = vrot.slane %v1301_v9, 4  ;;  %v1317_v4 = vsel %vm1081_vm4, %v1272_v50, %v1316_v47  ;;  %v1213_v26 = vrot.slane %v1212_v27, 2  ;;  %v1278_v29 = vrot.slane %v1277_v35, 1  ;;  %v5206_v47 = vld [vmem:[#allocation8_spill] sm:$0xff] }
 0x127   :  { %v1284_v53 = vadd.f32 %v1283_v3, %v1282_v34  ;;  %v1297_v22 = vrot.slane %v1296_v6, 2  ;;  %v1291_v19 = vadd.f32 %v1290_v25, %v1289_v39  ;;  %v5203_v31 = vrot.slane %v4235_v30, 1 }
 0x128   :  { %v1303_v8 = vadd.f32 %v1302_v24, %v1301_v9  ;;  %v5204_v32 = vrot.slane %v4382_v5, 2  ;;  %v1214_v51 = vadd.f32 %v1213_v26, %v1212_v27  ;;  %v1279_v1 = vadd.f32 %v1278_v29, %v1277_v35  ;;  %v5207_v27 = vld [vmem:[#allocation5_spill] sm:$0xff] }
 0x129   :  { %v1345_v52 = vadd.f32 %v5203_v31, %v4235_v30  ;;  %v1285_v49 = vrot.slane %v1284_v53, 1  ;;  %v1298_v20 = vadd.f32 %v1297_v22, %v1296_v6  ;;  %v5205_v12 = vrot.slane %v4387_v41, 1 }
 0x12a   :  { %v4475_v63 = vadd.f32 %v5204_v32, %v4382_v5  ;;  %v1292_v0 = vrot.slane %v1291_v19, 1  ;;  %v1304_v44 = vrot.slane %v1303_v8, 2  ;;  %v1215_v30 = vrot.slane %v1214_v51, 1  ;;  %v5211_v32 = vld [vmem:[#allocation16_spill] sm:$0xff] }
 0x12b   :  { %v4480_v50 = vadd.f32 %v5205_v12, %v4387_v41  ;;  %v4483_v13 = vmul.f32 %v1345_v52, %v4049_v37  ;;  %v1286_v34 = vadd.f32 %v1285_v49, %v1284_v53  ;;  %v1299_v28 = vrot.slane %v1298_v20, 1 }
 0x12c   :  { %v1318_v5 = vsel %vm1083_vm5, %v1279_v1, %v1317_v4  ;;  %v1293_v60 = vadd.f32 %v1292_v0, %v1291_v19  ;;  %v1305_v39 = vadd.f32 %v1304_v44, %v1303_v8  ;;  %v5208_v41 = vrot.slane %v5206_v47, %v5207_v27  ;;  %v5212_v1 = vld [vmem:[#allocation17_spill] sm:$0xff] }
 0x12d   :  { %v1348_v33 = vrot.slane %v4483_v13, 4  ;;  %v1216_v3 = vadd.f32 %v1215_v30, %v1214_v51  ;;  %v1300_v6 = vadd.f32 %v1299_v28, %v1298_v20  ;;  %v1319_v25 = vsel %vm1085_vm6, %v1286_v34, %v1318_v5  ;;  %v5213_v20 = vld [vmem:[#allocation21_spill] sm:$0xff] }
 0x12e   :  { %vm4491_vm0 = vcmp.eq.s32.totalorder %v5208_v41, 1  ;;  %v1362_v24 = vmul.f32 %v4033_v16, %v4080_v55  ;;  %v1306_v4 = vrot.slane %v1305_v39, 1  ;;  %v1320_v26 = vsel %vm1087_vm7, %v1293_v60, %v1319_v25 }
 0x12f   :  { %v1363_v29 = vmul.f32 %v4033_v16, %v4097_v42  ;;  %v4503_v53 = vmul.f32 %v4033_v16, %v4101_v45  ;;  %v1217_v22 = vadd.f32 %v1216_v3, %v4395_v58  ;;  %v1321_v19 = vsel %vm1089_vm8, %v1300_v6, %v1320_v26 }
 0x130   :  { %v4509_v8 = vmul.f32 %v4033_v16, %v4132_v40  ;;  %v4513_v31 = vmul.f32 %v4033_v16, %v4138_v46  ;;  %v1307_v52 = vadd.f32 %v1306_v4, %v1305_v39  ;;  %v1367_v51 = vsel %vm944_vm2, %v5211_v32, 0.0 }
 0x131   :  { %v1375_v49 = vrot.slane %v5212_v1, 4  ;;  %v1381_v12 = vsel %vm944_vm2, %v5213_v20, 0.0  ;;  %v1218_v58 = vmul.f32 %v4406_v43, %v1217_v22  ;;  %v1368_v0 = vrot.slane %v1367_v51, 4 }
 0x132   :  { %v1382_v44 = vrot.slane %v1381_v12, 4  ;;  %v1388_v30 = vsel %vm944_vm2, %v1362_v24, 0.0  ;;  %v1322_v34 = vsel %vm1091_vm9, %v1307_v52, %v1321_v19  ;;  %v1395_v60 = vsel %vm944_vm2, %v1363_v29, 0.0  ;;  %v3416_v39 = vpop.eup %3415 }
 0x133   :  { %v1376_v28 = vadd.f32 %v1375_v49, %v5212_v1  ;;  %v1389_v5 = vrot.slane %v1388_v30, 4  ;;  %v1220_v27 = vrot.slane %v1218_v58, 2  ;;  %v1324_v41 = vmul.f32 %v4027_v14, %v1322_v34 }
 0x134   :  { %v1369_v3 = vadd.f32 %v1368_v0, %v1367_v51  ;;  %v1383_v6 = vadd.f32 %v1382_v44, %v1381_v12  ;;  %v1960_v25 = vmul.f32 0.6931472, %v3416_v39  ;;  %v1396_v22 = vrot.slane %v1395_v60, 4 }
 0x135   :  { %v1377_v4 = vrot.slane %v1376_v28, 2  ;;  %v1390_v26 = vadd.f32 %v1389_v5, %v1388_v30  ;;  %v1222_v32 = vadd.f32 %v1220_v27, %v4431_v57  ;;  %v1325_v24 = vsel %vm944_vm2, %v1324_v41, 0.0 }
 0x136   :  { %v1370_v19 = vrot.slane %v1369_v3, 2  ;;  %v1384_v52 = vrot.slane %v1383_v6, 2  ;;  %v1961_v1 = vadd.f32 %v1960_v25, %v4359_v21  ;;  %v1326_v49 = vrot.slane %v1325_v24, 4 }
 0x137   :  { %v1378_v29 = vadd.f32 %v1377_v4, %v1376_v28  ;;  %v1391_v20 = vrot.slane %v1390_v26, 2  ;;  %v5214_v58 = vrot.slane %v4420_v2, 3  ;;  %v1397_v0 = vadd.f32 %v1396_v22, %v1395_v60 }
 0x138   :  { %v1371_v51 = vadd.f32 %v1370_v19, %v1369_v3  ;;  %v1385_v12 = vadd.f32 %v1384_v52, %v1383_v6  ;;  %v4536_v57 = vsel %vm4491_vm0, %v1961_v1, %v4193_v10  ;;  %v1327_v44 = vadd.f32 %v1326_v49, %v1325_v24 }
 0x139   :  { %v4531_v14 = vadd.f32 %v5214_v58, %v1222_v32  ;;  %v1379_v30 = vrot.slane %v1378_v29, 1  ;;  %v1392_v34 = vadd.f32 %v1391_v20, %v1390_v26  ;;  %v1971_v21 = vcombine.high %v4536_v57, %v4536_v57 }
 0x13a   :  { %v1978_v28 = vrot.slane %v4536_v57, %v4052_v38  ;;  %v1372_v2 = vrot.slane %v1371_v51, 1  ;;  %v1386_v5 = vrot.slane %v1385_v12, 1  ;;  %v1328_v39 = vrot.slane %v1327_v44, 2 }
 0x13b   :  { %v4542_v27 = vadd.f32 %v1379_v30, %v1378_v29  ;;  %v1393_v60 = vrot.slane %v1392_v34, 1  ;;  %v1398_v41 = vrot.slane %v1397_v0, 2  ;;  %v1985_v35 = vrot.slane %v1971_v21, %v4052_v38 }
 0x13c   :  { %v1986_v10 = vcombine.high %v1978_v28, %v1978_v28  ;;  %v1994_v3 = vrot.slane %v1978_v28, %v4052_v38  ;;  %v4546_v6 = vadd.f32 %v1372_v2, %v1371_v51  ;;  %v1329_v25 = vadd.f32 %v1328_v39, %v1327_v44 }
 0x13d   :  { %v4548_v4 = vadd.f32 %v1386_v5, %v1385_v12  ;;  %v4550_v26 = vadd.f32 %v1393_v60, %v1392_v34  ;;  %v1399_v22 = vadd.f32 %v1398_v41, %v1397_v0  ;;  %v1987_v32 = vcombine.high %v1985_v35, %v1985_v35 }
 0x13e   :  { %v2001_v24 = vrot.slane %v1985_v35, %v4052_v38  ;;  %v2008_v19 = vrot.slane %v1986_v10, %v4052_v38  ;;  %v2016_v52 = vcombine.high %v1994_v3, %v1994_v3  ;;  %v2023_v1 = vrot.slane %v1994_v3, %v3622_v7 }
 0x13f   :  { %v1330_v49 = vrot.slane %v1329_v25, 1  ;;  %v1400_v29 = vrot.slane %v1399_v22, 1  ;;  %v1402_v20 = vsel %vm944_vm2, %v4503_v53, 0.0  ;;  %v2015_v58 = vrot.slane %v1987_v32, %v4052_v38 }
 0x140   :  { %v2017_v51 = vcombine.high %v2001_v24, %v2001_v24  ;;  %v2018_v12 = vcombine.high %v2008_v19, %v2008_v19  ;;  %v2027_v44 = vrot.slane %v2008_v19, %v3622_v7  ;;  %v2031_v0 = vrot.slane %v2016_v52, %v3622_v7 }
 0x141   :  { %v2039_v30 = vrot.slane %v2001_v24, %v3622_v7  ;;  %v2060_v34 = vadd.f32 %v2023_v1, %v4046_v36  ;;  %v1331_v21 = vadd.f32 %v1330_v49, %v1329_v25  ;;  %v2019_v28 = vcombine.high %v2015_v58, %v2015_v58 }
 0x142   :  { %v2035_v2 = vrot.slane %v2018_v12, %v3622_v7  ;;  %v2043_v5 = vrot.slane %v2015_v58, %v3622_v7  ;;  %v2047_v53 = vrot.slane %v2017_v51, %v3622_v7  ;;  %v2061_v39 = vadd.f32 %v2027_v44, %v4044_v23 }
 0x143   :  { %v2062_v60 = vadd.f32 %v2031_v0, %v4078_v54  ;;  %v2064_v41 = vadd.f32 %v2039_v30, %v4097_v42  ;;  %v2068_v35 = vadd.f32 %v2060_v34, %v4248_v59  ;;  %v2051_v10 = vrot.slane %v2019_v28, %v3622_v7 }
 0x144   :  { %v2063_v3 = vadd.f32 %v2035_v2, %v4080_v55  ;;  %v2065_v25 = vadd.f32 %v2043_v5, %v4101_v45  ;;  %v2066_v32 = vadd.f32 %v2047_v53, %v4132_v40  ;;  %v2069_v24 = vadd.f32 %v2061_v39, %v4248_v59 }
 0x145   :  { %v2070_v19 = vadd.f32 %v2062_v60, %v4248_v59  ;;  %v2072_v52 = vadd.f32 %v2064_v41, %v4248_v59  ;;  %v2076_v1 = vsel %vm944_vm2, %v2068_v35, -inf  ;;  %v2067_v49 = vadd.f32 %v2051_v10, %v4138_v46 }
 0x146   :  { %v2071_v58 = vadd.f32 %v2063_v3, %v4248_v59  ;;  %v2073_v51 = vadd.f32 %v2065_v25, %v4248_v59  ;;  %v2074_v12 = vadd.f32 %v2066_v32, %v4248_v59  ;;  %v2077_v44 = vsel %vm944_vm2, %v2069_v24, -inf }
 0x147   :  { %v2078_v0 = vsel %vm944_vm2, %v2070_v19, -inf  ;;  %v2080_v30 = vsel %vm944_vm2, %v2072_v52, -inf  ;;  %v1332_v34 = vadd.f32 %v1331_v21, %v4480_v50  ;;  %v2075_v28 = vadd.f32 %v2067_v49, %v4248_v59 }
 0x148   :  { %v2079_v2 = vsel %vm944_vm2, %v2071_v58, -inf  ;;  %v2081_v5 = vmax.f32 %v2076_v1, %v2080_v30  ;;  %v2082_v53 = vsel %vm944_vm2, %v2073_v51, -inf  ;;  %v2084_v60 = vsel %vm944_vm2, %v2074_v12, -inf }
 0x149   :  { %v2083_v39 = vmax.f32 %v2077_v44, %v2082_v53  ;;  %v1333_v41 = vmul.f32 %v4406_v43, %v1332_v34  ;;  %v1401_v10 = vadd.f32 %v1400_v29, %v1399_v22  ;;  %v2085_v3 = vmax.f32 %v2078_v0, %v2084_v60  ;;  %v5215_v22 = vld [vmem:[#allocation28_spill] sm:$0xff] }
 0x14a   :  { %v2086_v25 = vsel %vm944_vm2, %v2075_v28, -inf  ;;  %v1403_v32 = vrot.slane %v1402_v20, 4  ;;  %v1409_v50 = vsel %vm944_vm2, %v4509_v8, 0.0  ;;  %v1416_v44 = vsel %vm944_vm2, %v4513_v31, 0.0 }
 0x14b   :  { %v2087_v21 = vmax.f32 %v2079_v2, %v2086_v25  ;;  %v2088_v59 = vmax.f32 %v2081_v5, %v2083_v39  ;;  %v1335_v49 = vrot.slane %v1333_v41, 3  ;;  %v1410_v9 = vrot.slane %v1409_v50, 4 }
 0x14c   :  { %v1404_v1 = vadd.f32 %v1403_v32, %v1402_v20  ;;  %v1431_v30 = vsel %vm1079_vm3, %v4542_v27, %v4546_v6  ;;  %v5216_v29 = vrot.slane %v5215_v22, 2  ;;  %v1417_v2 = vrot.slane %v1416_v44, 4 }
 0x14d   :  { %v2089_v34 = vmax.f32 %v2085_v3, %v2087_v21  ;;  %v1337_v53 = vadd.f32 %v1335_v49, %v4531_v14  ;;  %v1411_v8 = vadd.f32 %v1410_v9, %v1409_v50  ;;  %v1432_v20 = vsel %vm1081_vm4, %v4548_v4, %v1431_v30 }
 0x14e   :  { %v1458_v0 = vadd.f32 %v5216_v29, %v5215_v22  ;;  %v1405_v5 = vrot.slane %v1404_v1, 2  ;;  %v5217_v31 = vrot.slane %v4357_v18, 4  ;;  %v1418_v3 = vadd.f32 %v1417_v2, %v1416_v44 }
 0x14f   :  { %v4607_v41 = vmax.f32 %v2088_v59, %v2089_v34  ;;  %v4611_v27 = vadd.f32 %v1348_v33, %v1337_v53  ;;  %v1412_v6 = vrot.slane %v1411_v8, 2  ;;  %v1433_v9 = vsel %vm1083_vm5, %v4550_v26, %v1432_v20 }
 0x150   :  { %v1459_v39 = vrot.slane %v1458_v0, 1  ;;  %v1469_v60 = vadd.f32 %v5217_v31, %v4357_v18  ;;  %v1406_v14 = vadd.f32 %v1405_v5, %v1404_v1  ;;  %v1474_v5 = vmul.f32 %v4036_v17, %v4046_v36 }
 0x151   :  { %v2091_v4 = vsub.f32 %v2068_v35, %v4607_v41  ;;  %v2092_v50 = vsub.f32 %v2069_v24, %v4607_v41  ;;  %v2093_v18 = vsub.f32 %v2070_v19, %v4607_v41  ;;  %v2094_v21 = vsub.f32 %v2071_v58, %v4607_v41 }
 0x152   :  { %v1460_v25 = vadd.f32 %v1459_v39, %v1458_v0  ;;  %v1470_v32 = vrot.slane %v1469_v60, 2  ;;  %v2095_v13 = vsub.f32 %v2072_v52, %v4607_v41  ;;  %v2096_v33 = vsub.f32 %v2073_v51, %v4607_v41 }
 0x153   :  { %v2097_v59 = vsub.f32 %v2074_v12, %v4607_v41  ;;  %v2098_v49 = vsub.f32 %v2075_v28, %v4607_v41  ;;  %v2099_v1 = vmul.f32 1.442695, %v2091_v4  ;;  %v2101_v26 = vmul.f32 1.442695, %v2092_v50 }
 0x154   :  { %v2103_v44 = vmul.f32 1.442695, %v2093_v18  ;;  %v1413_v30 = vadd.f32 %v1412_v6, %v1411_v8  ;;  %v2105_v22 = vmul.f32 1.442695, %v2094_v21  ;;  %v2107_v35 = vmul.f32 1.442695, %v2095_v13 }
 0x155   :  { %v2109_v29 = vmul.f32 1.442695, %v2096_v33  ;;  %v5218_v24 = vrot.slane %v4475_v63, 1  ;;  %3417 = vpow2.f32 %v2099_v1  ;;  %v2111_v52 = vmul.f32 1.442695, %v2097_v59 }
 0x156   :  { %v1407_v58 = vrot.slane %v1406_v14, 1  ;;  %v1434_v51 = vsel %vm1085_vm6, %v1401_v10, %v1433_v9  ;;  %3419 = vpow2.f32 %v2101_v26  ;;  %v1414_v12 = vrot.slane %v1413_v30, 1 }
 0x157   :  { %v4626_v19 = vadd.f32 %v5218_v24, %v4475_v63  ;;  %v1419_v28 = vrot.slane %v1418_v3, 2  ;;  %v4630_v0 = vmul.f32 %v1460_v25, %v4049_v37  ;;  %3421 = vpow2.f32 %v2103_v44 }
 0x158   :  { %v2113_v34 = vmul.f32 1.442695, %v2098_v49  ;;  %v1408_v53 = vadd.f32 %v1407_v58, %v1406_v14  ;;  %v4632_v8 = vadd.f32 %v1470_v32, %v1469_v60  ;;  %3423 = vpow2.f32 %v2105_v22 }
 0x159   :  { %v1415_v2 = vadd.f32 %v1414_v12, %v1413_v30  ;;  %v1420_v63 = vadd.f32 %v1419_v28, %v1418_v3  ;;  %3425 = vpow2.f32 %v2107_v35  ;;  %v1463_v20 = vrot.slane %v4630_v0, 5 }
 0x15a   :  { %v1435_v10 = vsel %vm1087_vm7, %v1408_v53, %v1434_v51  ;;  %v1475_v39 = vmul.f32 %v4036_v17, %v4044_v23  ;;  %3427 = vpow2.f32 %v2109_v29  ;;  %v1472_v6 = vrot.slane %v4632_v8, 1 }
 0x15b   :  { %v1421_v31 = vrot.slane %v1420_v63, 1  ;;  %v1476_v60 = vmul.f32 %v4036_v17, %v4078_v54  ;;  %3429 = vpow2.f32 %v2111_v52  ;;  %v1436_v3 = vsel %vm1089_vm8, %v1415_v2, %v1435_v10 }
 0x15c   :  { %v1477_v14 = vmul.f32 %v4036_v17, %v4080_v55  ;;  %v1478_v9 = vmul.f32 %v4036_v17, %v4097_v42  ;;  %3431 = vpow2.f32 %v2113_v34  ;;  %v1479_v32 = vmul.f32 %v4036_v17, %v4101_v45 }
 0x15d   :  { %v1422_v25 = vadd.f32 %v1421_v31, %v1420_v63  ;;  %v1480_v4 = vmul.f32 %v4036_v17, %v4132_v40  ;;  %v4654_v50 = vmul.f32 %v4036_v17, %v4138_v46  ;;  %v1482_v18 = vsel %vm944_vm2, %v1474_v5, 0.0 }
 0x15e   :  { %v1489_v21 = vsel %vm944_vm2, %v1475_v39, 0.0  ;;  %v1496_v13 = vsel %vm944_vm2, %v1476_v60, 0.0  ;;  %v1483_v59 = vrot.slane %v1482_v18, 4  ;;  %v1503_v44 = vsel %vm944_vm2, %v1477_v14, 0.0 }
 0x15f   :  { %v1437_v33 = vsel %vm1091_vm9, %v1422_v25, %v1436_v3  ;;  %v1490_v49 = vrot.slane %v1489_v21, 4  ;;  %v1497_v1 = vrot.slane %v1496_v13, 4  ;;  %v1510_v30 = vsel %vm944_vm2, %v1478_v9, 0.0 }
 0x160   :  { %v1439_v26 = vmul.f32 %v4030_v15, %v1437_v33  ;;  %v1517_v22 = vsel %vm944_vm2, %v1479_v32, 0.0  ;;  %v1484_v35 = vadd.f32 %v1483_v59, %v1482_v18  ;;  %v1504_v52 = vrot.slane %v1503_v44, 4 }
 0x161   :  { %v1491_v29 = vadd.f32 %v1490_v49, %v1489_v21  ;;  %v1498_v24 = vadd.f32 %v1497_v1, %v1496_v13  ;;  %v1511_v51 = vrot.slane %v1510_v30, 4  ;;  %v1518_v12 = vrot.slane %v1517_v22, 4 }
 0x162   :  { %v1440_v58 = vsel %vm944_vm2, %v1439_v26, 0.0  ;;  %v1524_v28 = vsel %vm944_vm2, %v1480_v4, 0.0  ;;  %v3418_v34 = vpop.eup %3417  ;;  %v1485_v2 = vrot.slane %v1484_v35, 2  ;;  %v1505_v39 = vadd.f32 %v1504_v52, %v1503_v44 }
 0x163   :  { %v1441_v53 = vrot.slane %v1440_v58, 4  ;;  %v1492_v15 = vrot.slane %v1491_v29, 2  ;;  %v1499_v63 = vrot.slane %v1498_v24, 2  ;;  %v3420_v5 = vpop.eup %3419  ;;  %v2115_v10 = vsel %vm944_vm2, %v3418_v34, 0.0 }
 0x164   :  { %v1512_v31 = vadd.f32 %v1511_v51, %v1510_v30  ;;  %v1519_v60 = vadd.f32 %v1518_v12, %v1517_v22  ;;  %v3422_v3 = vpop.eup %3421  ;;  %v2116_v14 = vsel %vm944_vm2, %v3420_v5, 0.0  ;;  %v1486_v25 = vadd.f32 %v1485_v2, %v1484_v35 }
 0x165   :  { %v1442_v9 = vadd.f32 %v1441_v53, %v1440_v58  ;;  %v1493_v32 = vadd.f32 %v1492_v15, %v1491_v29  ;;  %v3424_v18 = vpop.eup %3423  ;;  %v2117_v21 = vadd.f32 %v2116_v14, %v2115_v10  ;;  %v2118_v4 = vsel %vm944_vm2, %v3422_v3, 0.0 }
 0x166   :  { %v1500_v13 = vadd.f32 %v1499_v63, %v1498_v24  ;;  %v1506_v33 = vrot.slane %v1505_v39, 2  ;;  %v3426_v59 = vpop.eup %3425  ;;  %v2120_v49 = vsel %vm944_vm2, %v3424_v18, 0.0  ;;  %v1487_v26 = vrot.slane %v1486_v25, 1 }
 0x167   :  { %v1443_v1 = vrot.slane %v1442_v9, 2  ;;  %v1494_v44 = vrot.slane %v1493_v32, 1  ;;  %v3428_v30 = vpop.eup %3427  ;;  %v2119_v22 = vadd.f32 %v2118_v4, %v2117_v21  ;;  %v2122_v52 = vsel %vm944_vm2, %v3426_v59, 0.0 }
 0x168   :  { %v1501_v51 = vrot.slane %v1500_v13, 1  ;;  %v1507_v58 = vadd.f32 %v1506_v33, %v1505_v39  ;;  %v3430_v35 = vpop.eup %3429  ;;  %v2124_v29 = vsel %vm944_vm2, %v3428_v30, 0.0  ;;  %v1488_v34 = vadd.f32 %v1487_v26, %v1486_v25  ;;  %v5219_v26 = vld [vmem:[#allocation27_spill] sm:$0xff] }
 0x169   :  { %v1444_v12 = vadd.f32 %v1443_v1, %v1442_v9  ;;  %v1495_v53 = vadd.f32 %v1494_v44, %v1493_v32  ;;  %v3432_v24 = vpop.eup %3431  ;;  %v2121_v2 = vadd.f32 %v2120_v49, %v2119_v22  ;;  %v2126_v15 = vsel %vm944_vm2, %v3430_v35, 0.0 }
 0x16a   :  { %v1502_v63 = vadd.f32 %v1501_v51, %v1500_v13  ;;  %v1508_v5 = vrot.slane %v1507_v58, 1  ;;  %v2128_v10 = vsel %vm944_vm2, %v3432_v24, 0.0  ;;  %v1513_v14 = vrot.slane %v1512_v31, 2 }
 0x16b   :  { %v1445_v3 = vrot.slane %v1444_v12, 1  ;;  %v1520_v18 = vrot.slane %v1519_v60, 2  ;;  %v2123_v21 = vadd.f32 %v2122_v52, %v2121_v2  ;;  %v1525_v39 = vrot.slane %v1524_v28, 4 }
 0x16c   :  { %v1509_v4 = vadd.f32 %v1508_v5, %v1507_v58  ;;  %v1531_v33 = vsel %vm944_vm2, %v4654_v50, 0.0  ;;  %v1514_v25 = vadd.f32 %v1513_v14, %v1512_v31  ;;  %v1546_v13 = vsel %vm1079_vm3, %v1495_v53, %v1488_v34 }
 0x16d   :  { %v1446_v9 = vadd.f32 %v1445_v3, %v1444_v12  ;;  %v1521_v32 = vadd.f32 %v1520_v18, %v1519_v60  ;;  %v1532_v59 = vrot.slane %v1531_v33, 4  ;;  %v2125_v49 = vadd.f32 %v2124_v29, %v2123_v21 }
 0x16e   :  { %v1526_v1 = vadd.f32 %v1525_v39, %v1524_v28  ;;  %v5220_v44 = vrot.slane %v5219_v26, 4  ;;  %v1515_v52 = vrot.slane %v1514_v25, 1  ;;  %v1547_v50 = vsel %vm1081_vm4, %v1502_v63, %v1546_v13 }
 0x16f   :  { %v1447_v22 = vadd.f32 %v1446_v9, %v4626_v19  ;;  %v1522_v51 = vrot.slane %v1521_v32, 1  ;;  %v1533_v58 = vadd.f32 %v1532_v59, %v1531_v33  ;;  %v2127_v35 = vadd.f32 %v2126_v15, %v2125_v49 }
 0x170   :  { %v1571_v30 = vadd.f32 %v5220_v44, %v5219_v26  ;;  %v1527_v24 = vrot.slane %v1526_v1, 2  ;;  %v1516_v29 = vadd.f32 %v1515_v52, %v1514_v25  ;;  %v1548_v2 = vsel %vm1083_vm5, %v1509_v4, %v1547_v50 }
 0x171   :  { %v1448_v60 = vmul.f32 %v4406_v43, %v1447_v22  ;;  %v1523_v28 = vadd.f32 %v1522_v51, %v1521_v32  ;;  %v1534_v12 = vrot.slane %v1533_v58, 2  ;;  %v2129_v34 = vadd.f32 %v2128_v10, %v2127_v35  ;;  %v5221_v51 = vld [vmem:[#allocation6_spill] sm:$0xff] }
 0x172   :  { %v1572_v31 = vrot.slane %v1571_v30, 2  ;;  %v1528_v53 = vadd.f32 %v1527_v24, %v1526_v1  ;;  %v1549_v14 = vsel %vm1085_vm6, %v1516_v29, %v1548_v2  ;;  %v1582_v15 = vsel %vm944_vm2, %v4425_v56, 0.0 }
 0x173   :  { %v1450_v3 = vrot.slane %v1448_v60, 4  ;;  %v1535_v19 = vadd.f32 %v1534_v12, %v1533_v58  ;;  %3433 = vlog2.f32 %v2129_v34  ;;  %v4690_v43 = vadd.f32 %v1472_v6, %v4632_v8 }
 0x174   :  { %v1573_v5 = vadd.f32 %v1572_v31, %v1571_v30  ;;  %v1529_v63 = vrot.slane %v1528_v53, 1  ;;  %v1550_v4 = vsel %vm1087_vm7, %v1523_v28, %v1549_v14  ;;  %v1583_v39 = vrot.slane %v1582_v15, 4 }
 0x175   :  { %v1452_v10 = vadd.f32 %v1450_v3, %v4611_v27  ;;  %v1536_v21 = vrot.slane %v1535_v19, 1  ;;  %v1589_v25 = vmul.f32 %v5193_v61, %v4046_v36  ;;  %v1590_v56 = vmul.f32 %v5193_v61, %v4044_v23 }
 0x176   :  { %v1574_v18 = vrot.slane %v1573_v5, 1  ;;  %v1530_v33 = vadd.f32 %v1529_v63, %v1528_v53  ;;  %v1584_v32 = vadd.f32 %v1583_v39, %v1582_v15  ;;  %v1591_v27 = vmul.f32 %v5193_v61, %v4078_v54 }
 0x177   :  { %v4700_v8 = vadd.f32 %v1463_v20, %v1452_v10  ;;  %v1537_v6 = vadd.f32 %v1536_v21, %v1535_v19  ;;  %v1592_v1 = vmul.f32 %v5193_v61, %v4080_v55  ;;  %v1593_v13 = vmul.f32 %v5193_v61, %v4097_v42 }
 0x178   :  { %v1575_v9 = vadd.f32 %v1574_v18, %v1573_v5  ;;  %v1551_v59 = vsel %vm1089_vm8, %v1530_v33, %v1550_v4  ;;  %v1585_v20 = vrot.slane %v1584_v32, 2  ;;  %v1594_v26 = vmul.f32 %v5193_v61, %v4101_v45 }
 0x179   :  { %v1552_v0 = vsel %vm1091_vm9, %v1537_v6, %v1551_v59  ;;  %v1595_v44 = vmul.f32 %v5193_v61, %v4132_v40  ;;  %v1597_v22 = vsel %vm944_vm2, %v1589_v25, 0.0  ;;  %v1604_v52 = vsel %vm944_vm2, %v1590_v56, 0.0 }
 0x17a   :  { %v4706_v49 = vmul.f32 %v1575_v9, %v4049_v37  ;;  %v1554_v30 = vmul.f32 %v4033_v16, %v1552_v0  ;;  %v1596_v37 = vmul.f32 %v5193_v61, %v4138_v46  ;;  %v5222_v58 = vrot.slane %v5206_v47, %v5221_v51 }
 0x17b   :  { %v4729_v24 = vadd.f32 %v1585_v20, %v1584_v32  ;;  %v1598_v50 = vrot.slane %v1597_v22, 4  ;;  %v1605_v31 = vrot.slane %v1604_v52, 4  ;;  %v1611_v16 = vsel %vm944_vm2, %v1591_v27, 0.0 }
 0x17c   :  { %vm4725_vm10 = vcmp.eq.s32.totalorder %v5222_v58, 1  ;;  %v1555_v60 = vsel %vm944_vm2, %v1554_v30, 0.0  ;;  %v1612_v29 = vrot.slane %v1611_v16, 4  ;;  %v1618_v28 = vsel %vm944_vm2, %v1592_v1, 0.0 }
 0x17d   :  { %v1625_v12 = vsel %vm944_vm2, %v1593_v13, 0.0  ;;  %v1556_v34 = vrot.slane %v1555_v60, 4  ;;  %v1578_v53 = vrot.slane %v4706_v49, 6  ;;  %v1599_v2 = vadd.f32 %v1598_v50, %v1597_v22 }
 0x17e   :  { %v1606_v5 = vadd.f32 %v1605_v31, %v1604_v52  ;;  %v1613_v3 = vadd.f32 %v1612_v29, %v1611_v16  ;;  %v1619_v19 = vrot.slane %v1618_v28, 4  ;;  %v1626_v14 = vrot.slane %v1625_v12, 4 }
 0x17f   :  { %v1632_v15 = vsel %vm944_vm2, %v1594_v26, 0.0  ;;  %v1557_v63 = vadd.f32 %v1556_v34, %v1555_v60  ;;  %v1587_v18 = vrot.slane %v4729_v24, 1  ;;  %v1600_v10 = vrot.slane %v1599_v2, 2 }
 0x180   :  { %v1607_v21 = vrot.slane %v1606_v5, 2  ;;  %v1614_v4 = vrot.slane %v1613_v3, 2  ;;  %v1620_v39 = vadd.f32 %v1619_v19, %v1618_v28  ;;  %v1627_v33 = vadd.f32 %v1626_v14, %v1625_v12  ;;  %v3434_v25 = vpop.eup %3433 }
 0x181   :  { %v1633_v9 = vrot.slane %v1632_v15, 4  ;;  %v1558_v56 = vrot.slane %v1557_v63, 2  ;;  %v1601_v6 = vadd.f32 %v1600_v10, %v1599_v2  ;;  %v1639_v27 = vsel %vm944_vm2, %v1595_v44, 0.0 }
 0x182   :  { %v1608_v32 = vadd.f32 %v1607_v21, %v1606_v5  ;;  %v2131_v59 = vmul.f32 0.6931472, %v3434_v25  ;;  %v1615_v1 = vadd.f32 %v1614_v4, %v1613_v3  ;;  %v1621_v13 = vrot.slane %v1620_v39, 2 }
 0x183   :  { %v1628_v0 = vrot.slane %v1627_v33, 2  ;;  %v1559_v20 = vadd.f32 %v1558_v56, %v1557_v63  ;;  %v1602_v26 = vrot.slane %v1601_v6, 1  ;;  %v1634_v22 = vadd.f32 %v1633_v9, %v1632_v15 }
 0x184   :  { %v1609_v30 = vrot.slane %v1608_v32, 1  ;;  %v2132_v52 = vadd.f32 %v2131_v59, %v4607_v41  ;;  %v1616_v51 = vrot.slane %v1615_v1, 1  ;;  %v1622_v58 = vadd.f32 %v1621_v13, %v1620_v39  ;;  %v4766_v59 = vld [vmem:[%s5128_s1] sm:$0xff] }
 0x185   :  { %v1629_v50 = vadd.f32 %v1628_v0, %v1627_v33  ;;  %v1560_v31 = vrot.slane %v1559_v20, 1  ;;  %v1603_v16 = vadd.f32 %v1602_v26, %v1601_v6  ;;  %v1635_v29 = vrot.slane %v1634_v22, 2 }
 0x186   :  { %v1610_v60 = vadd.f32 %v1609_v30, %v1608_v32  ;;  %v4743_v44 = vsel %vm4725_vm10, %v2132_v52, %v4536_v57  ;;  %v4745_v28 = vadd.f32 %v1616_v51, %v1615_v1  ;;  %v1623_v12 = vrot.slane %v1622_v58, 1 }
 0x187   :  { %v1630_v34 = vrot.slane %v1629_v50, 1  ;;  %v2140_v2 = vcombine.high %v4743_v44, %v4743_v44  ;;  %v2147_v41 = vrot.slane %v4743_v44, %v4052_v38  ;;  %v1561_v5 = vadd.f32 %v1560_v31, %v1559_v20 }
 0x188   :  { %v1636_v3 = vadd.f32 %v1635_v29, %v1634_v22  ;;  %v4751_v19 = vadd.f32 %v1623_v12, %v1622_v58  ;;  %v1640_v15 = vrot.slane %v1639_v27, 4  ;;  %v1646_v57 = vsel %vm944_vm2, %v1596_v37, 0.0 }
 0x189   :  { %v4753_v14 = vadd.f32 %v1630_v34, %v1629_v50  ;;  %v2154_v35 = vrot.slane %v2140_v2, %v4052_v38  ;;  %v2155_v63 = vcombine.high %v2147_v41, %v2147_v41  ;;  %v2163_v10 = vrot.slane %v2147_v41, %v4052_v38 }
 0x18a   :  { %v1562_v21 = vadd.f32 %v1561_v5, %v4690_v43  ;;  %v1637_v4 = vrot.slane %v1636_v3, 1  ;;  %v1641_v39 = vadd.f32 %v1640_v15, %v1639_v27  ;;  %v1647_v33 = vrot.slane %v1646_v57, 4 }
 0x18b   :  { %v1661_v9 = vsel %vm1079_vm3, %v1610_v60, %v1603_v16  ;;  %v2156_v25 = vcombine.high %v2154_v35, %v2154_v35  ;;  %v2170_v56 = vrot.slane %v2154_v35, %v4052_v38  ;;  %v2177_v6 = vrot.slane %v2155_v63, %v4052_v38 }
 0x18c   :  { %v2185_v32 = vcombine.high %v2163_v10, %v2163_v10  ;;  %v2192_v37 = vrot.slane %v2163_v10, %v3622_v7  ;;  %v1563_v43 = vmul.f32 %v4766_v59, %v1562_v21  ;;  %v1638_v1 = vadd.f32 %v1637_v4, %v1636_v3 }
 0x18d   :  { %v1642_v27 = vrot.slane %v1641_v39, 2  ;;  %v2184_v13 = vrot.slane %v2156_v25, %v4052_v38  ;;  %v2186_v0 = vcombine.high %v2170_v56, %v2170_v56  ;;  %v2187_v20 = vcombine.high %v2177_v6, %v2177_v6 }
 0x18e   :  { %v2196_v26 = vrot.slane %v2177_v6, %v3622_v7  ;;  %v2200_v30 = vrot.slane %v2185_v32, %v3622_v7  ;;  %v2208_v22 = vrot.slane %v2170_v56, %v3622_v7  ;;  %v2229_v52 = vadd.f32 %v2192_v37, %v4046_v36 }
 0x18f   :  { %v1565_v51 = vrot.slane %v1563_v43, 5  ;;  %v2188_v58 = vcombine.high %v2184_v13, %v2184_v13  ;;  %v2204_v50 = vrot.slane %v2187_v20, %v3622_v7  ;;  %v2212_v31 = vrot.slane %v2184_v13, %v3622_v7 }
 0x190   :  { %v2216_v16 = vrot.slane %v2186_v0, %v3622_v7  ;;  %v2230_v60 = vadd.f32 %v2196_v26, %v4044_v23  ;;  %v2231_v29 = vadd.f32 %v2200_v30, %v4078_v54  ;;  %v2233_v12 = vadd.f32 %v2208_v22, %v4097_v42 }
 0x191   :  { %v2237_v34 = vadd.f32 %v2229_v52, %v4250_v62  ;;  %v2220_v2 = vrot.slane %v2188_v58, %v3622_v7  ;;  %v2232_v41 = vadd.f32 %v2204_v50, %v4080_v55  ;;  %v2234_v5 = vadd.f32 %v2212_v31, %v4101_v45 }
 0x192   :  { %v2235_v3 = vadd.f32 %v2216_v16, %v4132_v40  ;;  %v2238_v15 = vadd.f32 %v2230_v60, %v4250_v62  ;;  %v2239_v35 = vadd.f32 %v2231_v29, %v4250_v62  ;;  %v2241_v63 = vadd.f32 %v2233_v12, %v4250_v62 }
 0x193   :  { %v2245_v10 = vsel %vm944_vm2, %v2237_v34, -inf  ;;  %v2236_v21 = vadd.f32 %v2220_v2, %v4138_v46  ;;  %v2240_v4 = vadd.f32 %v2232_v41, %v4250_v62  ;;  %v2242_v25 = vadd.f32 %v2234_v5, %v4250_v62 }
 0x194   :  { %v2243_v56 = vadd.f32 %v2235_v3, %v4250_v62  ;;  %v2246_v6 = vsel %vm944_vm2, %v2238_v15, -inf  ;;  %v2247_v32 = vsel %vm944_vm2, %v2239_v35, -inf  ;;  %v2249_v37 = vsel %vm944_vm2, %v2241_v63, -inf }
 0x195   :  { %v1567_v43 = vadd.f32 %v1565_v51, %v4700_v8  ;;  %v2244_v13 = vadd.f32 %v2236_v21, %v4250_v62  ;;  %v2248_v0 = vsel %vm944_vm2, %v2240_v4, -inf  ;;  %v2250_v20 = vmax.f32 %v2245_v10, %v2249_v37 }
 0x196   :  { %v2251_v26 = vsel %vm944_vm2, %v2242_v25, -inf  ;;  %v2253_v22 = vsel %vm944_vm2, %v2243_v56, -inf  ;;  %v1643_v58 = vadd.f32 %v1642_v27, %v1641_v39  ;;  %v1648_v16 = vadd.f32 %v1647_v33, %v1646_v57  ;;  %v5226_v27 = vld [vmem:[#allocation15_spill] sm:$0xff] }
 0x197   :  { %v2252_v30 = vmax.f32 %v2246_v6, %v2251_v26  ;;  %v4803_v52 = vadd.f32 %v1578_v53, %v1567_v43  ;;  %v2254_v50 = vmax.f32 %v2247_v32, %v2253_v22  ;;  %v2255_v31 = vsel %vm944_vm2, %v2244_v13, -inf  ;;  %v5225_v53 = vld [vmem:[#allocation26_spill] sm:$0xff] }
 0x198   :  { %v1662_v62 = vsel %vm1081_vm4, %v4745_v28, %v1661_v9  ;;  %v2256_v8 = vmax.f32 %v2248_v0, %v2255_v31  ;;  %v1644_v60 = vrot.slane %v1643_v58, 1  ;;  %v1649_v12 = vrot.slane %v1648_v16, 2 }
 0x199   :  { %v2257_v51 = vmax.f32 %v2250_v20, %v2252_v30  ;;  %v1663_v29 = vsel %vm1083_vm5, %v4751_v19, %v1662_v62  ;;  %v1684_v39 = vsel %vm944_vm2, %v5225_v53, 0.0  ;;  %v1696_v2 = vmul.f32 %v5226_v27, %v4400_v48 }
 0x19a   :  { %v1664_v49 = vsel %vm1085_vm6, %v4753_v14, %v1663_v29  ;;  %v2258_v57 = vmax.f32 %v2254_v50, %v2256_v8  ;;  %v1645_v33 = vadd.f32 %v1644_v60, %v1643_v58  ;;  %v1685_v9 = vrot.slane %v1684_v39, 4 }
 0x19b   :  { %v1665_v28 = vsel %vm1087_vm7, %v1638_v1, %v1664_v49  ;;  %v1650_v41 = vadd.f32 %v1649_v12, %v1648_v16  ;;  %v4822_v19 = vadd.f32 %v1587_v18, %v4729_v24  ;;  %v4826_v21 = vsel %vm944_vm2, %v1696_v2, 0.0 }
 0x19c   :  { %v4817_v5 = vmax.f32 %v2257_v51, %v2258_v57  ;;  %v1666_v3 = vsel %vm1089_vm8, %v1645_v33, %v1665_v28  ;;  %v1686_v10 = vadd.f32 %v1685_v9, %v1684_v39  ;;  %v1708_v62 = vmul.f32 %v5226_v27, %v4097_v42 }
 0x19d   :  { %v1651_v14 = vrot.slane %v1650_v41, 1  ;;  %v1709_v60 = vmul.f32 %v5226_v27, %v4101_v45  ;;  %v1710_v53 = vmul.f32 %v5226_v27, %v4132_v40  ;;  %v1711_v9 = vmul.f32 %v5226_v27, %v4138_v46 }
 0x19e   :  { %v2260_v6 = vsub.f32 %v2237_v34, %v4817_v5  ;;  %v2261_v1 = vsub.f32 %v2238_v15, %v4817_v5  ;;  %v2262_v32 = vsub.f32 %v2239_v35, %v4817_v5  ;;  %v2263_v37 = vsub.f32 %v2240_v4, %v4817_v5 }
 0x19f   :  { %v2264_v43 = vsub.f32 %v2241_v63, %v4817_v5  ;;  %v2265_v24 = vsub.f32 %v2242_v25, %v4817_v5  ;;  %v2266_v18 = vsub.f32 %v2243_v56, %v4817_v5  ;;  %v2267_v0 = vsub.f32 %v2244_v13, %v4817_v5 }
 0x1a0   :  { %v2268_v20 = vmul.f32 1.442695, %v2260_v6  ;;  %v2270_v26 = vmul.f32 1.442695, %v2261_v1  ;;  %v2272_v30 = vmul.f32 1.442695, %v2262_v32  ;;  %v1652_v22 = vadd.f32 %v1651_v14, %v1650_v41 }
 0x1a1   :  { %v2274_v58 = vmul.f32 1.442695, %v2263_v37  ;;  %v1704_v34 = vmul.f32 %v5226_v27, %v4046_v36  ;;  %v1705_v15 = vmul.f32 %v5226_v27, %v4044_v23  ;;  %v1706_v35 = vmul.f32 %v5226_v27, %v4078_v54 }
 0x1a2   :  { %3435 = vpow2.f32 %v2268_v20  ;;  %v2276_v63 = vmul.f32 1.442695, %v2264_v43  ;;  %v1667_v4 = vsel %vm1091_vm9, %v1652_v22, %v1666_v3  ;;  %v1707_v25 = vmul.f32 %v5226_v27, %v4080_v55 }
 0x1a3   :  { %3437 = vpow2.f32 %v2270_v26  ;;  %v2278_v56 = vmul.f32 1.442695, %v2265_v24  ;;  %v1669_v13 = vmul.f32 %v4036_v17, %v1667_v4  ;;  %v1687_v50 = vrot.slane %v1686_v10, 2 }
 0x1a4   :  { %3439 = vpow2.f32 %v2272_v30  ;;  %v2280_v31 = vmul.f32 1.442695, %v2266_v18  ;;  %v2282_v16 = vmul.f32 1.442695, %v2267_v0  ;;  %v1712_v12 = vsel %vm944_vm2, %v1704_v34, 0.0 }
 0x1a5   :  { %3441 = vpow2.f32 %v2274_v58  ;;  %v1670_v8 = vsel %vm944_vm2, %v1669_v13, 0.0  ;;  %v1688_v51 = vadd.f32 %v1687_v50, %v1686_v10  ;;  %v1719_v17 = vsel %vm944_vm2, %v1705_v15, 0.0 }
 0x1a6   :  { %3443 = vpow2.f32 %v2276_v63  ;;  %v1671_v29 = vrot.slane %v1670_v8, 4  ;;  %v1713_v39 = vrot.slane %v1712_v12, 4  ;;  %v1720_v57 = vrot.slane %v1719_v17, 4 }
 0x1a7   :  { %3445 = vpow2.f32 %v2278_v56  ;;  %v1689_v49 = vrot.slane %v1688_v51, 1  ;;  %v1726_v33 = vsel %vm944_vm2, %v1706_v35, 0.0  ;;  %v1733_v6 = vsel %vm944_vm2, %v1707_v25, 0.0 }
 0x1a8   :  { %3447 = vpow2.f32 %v2280_v31  ;;  %v1672_v2 = vadd.f32 %v1671_v29, %v1670_v8  ;;  %v1714_v41 = vadd.f32 %v1713_v39, %v1712_v12  ;;  %v1721_v3 = vadd.f32 %v1720_v57, %v1719_v17 }
 0x1a9   :  { %3449 = vpow2.f32 %v2282_v16  ;;  %v1690_v28 = vadd.f32 %v1689_v49, %v1688_v51  ;;  %v1727_v10 = vrot.slane %v1726_v33, 4  ;;  %v1734_v37 = vrot.slane %v1733_v6, 4 }
 0x1aa   :  { %v1673_v14 = vrot.slane %v1672_v2, 2  ;;  %v1715_v32 = vrot.slane %v1714_v41, 2  ;;  %v1740_v43 = vsel %vm944_vm2, %v1708_v62, 0.0  ;;  %v1722_v18 = vrot.slane %v1721_v3, 2 }
 0x1ab   :  { %v4860_v1 = vmul.f32 %v4766_v59, %v1690_v28  ;;  %v1728_v0 = vadd.f32 %v1727_v10, %v1726_v33  ;;  %v1741_v20 = vrot.slane %v1740_v43, 4  ;;  %v1735_v30 = vadd.f32 %v1734_v37, %v1733_v6 }
 0x1ac   :  { %v1674_v24 = vadd.f32 %v1673_v14, %v1672_v2  ;;  %v1716_v27 = vadd.f32 %v1715_v32, %v1714_v41  ;;  %v1747_v22 = vsel %vm944_vm2, %v1709_v60, 0.0  ;;  %v1723_v34 = vadd.f32 %v1722_v18, %v1721_v3 }
 0x1ad   :  { %v1693_v26 = vrot.slane %v4860_v1, 7  ;;  %v1729_v15 = vrot.slane %v1728_v0, 2  ;;  %v1742_v35 = vadd.f32 %v1741_v20, %v1740_v43  ;;  %v1736_v25 = vrot.slane %v1735_v30, 2 }
 0x1ae   :  { %v1675_v58 = vrot.slane %v1674_v24, 1  ;;  %v1717_v4 = vrot.slane %v1716_v27, 1  ;;  %v1748_v56 = vrot.slane %v1747_v22, 4  ;;  %v1754_v13 = vsel %vm944_vm2, %v1710_v53, 0.0 }
 0x1af   :  { %v3436_v63 = vpop.eup %3435  ;;  %v1724_v62 = vrot.slane %v1723_v34, 1  ;;  %v1730_v8 = vadd.f32 %v1729_v15, %v1728_v0  ;;  %v1737_v12 = vadd.f32 %v1736_v25, %v1735_v30  ;;  %v1743_v17 = vrot.slane %v1742_v35, 2 }
 0x1b0   :  { %v3438_v50 = vpop.eup %3437  ;;  %v2284_v31 = vsel %vm944_vm2, %v3436_v63, 0.0  ;;  %v1676_v16 = vadd.f32 %v1675_v58, %v1674_v24  ;;  %v1718_v60 = vadd.f32 %v1717_v4, %v1716_v27  ;;  %v1749_v32 = vadd.f32 %v1748_v56, %v1747_v22 }
 0x1b1   :  { %v3440_v51 = vpop.eup %3439  ;;  %v2285_v29 = vsel %vm944_vm2, %v3438_v50, 0.0  ;;  %v1725_v33 = vadd.f32 %v1724_v62, %v1723_v34  ;;  %v1731_v41 = vrot.slane %v1730_v8, 1  ;;  %v1738_v14 = vrot.slane %v1737_v12, 1 }
 0x1b2   :  { %v3442_v49 = vpop.eup %3441  ;;  %v2286_v39 = vadd.f32 %v2285_v29, %v2284_v31  ;;  %v2287_v2 = vsel %vm944_vm2, %v3440_v51, 0.0  ;;  %v1677_v57 = vadd.f32 %v1676_v16, %v4822_v19  ;;  %v1744_v3 = vadd.f32 %v1743_v17, %v1742_v35 }
 0x1b3   :  { %v3444_v53 = vpop.eup %3443  ;;  %v2289_v28 = vsel %vm944_vm2, %v3442_v49, 0.0  ;;  %v1755_v37 = vrot.slane %v1754_v13, 4  ;;  %v1732_v24 = vadd.f32 %v1731_v41, %v1730_v8  ;;  %v1739_v18 = vadd.f32 %v1738_v14, %v1737_v12 }
 0x1b4   :  { %v3446_v10 = vpop.eup %3445  ;;  %v2288_v6 = vadd.f32 %v2287_v2, %v2286_v39  ;;  %v1678_v1 = vmul.f32 %v4766_v59, %v1677_v57  ;;  %v1745_v0 = vrot.slane %v1744_v3, 1  ;;  %v1761_v20 = vsel %vm944_vm2, %v1711_v9, 0.0 }
 0x1b5   :  { %v3448_v43 = vpop.eup %3447  ;;  %v1750_v30 = vrot.slane %v1749_v32, 2  ;;  %v1756_v58 = vadd.f32 %v1755_v37, %v1754_v13  ;;  %v1762_v34 = vrot.slane %v1761_v20, 4  ;;  %v1776_v35 = vsel %vm1079_vm3, %v1725_v33, %v1718_v60 }
 0x1b6   :  { %v3450_v19 = vpop.eup %3449  ;;  %v1680_v27 = vrot.slane %v1678_v1, 6  ;;  %v1746_v15 = vadd.f32 %v1745_v0, %v1744_v3  ;;  %v2290_v63 = vadd.f32 %v2289_v28, %v2288_v6  ;;  %v2291_v4 = vsel %vm944_vm2, %v3444_v53, 0.0 }
 0x1b7   :  { %v1751_v25 = vadd.f32 %v1750_v30, %v1749_v32  ;;  %v1757_v56 = vrot.slane %v1756_v58, 2  ;;  %v1763_v50 = vadd.f32 %v1762_v34, %v1761_v20  ;;  %v1698_v31 = vrot.slane %v4826_v21, 4  ;;  %v5227_v34 = vld [vmem:[#allocation7_spill] sm:$0xff] }
 0x1b8   :  { %v1682_v22 = vadd.f32 %v1680_v27, %v4803_v52  ;;  %v1777_v9 = vsel %vm1081_vm4, %v1732_v24, %v1776_v35  ;;  %v2292_v16 = vadd.f32 %v2291_v4, %v2290_v63  ;;  %v2293_v62 = vsel %vm944_vm2, %v3446_v10, 0.0 }
 0x1b9   :  { %v1752_v8 = vrot.slane %v1751_v25, 1  ;;  %v1758_v51 = vadd.f32 %v1757_v56, %v1756_v58  ;;  %v1764_v29 = vrot.slane %v1763_v50, 2  ;;  %v1778_v60 = vsel %vm1083_vm5, %v1739_v18, %v1777_v9 }
 0x1ba   :  { %v1695_v13 = vadd.f32 %v1693_v26, %v1682_v22  ;;  %v2294_v12 = vadd.f32 %v2293_v62, %v2292_v16  ;;  %v2295_v17 = vsel %vm944_vm2, %v3448_v43, 0.0  ;;  %v1779_v2 = vsel %vm1085_vm6, %v1746_v15, %v1778_v60 }
 0x1bb   :  { %v1753_v52 = vadd.f32 %v1752_v8, %v1751_v25  ;;  %v1759_v49 = vrot.slane %v1758_v51, 1  ;;  %v1765_v39 = vadd.f32 %v1764_v29, %v1763_v50  ;;  %v1699_v57 = vadd.f32 %v1698_v31, %v4826_v21 }
 0x1bc   :  { %v2296_v33 = vadd.f32 %v2295_v17, %v2294_v12  ;;  %v2297_v41 = vsel %vm944_vm2, %v3450_v19, 0.0  ;;  %v5228_v15 = vrot.slane %v5206_v47, %v5227_v34 }
 0x1bd   :  { %v1760_v53 = vadd.f32 %v1759_v49, %v1758_v51  ;;  %v1766_v28 = vrot.slane %v1765_v39, 1  ;;  %v1780_v26 = vsel %vm1087_vm7, %v1753_v52, %v1779_v2  ;;  %v1700_v6 = vrot.slane %v1699_v57, 2 }
 0x1be   :  { %v2298_v14 = vadd.f32 %v2297_v41, %v2296_v33  ;;  %vm2306_vm11 = vcmp.eq.s32.totalorder %v5228_v15, 1 }
 0x1bf   :  { %v1767_v3 = vadd.f32 %v1766_v28, %v1765_v39  ;;  %v1781_v10 = vsel %vm1089_vm8, %v1760_v53, %v1780_v26  ;;  %v1701_v21 = vadd.f32 %v1700_v6, %v1699_v57 }
 0x1c0   :  { %3451 = vlog2.f32 %v2298_v14 }
 0x1c1   :  { %v1782_v1 = vsel %vm1091_vm9, %v1767_v3, %v1781_v10  ;;  %v1702_v18 = vrot.slane %v1701_v21, 1 }
 0x1c2   :  { %v1784_v32 = vmul.f32 %v5193_v61, %v1782_v1 }
 0x1c3   :  { %v1703_v19 = vadd.f32 %v1702_v18, %v1701_v21 }
 0x1c4   :  { %v1785_v37 = vsel %vm944_vm2, %v1784_v32, 0.0 }
 0x1c5   :  { %v1786_v43 = vrot.slane %v1785_v37, 4 }
 0x1c7   :  { %v1787_v24 = vadd.f32 %v1786_v43, %v1785_v37 }
 0x1c9   :  { %v1788_v0 = vrot.slane %v1787_v24, 2 }
 0x1cb   :  { %v1789_v20 = vadd.f32 %v1788_v0, %v1787_v24 }
 0x1cd   :  { %v3452_v27 = vpop.eup %3451  ;;  %v1790_v30 = vrot.slane %v1789_v20, 1 }
 0x1ce   :  { %v2300_v58 = vmul.f32 0.6931472, %v3452_v27 }
 0x1cf   :  { %v1791_v35 = vadd.f32 %v1790_v30, %v1789_v20 }
 0x1d0   :  { %v2301_v63 = vadd.f32 %v2300_v58, %v4817_v5 }
 0x1d1   :  { %v1792_v61 = vadd.f32 %v1791_v35, %v1703_v19 }
 0x1d2   :  { %v4894_v4 = vsel %vm2306_vm11, %v2301_v63, %v4743_v44 }
 0x1d3   :  { %v1793_v22 = vmul.f32 %v4766_v59, %v1792_v61  ;;  %v2309_v25 = vcombine.high %v4894_v4, %v4894_v4  ;;  %v2316_v56 = vrot.slane %v4894_v4, %v4052_v38 }
 0x1d5   :  { %v1795_v50 = vrot.slane %v1793_v22, 7  ;;  %v2323_v31 = vrot.slane %v2309_v25, %v4052_v38  ;;  %v2324_v9 = vcombine.high %v2316_v56, %v2316_v56  ;;  %v2332_v16 = vrot.slane %v2316_v56, %v4052_v38 }
 0x1d7   :  { %v4903_v62 = vadd.f32 %v1795_v50, %v1695_v13  ;;  %v2325_v5 = vcombine.high %v2323_v31, %v2323_v31  ;;  %v2339_v44 = vrot.slane %v2323_v31, %v4052_v38  ;;  %v2346_v8 = vrot.slane %v2324_v9, %v4052_v38 }
 0x1d8   :  { %v2354_v59 = vcombine.high %v2332_v16, %v2332_v16  ;;  %v2361_v51 = vrot.slane %v2332_v16, %v3622_v7 }
 0x1d9   :  { %v2353_v29 = vrot.slane %v2325_v5, %v4052_v38  ;;  %v2355_v60 = vcombine.high %v2339_v44, %v2339_v44  ;;  %v2356_v12 = vcombine.high %v2346_v8, %v2346_v8  ;;  %v2365_v17 = vrot.slane %v2346_v8, %v3622_v7 }
 0x1da   :  { %v2369_v52 = vrot.slane %v2354_v59, %v3622_v7  ;;  %v2377_v49 = vrot.slane %v2339_v44, %v3622_v7  ;;  %v2398_v13 = vadd.f32 %v2361_v51, %v4046_v36 }
 0x1db   :  { %v2357_v39 = vcombine.high %v2353_v29, %v2353_v29  ;;  %v2373_v2 = vrot.slane %v2356_v12, %v3622_v7  ;;  %v2381_v57 = vrot.slane %v2353_v29, %v3622_v7  ;;  %v2385_v33 = vrot.slane %v2355_v60, %v3622_v7 }
 0x1dc   :  { %v2399_v53 = vadd.f32 %v2365_v17, %v4044_v23  ;;  %v2400_v28 = vadd.f32 %v2369_v52, %v4078_v54  ;;  %v2402_v26 = vadd.f32 %v2377_v49, %v4097_v42  ;;  %v2406_v6 = vadd.f32 %v2398_v13, %v4335_v11 }
 0x1dd   :  { %v2389_v41 = vrot.slane %v2357_v39, %v3622_v7  ;;  %v2401_v14 = vadd.f32 %v2373_v2, %v4080_v55  ;;  %v2403_v3 = vadd.f32 %v2381_v57, %v4101_v45  ;;  %v2404_v10 = vadd.f32 %v2385_v33, %v4132_v40 }
 0x1de   :  { %v2407_v1 = vadd.f32 %v2399_v53, %v4335_v11  ;;  %v2408_v32 = vadd.f32 %v2400_v28, %v4335_v11  ;;  %v2410_v37 = vadd.f32 %v2402_v26, %v4335_v11  ;;  %v2414_v34 = vsel %vm944_vm2, %v2406_v6, -inf }
 0x1df   :  { %v2405_v21 = vadd.f32 %v2389_v41, %v4138_v46  ;;  %v2409_v43 = vadd.f32 %v2401_v14, %v4335_v11  ;;  %v2411_v24 = vadd.f32 %v2403_v3, %v4335_v11  ;;  %v2412_v18 = vadd.f32 %v2404_v10, %v4335_v11 }
 0x1e0   :  { %v2415_v20 = vsel %vm944_vm2, %v2407_v1, -inf  ;;  %v2418_v27 = vsel %vm944_vm2, %v2410_v37, -inf  ;;  %v2416_v15 = vsel %vm944_vm2, %v2408_v32, -inf }
 0x1e1   :  { %v2413_v0 = vadd.f32 %v2405_v21, %v4335_v11  ;;  %v2420_v19 = vsel %vm944_vm2, %v2411_v24, -inf  ;;  %v2422_v58 = vsel %vm944_vm2, %v2412_v18, -inf  ;;  %v2417_v35 = vsel %vm944_vm2, %v2409_v43, -inf }
 0x1e2   :  { %v2421_v30 = vmax.f32 %v2415_v20, %v2420_v19  ;;  %v2419_v61 = vmax.f32 %v2414_v34, %v2418_v27  ;;  %v2423_v22 = vmax.f32 %v2416_v15, %v2422_v58  ;;  %v5229_v15 = vld [vmem:[#allocation9_spill] sm:$0xff] }
 0x1e3   :  { %v2424_v63 = vsel %vm944_vm2, %v2413_v0, -inf }
 0x1e4   :  { %v2425_v11 = vmax.f32 %v2417_v35, %v2424_v63  ;;  %v2426_v25 = vmax.f32 %v2419_v61, %v2421_v30  ;;  %v5230_v35 = vrot.slane %v5206_v47, %v5229_v15 }
 0x1e6   :  { %v2427_v56 = vmax.f32 %v2423_v22, %v2425_v11  ;;  %vm2475_vm12 = vcmp.eq.s32.totalorder %v5230_v35, 1 }
 0x1e8   :  { %v2428_v50 = vmax.f32 %v2426_v25, %v2427_v56 }
 0x1ea   :  { %v2429_v31 = vsub.f32 %v2406_v6, %v2428_v50  ;;  %v2430_v9 = vsub.f32 %v2407_v1, %v2428_v50  ;;  %v2431_v16 = vsub.f32 %v2408_v32, %v2428_v50  ;;  %v2432_v5 = vsub.f32 %v2409_v43, %v2428_v50 }
 0x1eb   :  { %v2433_v44 = vsub.f32 %v2410_v37, %v2428_v50  ;;  %v2434_v29 = vsub.f32 %v2411_v24, %v2428_v50  ;;  %v2435_v12 = vsub.f32 %v2412_v18, %v2428_v50  ;;  %v2436_v52 = vsub.f32 %v2413_v0, %v2428_v50 }
 0x1ec   :  { %v2437_v8 = vmul.f32 1.442695, %v2429_v31  ;;  %v2439_v59 = vmul.f32 1.442695, %v2430_v9  ;;  %v2441_v51 = vmul.f32 1.442695, %v2431_v16 }
 0x1ed   :  { %v2443_v60 = vmul.f32 1.442695, %v2432_v5  ;;  %v2445_v17 = vmul.f32 1.442695, %v2433_v44  ;;  %v2447_v49 = vmul.f32 1.442695, %v2434_v29 }
 0x1ee   :  { %3453 = vpow2.f32 %v2437_v8  ;;  %v2449_v13 = vmul.f32 1.442695, %v2435_v12  ;;  %v2451_v39 = vmul.f32 1.442695, %v2436_v52 }
 0x1ef   :  { %3455 = vpow2.f32 %v2439_v59 }
 0x1f0   :  { %3457 = vpow2.f32 %v2441_v51 }
 0x1f1   :  { %3459 = vpow2.f32 %v2443_v60 }
 0x1f2   :  { %3461 = vpow2.f32 %v2445_v17 }
 0x1f3   :  { %3463 = vpow2.f32 %v2447_v49 }
 0x1f4   :  { %3465 = vpow2.f32 %v2449_v13 }
 0x1f5   :  { %3467 = vpow2.f32 %v2451_v39 }
 0x1fb   :  { %v3454_v2 = vpop.eup %3453 }
 0x1fc   :  { %v3456_v57 = vpop.eup %3455  ;;  %v2453_v33 = vsel %vm944_vm2, %v3454_v2, 0.0 }
 0x1fd   :  { %v3458_v53 = vpop.eup %3457  ;;  %v2454_v28 = vsel %vm944_vm2, %v3456_v57, 0.0 }
 0x1fe   :  { %v3460_v26 = vpop.eup %3459  ;;  %v2455_v41 = vadd.f32 %v2454_v28, %v2453_v33  ;;  %v2456_v14 = vsel %vm944_vm2, %v3458_v53, 0.0 }
 0x1ff   :  { %v3462_v3 = vpop.eup %3461  ;;  %v2458_v6 = vsel %vm944_vm2, %v3460_v26, 0.0 }
 0x200   :  { %v2457_v10 = vadd.f32 %v2456_v14, %v2455_v41  ;;  %v3464_v1 = vpop.eup %3463  ;;  %v2460_v37 = vsel %vm944_vm2, %v3462_v3, 0.0  ;;  %v5231_v41 = vld [vmem:[#allocation29_spill] sm:$0xff] }
 0x201   :  { %v3466_v21 = vpop.eup %3465  ;;  %v2462_v24 = vsel %vm944_vm2, %v3464_v1, 0.0 }
 0x202   :  { %v2459_v32 = vadd.f32 %v2458_v6, %v2457_v10  ;;  %v3468_v18 = vpop.eup %3467  ;;  %v2464_v20 = vsel %vm944_vm2, %v3466_v21, 0.0 }
 0x203   :  { %v2466_v19 = vsel %vm944_vm2, %v3468_v18, 0.0 }
 0x204   :  { %v2461_v43 = vadd.f32 %v2460_v37, %v2459_v32 }
 0x206   :  { %v2463_v0 = vadd.f32 %v2462_v24, %v2461_v43 }
 0x208   :  { %v2465_v27 = vadd.f32 %v2464_v20, %v2463_v0 }
 0x20a   :  { %v2467_v30 = vadd.f32 %v2466_v19, %v2465_v27 }
 0x20c   :  { %3469 = vlog2.f32 %v2467_v30 }
 0x219   :  { %v3470_v58 = vpop.eup %3469 }
 0x21a   :  { %v2469_v34 = vmul.f32 0.6931472, %v3470_v58 }
 0x21c   :  { %v2470_v63 = vadd.f32 %v2469_v34, %v2428_v50 }
 0x21e   :  { %v4952_v61 = vsel %vm2475_vm12, %v2470_v63, %v4894_v4 }
 0x21f   :  { %v2478_v22 = vcombine.high %v4952_v61, %v4952_v61  ;;  %v2485_v11 = vrot.slane %v4952_v61, %v4052_v38 }
 0x221   :  { %v2492_v25 = vrot.slane %v2478_v22, %v4052_v38  ;;  %v2493_v56 = vcombine.high %v2485_v11, %v2485_v11  ;;  %v2501_v31 = vrot.slane %v2485_v11, %v4052_v38 }
 0x223   :  { %v2494_v9 = vcombine.high %v2492_v25, %v2492_v25  ;;  %v2508_v16 = vrot.slane %v2492_v25, %v4052_v38  ;;  %v2515_v5 = vrot.slane %v2493_v56, %v4052_v38  ;;  %v2523_v50 = vcombine.high %v2501_v31, %v2501_v31 }
 0x224   :  { %v2530_v4 = vrot.slane %v2501_v31, %v3622_v7 }
 0x225   :  { %v2522_v44 = vrot.slane %v2494_v9, %v4052_v38  ;;  %v2524_v8 = vcombine.high %v2508_v16, %v2508_v16  ;;  %v2525_v59 = vcombine.high %v2515_v5, %v2515_v5  ;;  %v2534_v51 = vrot.slane %v2515_v5, %v3622_v7 }
 0x226   :  { %v2538_v29 = vrot.slane %v2523_v50, %v3622_v7  ;;  %v2546_v60 = vrot.slane %v2508_v16, %v3622_v7  ;;  %v2567_v12 = vadd.f32 %v2530_v4, %v4046_v36 }
 0x227   :  { %v2526_v17 = vcombine.high %v2522_v44, %v2522_v44  ;;  %v2542_v52 = vrot.slane %v2525_v59, %v3622_v7  ;;  %v2550_v49 = vrot.slane %v2522_v44, %v3622_v7  ;;  %v2554_v13 = vrot.slane %v2524_v8, %v3622_v7 }
 0x228   :  { %v2568_v39 = vadd.f32 %v2534_v51, %v4044_v23  ;;  %v2569_v2 = vadd.f32 %v2538_v29, %v4078_v54  ;;  %v2571_v57 = vadd.f32 %v2546_v60, %v4097_v42  ;;  %v2575_v14 = vadd.f32 %v2567_v12, %v5231_v41 }
 0x229   :  { %v2558_v33 = vrot.slane %v2526_v17, %v3622_v7  ;;  %v2570_v53 = vadd.f32 %v2542_v52, %v4080_v55  ;;  %v2572_v28 = vadd.f32 %v2550_v49, %v4101_v45  ;;  %v2573_v26 = vadd.f32 %v2554_v13, %v4132_v40 }
 0x22a   :  { %v2576_v3 = vadd.f32 %v2568_v39, %v5231_v41  ;;  %v2577_v10 = vadd.f32 %v2569_v2, %v5231_v41  ;;  %v2579_v6 = vadd.f32 %v2571_v57, %v5231_v41  ;;  %v2583_v19 = vsel %vm944_vm2, %v2575_v14, -inf }
 0x22b   :  { %v2574_v1 = vadd.f32 %v2558_v33, %v4138_v46  ;;  %v2578_v32 = vadd.f32 %v2570_v53, %v5231_v41  ;;  %v2580_v37 = vadd.f32 %v2572_v28, %v5231_v41  ;;  %v2581_v21 = vadd.f32 %v2573_v26, %v5231_v41 }
 0x22c   :  { %v2584_v24 = vsel %vm944_vm2, %v2576_v3, -inf  ;;  %v2587_v18 = vsel %vm944_vm2, %v2579_v6, -inf  ;;  %v2585_v30 = vsel %vm944_vm2, %v2577_v10, -inf }
 0x22d   :  { %v2582_v43 = vadd.f32 %v2574_v1, %v5231_v41  ;;  %v2589_v0 = vsel %vm944_vm2, %v2580_v37, -inf  ;;  %v2591_v27 = vsel %vm944_vm2, %v2581_v21, -inf  ;;  %v2586_v58 = vsel %vm944_vm2, %v2578_v32, -inf }
 0x22e   :  { %v2590_v20 = vmax.f32 %v2584_v24, %v2589_v0  ;;  %v2588_v15 = vmax.f32 %v2583_v19, %v2587_v18  ;;  %v2592_v35 = vmax.f32 %v2585_v30, %v2591_v27  ;;  %v5232_v30 = vld [vmem:[#allocation10_spill] sm:$0xff] }
 0x22f   :  { %v2593_v34 = vsel %vm944_vm2, %v2582_v43, -inf }
 0x230   :  { %v2594_v63 = vmax.f32 %v2586_v58, %v2593_v34  ;;  %v2595_v22 = vmax.f32 %v2588_v15, %v2590_v20  ;;  %v5233_v58 = vrot.slane %v5206_v47, %v5232_v30 }
 0x232   :  { %v2596_v11 = vmax.f32 %v2592_v35, %v2594_v63  ;;  %vm2644_vm13 = vcmp.eq.s32.totalorder %v5233_v58, 1 }
 0x234   :  { %v2597_v25 = vmax.f32 %v2595_v22, %v2596_v11 }
 0x236   :  { %v2598_v56 = vsub.f32 %v2575_v14, %v2597_v25  ;;  %v2599_v31 = vsub.f32 %v2576_v3, %v2597_v25  ;;  %v2600_v9 = vsub.f32 %v2577_v10, %v2597_v25  ;;  %v2601_v16 = vsub.f32 %v2578_v32, %v2597_v25 }
 0x237   :  { %v2602_v5 = vsub.f32 %v2579_v6, %v2597_v25  ;;  %v2603_v8 = vsub.f32 %v2580_v37, %v2597_v25  ;;  %v2604_v51 = vsub.f32 %v2581_v21, %v2597_v25  ;;  %v2605_v60 = vsub.f32 %v2582_v43, %v2597_v25 }
 0x238   :  { %v2606_v50 = vmul.f32 1.442695, %v2598_v56  ;;  %v2608_v4 = vmul.f32 1.442695, %v2599_v31  ;;  %v2610_v44 = vmul.f32 1.442695, %v2600_v9 }
 0x239   :  { %v2612_v59 = vmul.f32 1.442695, %v2601_v16  ;;  %v2614_v29 = vmul.f32 1.442695, %v2602_v5  ;;  %v2616_v12 = vmul.f32 1.442695, %v2603_v8 }
 0x23a   :  { %3471 = vpow2.f32 %v2606_v50  ;;  %v2618_v17 = vmul.f32 1.442695, %v2604_v51  ;;  %v2620_v52 = vmul.f32 1.442695, %v2605_v60 }
 0x23b   :  { %3473 = vpow2.f32 %v2608_v4 }
 0x23c   :  { %3475 = vpow2.f32 %v2610_v44 }
 0x23d   :  { %3477 = vpow2.f32 %v2612_v59 }
 0x23e   :  { %3479 = vpow2.f32 %v2614_v29 }
 0x23f   :  { %3481 = vpow2.f32 %v2616_v12 }
 0x240   :  { %3483 = vpow2.f32 %v2618_v17 }
 0x241   :  { %3485 = vpow2.f32 %v2620_v52 }
 0x247   :  { %v3472_v49 = vpop.eup %3471 }
 0x248   :  { %v3474_v13 = vpop.eup %3473  ;;  %v2622_v39 = vsel %vm944_vm2, %v3472_v49, 0.0 }
 0x249   :  { %v3476_v2 = vpop.eup %3475  ;;  %v2623_v57 = vsel %vm944_vm2, %v3474_v13, 0.0 }
 0x24a   :  { %v3478_v33 = vpop.eup %3477  ;;  %v2624_v53 = vadd.f32 %v2623_v57, %v2622_v39  ;;  %v2625_v28 = vsel %vm944_vm2, %v3476_v2, 0.0 }
 0x24b   :  { %v3480_v26 = vpop.eup %3479  ;;  %v2627_v14 = vsel %vm944_vm2, %v3478_v33, 0.0 }
 0x24c   :  { %v2626_v41 = vadd.f32 %v2625_v28, %v2624_v53  ;;  %v3482_v3 = vpop.eup %3481  ;;  %v2629_v6 = vsel %vm944_vm2, %v3480_v26, 0.0  ;;  %v5234_v53 = vld [vmem:[#allocation30_spill] sm:$0xff] }
 0x24d   :  { %v3484_v1 = vpop.eup %3483  ;;  %v2631_v37 = vsel %vm944_vm2, %v3482_v3, 0.0 }
 0x24e   :  { %v2628_v10 = vadd.f32 %v2627_v14, %v2626_v41  ;;  %v3486_v21 = vpop.eup %3485  ;;  %v2633_v24 = vsel %vm944_vm2, %v3484_v1, 0.0 }
 0x24f   :  { %v2635_v0 = vsel %vm944_vm2, %v3486_v21, 0.0 }
 0x250   :  { %v2630_v32 = vadd.f32 %v2629_v6, %v2628_v10 }
 0x252   :  { %v2632_v43 = vadd.f32 %v2631_v37, %v2630_v32 }
 0x254   :  { %v2634_v18 = vadd.f32 %v2633_v24, %v2632_v43 }
 0x256   :  { %v2636_v20 = vadd.f32 %v2635_v0, %v2634_v18 }
 0x258   :  { %3487 = vlog2.f32 %v2636_v20 }
 0x265   :  { %v3488_v27 = vpop.eup %3487 }
 0x266   :  { %v2638_v19 = vmul.f32 0.6931472, %v3488_v27 }
 0x268   :  { %v2639_v34 = vadd.f32 %v2638_v19, %v2597_v25 }
 0x26a   :  { %v5007_v15 = vsel %vm2644_vm13, %v2639_v34, %v4952_v61 }
 0x26b   :  { %v2647_v35 = vcombine.high %v5007_v15, %v5007_v15  ;;  %v2654_v63 = vrot.slane %v5007_v15, %v4052_v38 }
 0x26d   :  { %v2661_v22 = vrot.slane %v2647_v35, %v4052_v38  ;;  %v2662_v11 = vcombine.high %v2654_v63, %v2654_v63  ;;  %v2670_v56 = vrot.slane %v2654_v63, %v4052_v38 }
 0x26f   :  { %v2663_v31 = vcombine.high %v2661_v22, %v2661_v22  ;;  %v2677_v9 = vrot.slane %v2661_v22, %v4052_v38  ;;  %v2684_v16 = vrot.slane %v2662_v11, %v4052_v38  ;;  %v2692_v25 = vcombine.high %v2670_v56, %v2670_v56 }
 0x270   :  { %v2699_v61 = vrot.slane %v2670_v56, %v3622_v7 }
 0x271   :  { %v2691_v5 = vrot.slane %v2663_v31, %v4052_v38  ;;  %v2693_v50 = vcombine.high %v2677_v9, %v2677_v9  ;;  %v2694_v4 = vcombine.high %v2684_v16, %v2684_v16  ;;  %v2703_v44 = vrot.slane %v2684_v16, %v3622_v7 }
 0x272   :  { %v2707_v8 = vrot.slane %v2692_v25, %v3622_v7  ;;  %v2715_v59 = vrot.slane %v2677_v9, %v3622_v7  ;;  %v2736_v51 = vadd.f32 %v2699_v61, %v4046_v36 }
 0x273   :  { %v2695_v29 = vcombine.high %v2691_v5, %v2691_v5  ;;  %v2711_v60 = vrot.slane %v2694_v4, %v3622_v7  ;;  %v2719_v12 = vrot.slane %v2691_v5, %v3622_v7  ;;  %v2723_v17 = vrot.slane %v2693_v50, %v3622_v7 }
 0x274   :  { %v2737_v52 = vadd.f32 %v2703_v44, %v4044_v23  ;;  %v2738_v49 = vadd.f32 %v2707_v8, %v4078_v54  ;;  %v2740_v13 = vadd.f32 %v2715_v59, %v4097_v42  ;;  %v2744_v28 = vadd.f32 %v2736_v51, %v5234_v53 }
 0x275   :  { %v2727_v39 = vrot.slane %v2695_v29, %v3622_v7  ;;  %v2739_v2 = vadd.f32 %v2711_v60, %v4080_v55  ;;  %v2741_v57 = vadd.f32 %v2719_v12, %v4101_v45  ;;  %v2742_v33 = vadd.f32 %v2723_v17, %v4132_v40 }
 0x276   :  { %v2745_v26 = vadd.f32 %v2737_v52, %v5234_v53  ;;  %v2746_v41 = vadd.f32 %v2738_v49, %v5234_v53  ;;  %v2748_v14 = vadd.f32 %v2740_v13, %v5234_v53  ;;  %v2752_v0 = vsel %vm944_vm2, %v2744_v28, -inf }
 0x277   :  { %v2743_v3 = vadd.f32 %v2727_v39, %v4138_v46  ;;  %v2747_v10 = vadd.f32 %v2739_v2, %v5234_v53  ;;  %v2749_v6 = vadd.f32 %v2741_v57, %v5234_v53  ;;  %v2750_v1 = vadd.f32 %v2742_v33, %v5234_v53 }
 0x278   :  { %v2753_v37 = vsel %vm944_vm2, %v2745_v26, -inf  ;;  %v2756_v21 = vsel %vm944_vm2, %v2748_v14, -inf  ;;  %v2754_v20 = vsel %vm944_vm2, %v2746_v41, -inf }
 0x279   :  { %v2751_v32 = vadd.f32 %v2743_v3, %v5234_v53  ;;  %v2758_v43 = vsel %vm944_vm2, %v2749_v6, -inf  ;;  %v2760_v18 = vsel %vm944_vm2, %v2750_v1, -inf  ;;  %v2755_v27 = vsel %vm944_vm2, %v2747_v10, -inf }
 0x27a   :  { %v2759_v24 = vmax.f32 %v2753_v37, %v2758_v43  ;;  %v2757_v30 = vmax.f32 %v2752_v0, %v2756_v21  ;;  %v2761_v58 = vmax.f32 %v2754_v20, %v2760_v18  ;;  %v5235_v20 = vld [vmem:[#allocation11_spill] sm:$0xff] }
 0x27b   :  { %v2762_v19 = vsel %vm944_vm2, %v2751_v32, -inf }
 0x27c   :  { %v2763_v34 = vmax.f32 %v2755_v27, %v2762_v19  ;;  %v2764_v35 = vmax.f32 %v2757_v30, %v2759_v24  ;;  %v5236_v27 = vrot.slane %v5206_v47, %v5235_v20 }
 0x27e   :  { %v2765_v63 = vmax.f32 %v2761_v58, %v2763_v34  ;;  %vm2813_vm14 = vcmp.eq.s32.totalorder %v5236_v27, 1 }
 0x280   :  { %v2766_v22 = vmax.f32 %v2764_v35, %v2765_v63 }
 0x282   :  { %v2767_v11 = vsub.f32 %v2744_v28, %v2766_v22  ;;  %v2768_v56 = vsub.f32 %v2745_v26, %v2766_v22  ;;  %v2769_v31 = vsub.f32 %v2746_v41, %v2766_v22  ;;  %v2770_v9 = vsub.f32 %v2747_v10, %v2766_v22 }
 0x283   :  { %v2771_v16 = vsub.f32 %v2748_v14, %v2766_v22  ;;  %v2772_v50 = vsub.f32 %v2749_v6, %v2766_v22  ;;  %v2773_v44 = vsub.f32 %v2750_v1, %v2766_v22  ;;  %v2774_v59 = vsub.f32 %v2751_v32, %v2766_v22 }
 0x284   :  { %v2775_v25 = vmul.f32 1.442695, %v2767_v11  ;;  %v2777_v61 = vmul.f32 1.442695, %v2768_v56  ;;  %v2779_v5 = vmul.f32 1.442695, %v2769_v31 }
 0x285   :  { %v2781_v4 = vmul.f32 1.442695, %v2770_v9  ;;  %v2783_v8 = vmul.f32 1.442695, %v2771_v16  ;;  %v2785_v51 = vmul.f32 1.442695, %v2772_v50 }
 0x286   :  { %3489 = vpow2.f32 %v2775_v25  ;;  %v2787_v29 = vmul.f32 1.442695, %v2773_v44  ;;  %v2789_v60 = vmul.f32 1.442695, %v2774_v59 }
 0x287   :  { %3491 = vpow2.f32 %v2777_v61 }
 0x288   :  { %3493 = vpow2.f32 %v2779_v5 }
 0x289   :  { %3495 = vpow2.f32 %v2781_v4 }
 0x28a   :  { %3497 = vpow2.f32 %v2783_v8 }
 0x28b   :  { %3499 = vpow2.f32 %v2785_v51 }
 0x28c   :  { %3501 = vpow2.f32 %v2787_v29 }
 0x28d   :  { %3503 = vpow2.f32 %v2789_v60 }
 0x293   :  { %v3490_v12 = vpop.eup %3489 }
 0x294   :  { %v3492_v17 = vpop.eup %3491  ;;  %v2791_v52 = vsel %vm944_vm2, %v3490_v12, 0.0 }
 0x295   :  { %v3494_v49 = vpop.eup %3493  ;;  %v2792_v13 = vsel %vm944_vm2, %v3492_v17, 0.0 }
 0x296   :  { %v3496_v39 = vpop.eup %3495  ;;  %v2793_v2 = vadd.f32 %v2792_v13, %v2791_v52  ;;  %v2794_v57 = vsel %vm944_vm2, %v3494_v49, 0.0 }
 0x297   :  { %v3498_v33 = vpop.eup %3497  ;;  %v2796_v28 = vsel %vm944_vm2, %v3496_v39, 0.0 }
 0x298   :  { %v2795_v53 = vadd.f32 %v2794_v57, %v2793_v2  ;;  %v3500_v26 = vpop.eup %3499  ;;  %v2798_v14 = vsel %vm944_vm2, %v3498_v33, 0.0 }
 0x299   :  { %v3502_v3 = vpop.eup %3501  ;;  %v2800_v6 = vsel %vm944_vm2, %v3500_v26, 0.0 }
 0x29a   :  { %v2797_v41 = vadd.f32 %v2796_v28, %v2795_v53  ;;  %v3504_v1 = vpop.eup %3503  ;;  %v2802_v37 = vsel %vm944_vm2, %v3502_v3, 0.0 }
 0x29b   :  { %v2804_v43 = vsel %vm944_vm2, %v3504_v1, 0.0 }
 0x29c   :  { %v2799_v10 = vadd.f32 %v2798_v14, %v2797_v41 }
 0x29e   :  { %v2801_v32 = vadd.f32 %v2800_v6, %v2799_v10 }
 0x2a0   :  { %v2803_v21 = vadd.f32 %v2802_v37, %v2801_v32 }
 0x2a2   :  { %v2805_v24 = vadd.f32 %v2804_v43, %v2803_v21 }
 0x2a4   :  { %3505 = vlog2.f32 %v2805_v24 }
 0x2b1   :  { %v3506_v18 = vpop.eup %3505 }
 0x2b2   :  { %v2807_v0 = vmul.f32 0.6931472, %v3506_v18 }
 0x2b4   :  { %v2808_v19 = vadd.f32 %v2807_v0, %v2766_v22 }
 0x2b6   :  { %v5062_v30 = vsel %vm2813_vm14, %v2808_v19, %v5007_v15 }
 0x2b7   :  { %v2816_v58 = vcombine.high %v5062_v30, %v5062_v30  ;;  %v2823_v34 = vrot.slane %v5062_v30, %v4052_v38 }
 0x2b9   :  { %v2830_v35 = vrot.slane %v2816_v58, %v4052_v38  ;;  %v2831_v63 = vcombine.high %v2823_v34, %v2823_v34  ;;  %v2839_v11 = vrot.slane %v2823_v34, %v4052_v38 }
 0x2bb   :  { %v2832_v56 = vcombine.high %v2830_v35, %v2830_v35  ;;  %v2846_v31 = vrot.slane %v2830_v35, %v4052_v38  ;;  %v2853_v9 = vrot.slane %v2831_v63, %v4052_v38  ;;  %v2861_v22 = vcombine.high %v2839_v11, %v2839_v11 }
 0x2bc   :  { %v2868_v15 = vrot.slane %v2839_v11, %v3622_v7 }
 0x2bd   :  { %v2860_v16 = vrot.slane %v2832_v56, %v4052_v38  ;;  %v2862_v25 = vcombine.high %v2846_v31, %v2846_v31  ;;  %v2863_v61 = vcombine.high %v2853_v9, %v2853_v9  ;;  %v2872_v5 = vrot.slane %v2853_v9, %v3622_v7 }
 0x2be   :  { %v2876_v50 = vrot.slane %v2861_v22, %v3622_v7  ;;  %v2884_v4 = vrot.slane %v2846_v31, %v3622_v7  ;;  %v2905_v44 = vadd.f32 %v2868_v15, %v4046_v36 }
 0x2bf   :  { %v2864_v8 = vcombine.high %v2860_v16, %v2860_v16  ;;  %v2880_v59 = vrot.slane %v2863_v61, %v3622_v7  ;;  %v2888_v51 = vrot.slane %v2860_v16, %v3622_v7  ;;  %v2892_v29 = vrot.slane %v2862_v25, %v3622_v7 }
 0x2c0   :  { %v2906_v60 = vadd.f32 %v2872_v5, %v4044_v23  ;;  %v2907_v38 = vadd.f32 %v2876_v50, %v4078_v54  ;;  %v2909_v12 = vadd.f32 %v2884_v4, %v4097_v42  ;;  %v2913_v13 = vadd.f32 %v2905_v44, %v4400_v48 }
 0x2c1   :  { %v2896_v17 = vrot.slane %v2864_v8, %v3622_v7  ;;  %v2908_v52 = vadd.f32 %v2880_v59, %v4080_v55  ;;  %v2910_v49 = vadd.f32 %v2888_v51, %v4101_v45  ;;  %v2911_v36 = vadd.f32 %v2892_v29, %v4132_v40 }
 0x2c2   :  { %v2914_v39 = vadd.f32 %v2906_v60, %v4400_v48  ;;  %v2915_v2 = vadd.f32 %v2907_v38, %v4400_v48  ;;  %v2917_v23 = vadd.f32 %v2909_v12, %v4400_v48  ;;  %v2921_v26 = vsel %vm944_vm2, %v2913_v13, -inf }
 0x2c3   :  { %v2912_v54 = vadd.f32 %v2896_v17, %v4138_v46  ;;  %v2916_v42 = vadd.f32 %v2908_v52, %v4400_v48  ;;  %v2918_v7 = vadd.f32 %v2910_v49, %v4400_v48  ;;  %v2919_v55 = vadd.f32 %v2911_v36, %v4400_v48 }
 0x2c4   :  { %v2922_v40 = vsel %vm944_vm2, %v2914_v39, -inf  ;;  %v2925_v57 = vsel %vm944_vm2, %v2917_v23, -inf  ;;  %v2923_v46 = vsel %vm944_vm2, %v2915_v2, -inf }
 0x2c5   :  { %v2920_v45 = vadd.f32 %v2912_v54, %v4400_v48  ;;  %v2927_v33 = vsel %vm944_vm2, %v2918_v7, -inf  ;;  %v2929_v28 = vsel %vm944_vm2, %v2919_v55, -inf  ;;  %v2924_v41 = vsel %vm944_vm2, %v2916_v42, -inf  ;;  %v5237_v54 = vld [vmem:[#allocation12_spill] sm:$0xff] }
 0x2c6   :  { %v2928_v53 = vmax.f32 %v2922_v40, %v2927_v33  ;;  %v2926_v3 = vmax.f32 %v2921_v26, %v2925_v57  ;;  %v2930_v10 = vmax.f32 %v2923_v46, %v2929_v28 }
 0x2c7   :  { %v2931_v14 = vsel %vm944_vm2, %v2920_v45, -inf }
 0x2c8   :  { %v2932_v48 = vmax.f32 %v2924_v41, %v2931_v14  ;;  %v2933_v6 = vmax.f32 %v2926_v3, %v2928_v53 }
 0x2ca   :  { %v2934_v1 = vmax.f32 %v2930_v10, %v2932_v48 }
 0x2cc   :  { %v2935_v32 = vmax.f32 %v2933_v6, %v2934_v1 }
 0x2ce   :  { %v2936_v37 = vsub.f32 %v2913_v13, %v2935_v32  ;;  %v2937_v21 = vsub.f32 %v2914_v39, %v2935_v32  ;;  %v2938_v43 = vsub.f32 %v2915_v2, %v2935_v32  ;;  %v2939_v24 = vsub.f32 %v2916_v42, %v2935_v32 }
 0x2cf   :  { %v2940_v18 = vsub.f32 %v2917_v23, %v2935_v32  ;;  %v2941_v19 = vsub.f32 %v2918_v7, %v2935_v32  ;;  %v2942_v34 = vsub.f32 %v2919_v55, %v2935_v32  ;;  %v2943_v63 = vsub.f32 %v2920_v45, %v2935_v32  ;;  %v5239_v45 = vld [vmem:[#allocation25_spill] sm:$0xff] }
 0x2d0   :  { %v2944_v0 = vmul.f32 1.442695, %v2936_v37  ;;  %v2946_v20 = vmul.f32 1.442695, %v2937_v21  ;;  %v2948_v27 = vmul.f32 1.442695, %v2938_v43  ;;  %v5238_v42 = vrot.slane %v5206_v47, %v5237_v54 }
 0x2d1   :  { %v2950_v58 = vmul.f32 1.442695, %v2939_v24  ;;  %v2952_v35 = vmul.f32 1.442695, %v2940_v18  ;;  %v2954_v11 = vmul.f32 1.442695, %v2941_v19 }
 0x2d2   :  { %3507 = vpow2.f32 %v2944_v0  ;;  %v2956_v56 = vmul.f32 1.442695, %v2942_v34  ;;  %v2958_v31 = vmul.f32 1.442695, %v2943_v63  ;;  %vm2982_vm15 = vcmp.eq.s32.totalorder %v5238_v42, 1  ;;  %v3531_v0 = vld [vmem:[%s5128_s1] sm:$0xff] }
 0x2d3   :  { %3509 = vpow2.f32 %v2946_v20 }
 0x2d4   :  { %3511 = vpow2.f32 %v2948_v27 }
 0x2d5   :  { %3513 = vpow2.f32 %v2950_v58 }
 0x2d6   :  { %3515 = vpow2.f32 %v2952_v35 }
 0x2d7   :  { %3517 = vpow2.f32 %v2954_v11 }
 0x2d8   :  { %3519 = vpow2.f32 %v2956_v56 }
 0x2d9   :  { %3521 = vpow2.f32 %v2958_v31 }
 0x2df   :  { %v3508_v9 = vpop.eup %3507 }
 0x2e0   :  { %v3510_v22 = vpop.eup %3509  ;;  %v2960_v15 = vsel %vm944_vm2, %v3508_v9, 0.0 }
 0x2e1   :  { %v3512_v16 = vpop.eup %3511  ;;  %v2961_v25 = vsel %vm944_vm2, %v3510_v22, 0.0 }
 0x2e2   :  { %v3514_v61 = vpop.eup %3513  ;;  %v2962_v5 = vadd.f32 %v2961_v25, %v2960_v15  ;;  %v2963_v50 = vsel %vm944_vm2, %v3512_v16, 0.0 }
 0x2e3   :  { %v3516_v4 = vpop.eup %3515  ;;  %v2965_v8 = vsel %vm944_vm2, %v3514_v61, 0.0 }
 0x2e4   :  { %v2964_v44 = vadd.f32 %v2963_v50, %v2962_v5  ;;  %v3518_v59 = vpop.eup %3517  ;;  %v2967_v29 = vsel %vm944_vm2, %v3516_v4, 0.0 }
 0x2e5   :  { %v3520_v60 = vpop.eup %3519  ;;  %v2969_v12 = vsel %vm944_vm2, %v3518_v59, 0.0 }
 0x2e6   :  { %v2966_v51 = vadd.f32 %v2965_v8, %v2964_v44  ;;  %v3522_v17 = vpop.eup %3521  ;;  %v2971_v49 = vsel %vm944_vm2, %v3520_v60, 0.0 }
 0x2e7   :  { %v2973_v13 = vsel %vm944_vm2, %v3522_v17, 0.0 }
 0x2e8   :  { %v2968_v38 = vadd.f32 %v2967_v29, %v2966_v51 }
 0x2ea   :  { %v2970_v52 = vadd.f32 %v2969_v12, %v2968_v38 }
 0x2ec   :  { %v2972_v36 = vadd.f32 %v2971_v49, %v2970_v52 }
 0x2ee   :  { %v2974_v39 = vadd.f32 %v2973_v13, %v2972_v36 }
 0x2f0   :  { %3523 = vlog2.f32 %v2974_v39 }
 0x2fd   :  { %v3524_v2 = vpop.eup %3523 }
 0x2fe   :  { %v2976_v23 = vmul.f32 0.6931472, %v3524_v2 }
 0x300   :  { %v2977_v7 = vadd.f32 %v2976_v23, %v2935_v32 }
 0x302   :  { %v2983_v55 = vsel %vm2982_vm15, %v2977_v7, %v5062_v30 }
 0x303   :  { %v2984_v40 = vadd.f32 %v2983_v55, %v5239_v45 }
 0x305   :  { %v2985_v57 = vsel %vm944_vm2, %v2984_v40, -inf }
 0x306   :  { %v2986_v33 = vrot.slane %v2985_v57, 4 }
 0x308   :  { %v2987_v53 = vmax.f32 %v2985_v57, %v2986_v33 }
 0x30a   :  { %v2988_v28 = vrot.slane %v2987_v53, 2 }
 0x30c   :  { %v2989_v26 = vmax.f32 %v2987_v53, %v2988_v28 }
 0x30e   :  { %v2990_v46 = vrot.slane %v2989_v26, 1 }
 0x310   :  { %v2991_v41 = vmax.f32 %v2989_v26, %v2990_v46 }
 0x312   :  { %v2992_v14 = vsub.f32 %v2984_v40, %v2991_v41 }
 0x314   :  { %v2993_v3 = vmul.f32 1.442695, %v2992_v14 }
 0x316   :  { %3525 = vpow2.f32 %v2993_v3 }
 0x323   :  { %v3526_v10 = vpop.eup %3525 }
 0x324   :  { %v2995_v47 = vsel %vm944_vm2, %v3526_v10, 0.0 }
 0x325   :  { %v2996_v48 = vrot.slane %v2995_v47, 4 }
 0x327   :  { %v2997_v6 = vadd.f32 %v2996_v48, %v2995_v47 }
 0x329   :  { %v2998_v1 = vrot.slane %v2997_v6, 2 }
 0x32b   :  { %v2999_v30 = vadd.f32 %v2998_v1, %v2997_v6 }
 0x32d   :  { %v3000_v32 = vrot.slane %v2999_v30, 1 }
 0x32f   :  { %v3001_v37 = vadd.f32 %v3000_v32, %v2999_v30 }
 0x331   :  { %3527 = vlog2.f32 %v3001_v37 }
 0x33e   :  { %v3528_v21 = vpop.eup %3527 }
 0x33f   :  { %v3003_v43 = vmul.f32 0.6931472, %v3528_v21 }
 0x341   :  { %v3004_v24 = vadd.f32 %v3003_v43, %v2991_v41 }
 0x343   :  { %v3005_v18 = vsub.f32 %v3004_v24, %v4903_v62 }
 0x345   :  { %v3006_v20 = vmul.f32 %v3531_v0, %v3005_v18 }
 0x347   :  { %3008 = vst.msk [vmem:[#allocation2] sm:$0x1] %vm3007_vm1, %v3006_v20 }
 0x348   :  { %3543 = shalt.err (!%p3540_p4)
}
 0x349   :  { %3018 = dma.vmem_to_hbm [thread:$0]  %s3016_s14, 16, %s5134_s7, [#allocation3]  }
 0x34a   :  { %3552 = dma.done.wait [#allocation3], 16  }
 0x34b   :  { %3553 = vsyncadd [#allocation3], 4294967280 }
 0x34c   :  { %3022 = vsyncpa [#allocation3], 1 }

</bundles_post_ra>
